<compile_context>
chip_gen: v7x
topology: tpu7x:2x2x1
jax: 0.10.0
libtpu: 0.0.40
codegen_flags: <defaults>
</compile_context>

<pallas_src>
import functools

import jax
import jax.numpy as jnp
from jax.experimental import pallas as pl
from jax.experimental.pallas import tpu as pltpu

POSITIONAL_DIMS = 2
LN_EPS = 1e-5


def _vmem():
    return pl.BlockSpec(memory_space=pltpu.MemorySpace.VMEM)


def _layernorm(x, gamma, beta):
    mu = jnp.mean(x, axis=-1, keepdims=True)
    var = jnp.mean((x - mu) ** 2, axis=-1, keepdims=True)
    return (x - mu) * jax.lax.rsqrt(var + LN_EPS) * gamma + beta


# ----------------------------------------------------------------------------
# Single fused kernel: fc -> +positional -> num_layers x encoder layer -> classifier
# ----------------------------------------------------------------------------
def fused_transformer_kernel(x_ref, fcw_ref, fcb_ref,
                             wqkv_ref, bqkv_ref, wo_ref, bo_ref,
                             g1_ref, be1_ref, w1_ref, b1_ref,
                             w2_ref, b2_ref, g2_ref, be2_ref,
                             cw1_ref, cb1_ref, cw2_ref, cb2_ref,
                             o_ref, *, nhead, num_layers):
    x = x_ref[...]
    B, S, Din = x.shape
    H = wo_ref.shape[-1]
    hd = H // nhead
    scale = 1.0 / (hd ** 0.5)
    n_fc = H - POSITIONAL_DIMS

    # ---- fc: Linear -> Dropout(identity) -> ReLU ----
    x2 = x.reshape(B * S, Din)
    h_fc = jnp.maximum(
        jnp.dot(x2, fcw_ref[...], preferred_element_type=jnp.float32) + fcb_ref[...],
        0.0)                                                    # (B*S, H-2)

    # ---- positional features exp(r), exp(-r) appended as last 2 lanes ----
    r = jax.lax.broadcasted_iota(jnp.int32, (S, POSITIONAL_DIMS), 0).astype(jnp.float32)
    c = jax.lax.broadcasted_iota(jnp.int32, (S, POSITIONAL_DIMS), 1)
    pos = jnp.exp(jnp.where(c == 0, r, -r))                     # (S, 2) = [exp(s), exp(-s)]
    pos = jnp.broadcast_to(pos[None, :, :], (B, S, POSITIONAL_DIMS))
    h = jnp.concatenate([h_fc.reshape(B, S, n_fc), pos], axis=-1)   # (B, S, H)
    h = h.reshape(B * S, H)

    # ---- causal mask, shared across layers & heads ----
    qi = jax.lax.broadcasted_iota(jnp.int32, (S, S), 0)
    ki = jax.lax.broadcasted_iota(jnp.int32, (S, S), 1)
    allowed = (ki <= qi)[None, :, :]                            # (1, S, S)

    # ---- TransformerEncoder stack (post-norm, ReLU FF, causal self-attention) ----
    for li in range(num_layers):
        # fused QKV projection: one matmul + one bias add
        qkv = (jnp.dot(h, wqkv_ref[li], preferred_element_type=jnp.float32)
               + bqkv_ref[li])                                  # (B*S, 3H)

        # split heads; heads stacked along the (major) batch axis -> (nhead*B, S, hd)
        qs, ks, vs = [], [], []
        for hh in range(nhead):
            lo = hh * hd
            qs.append(qkv[:, lo:lo + hd].reshape(B, S, hd))
            ks.append(qkv[:, H + lo:H + lo + hd].reshape(B, S, hd))
            vs.append(qkv[:, 2 * H + lo:2 * H + lo + hd].reshape(B, S, hd))
        qh = jnp.concatenate(qs, axis=0) * scale                # scale folded into Q
        kh = jnp.concatenate(ks, axis=0)
        vh = jnp.concatenate(vs, axis=0)

        # batched-over-heads attention
        s = jnp.einsum('bqd,bkd->bqk', qh, kh,
                       preferred_element_type=jnp.float32)
        s = jnp.where(allowed, s, -1e30)
        p = jnp.exp(s - jnp.max(s, axis=-1, keepdims=True))
        p = p * pl.reciprocal(jnp.sum(p, axis=-1, keepdims=True), approx=True)
        ctx = jnp.einsum('bqk,bkd->bqd', p, vh,
                         preferred_element_type=jnp.float32)    # (nhead*B, S, hd)

        # merge heads back onto the lane axis -> (B*S, H)
        ctx = jnp.concatenate(
            [ctx[hh * B:(hh + 1) * B].reshape(B * S, hd) for hh in range(nhead)],
            axis=-1)

        attn = (jnp.dot(ctx, wo_ref[li], preferred_element_type=jnp.float32)
                + bo_ref[li])

        # residual + LayerNorm 1
        x1 = _layernorm(h + attn, g1_ref[li], be1_ref[li])

        # feed-forward: Linear -> ReLU -> Linear
        hmid = jnp.maximum(
            jnp.dot(x1, w1_ref[li], preferred_element_type=jnp.float32) + b1_ref[li],
            0.0)
        ff = jnp.dot(hmid, w2_ref[li], preferred_element_type=jnp.float32) + b2_ref[li]

        # residual + LayerNorm 2
        h = _layernorm(x1 + ff, g2_ref[li], be2_ref[li])

    # ---- classifier: Linear -> ReLU -> Linear -> LogSoftmax ----
    cm = jnp.maximum(
        jnp.dot(h, cw1_ref[...], preferred_element_type=jnp.float32) + cb1_ref[...],
        0.0)
    logits = jnp.dot(cm, cw2_ref[...], preferred_element_type=jnp.float32) + cb2_ref[...]
    z = logits - jnp.max(logits, axis=-1, keepdims=True)
    lse = jnp.log(jnp.sum(jnp.exp(z), axis=-1, keepdims=True))
    o_ref[...] = (z - lse).reshape(B, S, logits.shape[-1])


def transformer_predictor_forward(x, params, nhead):
    B, S, _ = x.shape
    num_layers = int(params['wqkv_t'].shape[0])
    n_out = int(params['cls_w2_t'].shape[1])
    kernel = functools.partial(fused_transformer_kernel,
                               nhead=nhead, num_layers=num_layers)
    args = (x, params['fc_w_t'], params['fc_b'],
            params['wqkv_t'], params['bqkv'], params['wo_t'], params['bo'],
            params['g1'], params['be1'], params['w1_t'], params['b1'],
            params['w2_t'], params['b2'], params['g2'], params['be2'],
            params['cls_w1_t'], params['cls_b1'],
            params['cls_w2_t'], params['cls_b2'])
    out = pl.pallas_call(
        kernel,
        out_shape=jax.ShapeDtypeStruct((B, S, n_out), jnp.float32),
        in_specs=[_vmem()] * len(args),
        out_specs=_vmem(),
    )(*args)
    return {'output': out}


# ----------------------------------------------------------------------------
# Deterministic parameter construction (synthetic weights, layer-stacked)
# ----------------------------------------------------------------------------
def _dense(key, fan_in, fan_out):
    kw, kb = jax.random.split(key)
    bound = 1.0 / (fan_in ** 0.5)
    w_t = jax.random.uniform(kw, (fan_in, fan_out), jnp.float32, -bound, bound)
    b = jax.random.uniform(kb, (1, fan_out), jnp.float32, -bound, bound)
    return w_t, b


def init_params(key, input_dim, hidden_dim, num_layers, ff_dim):
    keys = jax.random.split(key, 4 + num_layers)
    params = {}
    params['fc_w_t'], params['fc_b'] = _dense(keys[0], input_dim,
                                              hidden_dim - POSITIONAL_DIMS)
    params['cls_w1_t'], params['cls_b1'] = _dense(keys[1], hidden_dim, hidden_dim // 2)
    params['cls_w2_t'], params['cls_b2'] = _dense(keys[2], hidden_dim // 2, 2)

    names = ('wqkv_t', 'bqkv', 'wo_t', 'bo', 'g1', 'be1',
             'w1_t', 'b1', 'w2_t', 'b2', 'g2', 'be2')
    per_layer = {k: [] for k in names}
    for li in range(num_layers):
        lk = jax.random.split(keys[4 + li], 6)
        wq_t, bq = _dense(lk[0], hidden_dim, hidden_dim)
        wk_t, bk = _dense(lk[1], hidden_dim, hidden_dim)
        wv_t, bv = _dense(lk[2], hidden_dim, hidden_dim)
        wo_t, bo = _dense(lk[3], hidden_dim, hidden_dim)
        w1_t, b1 = _dense(lk[4], hidden_dim, ff_dim)
        w2_t, b2 = _dense(lk[5], ff_dim, hidden_dim)
        per_layer['wqkv_t'].append(jnp.concatenate([wq_t, wk_t, wv_t], axis=1))
        per_layer['bqkv'].append(jnp.concatenate([bq, bk, bv], axis=1))
        per_layer['wo_t'].append(wo_t)
        per_layer['bo'].append(bo)
        per_layer['g1'].append(jnp.ones((1, hidden_dim), jnp.float32))
        per_layer['be1'].append(jnp.zeros((1, hidden_dim), jnp.float32))
        per_layer['w1_t'].append(w1_t)
        per_layer['b1'].append(b1)
        per_layer['w2_t'].append(w2_t)
        per_layer['b2'].append(b2)
        per_layer['g2'].append(jnp.ones((1, hidden_dim), jnp.float32))
        per_layer['be2'].append(jnp.zeros((1, hidden_dim), jnp.float32))
    for k in names:
        params[k] = jnp.stack(per_layer[k], axis=0)
    return params


if __name__ == "__main__":
    # config: input_dim=4, hidden_dim=32, transformer_nheads=4, layers=2, dropout=0.1
    B, S = 2, 8
    INPUT_DIM, HIDDEN_DIM, NHEAD, NUM_LAYERS = 4, 32, 4, 2
    FF_DIM = 2048  # PyTorch TransformerEncoderLayer default dim_feedforward

    key = jax.random.PRNGKey(0)
    kx, kp = jax.random.split(key)
    x = jax.random.normal(kx, (B, S, INPUT_DIM), jnp.float32)
    params = init_params(kp, INPUT_DIM, HIDDEN_DIM, NUM_LAYERS, FF_DIM)

    out = transformer_predictor_forward(x, params, NHEAD)
    out = jax.block_until_ready(out['output'])
    assert out.shape == (B, S, 2)
    assert bool(jnp.all(jnp.isfinite(out)))
    # log-softmax rows should sum (in prob space) to ~1
    assert bool(jnp.allclose(jnp.sum(jnp.exp(out), axis=-1), 1.0, atol=1e-4))
    print("KERNEL_OK")
</pallas_src>

<mosaic_0001>
module attributes {stable_mosaic.version = 11 : i64} {
  func.func @fused_transformer_kernel(%arg0: memref<2x8x4xf32, #tpu.memory_space<vmem>>, %arg1: memref<4x30xf32, #tpu.memory_space<vmem>>, %arg2: memref<1x30xf32, #tpu.memory_space<vmem>>, %arg3: memref<2x32x96xf32, #tpu.memory_space<vmem>>, %arg4: memref<2x1x96xf32, #tpu.memory_space<vmem>>, %arg5: memref<2x32x32xf32, #tpu.memory_space<vmem>>, %arg6: memref<2x1x32xf32, #tpu.memory_space<vmem>>, %arg7: memref<2x1x32xf32, #tpu.memory_space<vmem>>, %arg8: memref<2x1x32xf32, #tpu.memory_space<vmem>>, %arg9: memref<2x32x2048xf32, #tpu.memory_space<vmem>>, %arg10: memref<2x1x2048xf32, #tpu.memory_space<vmem>>, %arg11: memref<2x2048x32xf32, #tpu.memory_space<vmem>>, %arg12: memref<2x1x32xf32, #tpu.memory_space<vmem>>, %arg13: memref<2x1x32xf32, #tpu.memory_space<vmem>>, %arg14: memref<2x1x32xf32, #tpu.memory_space<vmem>>, %arg15: memref<32x16xf32, #tpu.memory_space<vmem>>, %arg16: memref<1x16xf32, #tpu.memory_space<vmem>>, %arg17: memref<16x2xf32, #tpu.memory_space<vmem>>, %arg18: memref<1x2xf32, #tpu.memory_space<vmem>>, %arg19: memref<2x8x2xf32, #tpu.memory_space<vmem>>) attributes {dimension_semantics = [], scalar_prefetch = 0 : i64, scratch_operands = 0 : i64, tpu.core_type = #tpu.core_type<tc>} {
    %c0 = arith.constant 0 : index
    %c0_0 = arith.constant 0 : index
    %c0_1 = arith.constant 0 : index
    %0 = vector.load %arg0[%c0, %c0_0, %c0_1] : memref<2x8x4xf32, #tpu.memory_space<vmem>>, vector<2x8x4xf32>
    %1 = vector.shape_cast %0 : vector<2x8x4xf32> to vector<16x4xf32>
    %c0_2 = arith.constant 0 : index
    %c0_3 = arith.constant 0 : index
    %2 = vector.load %arg1[%c0_2, %c0_3] : memref<4x30xf32, #tpu.memory_space<vmem>>, vector<4x30xf32>
    %cst = arith.constant dense<0.000000e+00> : vector<16x30xf32>
    %3 = tpu.matmul %1, %2, %cst {dimension_numbers = #tpu.dot_dimension_numbers<[1], [0], [0], [1], [0, 0, 1, 1], [], []>} : vector<16x4xf32>, vector<4x30xf32>, vector<16x30xf32> -> vector<16x30xf32>
    %c0_4 = arith.constant 0 : index
    %c0_5 = arith.constant 0 : index
    %4 = vector.load %arg2[%c0_4, %c0_5] : memref<1x30xf32, #tpu.memory_space<vmem>>, vector<1x30xf32>
    %5 = vector.broadcast %4 : vector<1x30xf32> to vector<16x30xf32>
    %6 = arith.addf %3, %5 : vector<16x30xf32>
    %cst_6 = arith.constant 0.000000e+00 : f32
    %7 = vector.broadcast %cst_6 : f32 to vector<16x30xf32>
    %8 = arith.maximumf %6, %7 : vector<16x30xf32>
    %9 = tpu.iota {dimensions = array<i32: 0>} : vector<8x2xi32>
    %10 = arith.sitofp %9 : vector<8x2xi32> to vector<8x2xf32>
    %11 = tpu.iota {dimensions = array<i32: 1>} : vector<8x2xi32>
    %c0_i32 = arith.constant 0 : i32
    %12 = vector.broadcast %c0_i32 : i32 to vector<8x2xi32>
    %13 = arith.cmpi eq, %11, %12 : vector<8x2xi32>
    %cst_7 = arith.constant 0.000000e+00 : f32
    %14 = vector.broadcast %cst_7 : f32 to vector<8x2xf32>
    %15 = arith.subf %14, %10 : vector<8x2xf32>
    %16 = arith.select %13, %10, %15 : vector<8x2xi1>, vector<8x2xf32>
    %17 = math.exp %16 : vector<8x2xf32>
    %18 = vector.shape_cast %17 : vector<8x2xf32> to vector<1x8x2xf32>
    %19 = vector.shape_cast %18 : vector<1x8x2xf32> to vector<1x8x2xf32>
    %20 = vector.broadcast %19 : vector<1x8x2xf32> to vector<2x8x2xf32>
    %21 = vector.shape_cast %8 : vector<16x30xf32> to vector<2x8x30xf32>
    %22 = tpu.concatenate %21, %20 in 2 : vector<2x8x30xf32>, vector<2x8x2xf32> -> vector<2x8x32xf32>
    %23 = vector.shape_cast %22 : vector<2x8x32xf32> to vector<16x32xf32>
    %24 = tpu.iota {dimensions = array<i32: 0>} : vector<8x8xi32>
    %25 = tpu.iota {dimensions = array<i32: 1>} : vector<8x8xi32>
    %26 = arith.cmpi sle, %25, %24 : vector<8x8xi32>
    %27 = vector.shape_cast %26 : vector<8x8xi1> to vector<1x8x8xi1>
    %c0_8 = arith.constant 0 : index
    %c0_9 = arith.constant 0 : index
    %c0_10 = arith.constant 0 : index
    %28 = vector.load %arg3[%c0_8, %c0_9, %c0_10] : memref<2x32x96xf32, #tpu.memory_space<vmem>>, vector<1x32x96xf32>
    %29 = vector.shape_cast %28 : vector<1x32x96xf32> to vector<32x96xf32>
    %cst_11 = arith.constant dense<0.000000e+00> : vector<16x96xf32>
    %30 = tpu.matmul %23, %29, %cst_11 {dimension_numbers = #tpu.dot_dimension_numbers<[1], [0], [0], [1], [0, 0, 1, 1], [], []>} : vector<16x32xf32>, vector<32x96xf32>, vector<16x96xf32> -> vector<16x96xf32>
    %c0_12 = arith.constant 0 : index
    %c0_13 = arith.constant 0 : index
    %c0_14 = arith.constant 0 : index
    %31 = vector.load %arg4[%c0_12, %c0_13, %c0_14] : memref<2x1x96xf32, #tpu.memory_space<vmem>>, vector<1x1x96xf32>
    %32 = vector.shape_cast %31 : vector<1x1x96xf32> to vector<1x96xf32>
    %33 = vector.broadcast %32 : vector<1x96xf32> to vector<16x96xf32>
    %34 = arith.addf %30, %33 : vector<16x96xf32>
    %35 = vector.extract_strided_slice %34 {offsets = [0, 0], sizes = [16, 8], strides = [1, 1]} : vector<16x96xf32> to vector<16x8xf32>
    %36 = vector.shape_cast %35 : vector<16x8xf32> to vector<2x8x8xf32>
    %37 = vector.extract_strided_slice %34 {offsets = [0, 32], sizes = [16, 8], strides = [1, 1]} : vector<16x96xf32> to vector<16x8xf32>
    %38 = vector.shape_cast %37 : vector<16x8xf32> to vector<2x8x8xf32>
    %39 = vector.extract_strided_slice %34 {offsets = [0, 64], sizes = [16, 8], strides = [1, 1]} : vector<16x96xf32> to vector<16x8xf32>
    %40 = vector.shape_cast %39 : vector<16x8xf32> to vector<2x8x8xf32>
    %41 = vector.extract_strided_slice %34 {offsets = [0, 8], sizes = [16, 8], strides = [1, 1]} : vector<16x96xf32> to vector<16x8xf32>
    %42 = vector.shape_cast %41 : vector<16x8xf32> to vector<2x8x8xf32>
    %43 = vector.extract_strided_slice %34 {offsets = [0, 40], sizes = [16, 8], strides = [1, 1]} : vector<16x96xf32> to vector<16x8xf32>
    %44 = vector.shape_cast %43 : vector<16x8xf32> to vector<2x8x8xf32>
    %45 = vector.extract_strided_slice %34 {offsets = [0, 72], sizes = [16, 8], strides = [1, 1]} : vector<16x96xf32> to vector<16x8xf32>
    %46 = vector.shape_cast %45 : vector<16x8xf32> to vector<2x8x8xf32>
    %47 = vector.extract_strided_slice %34 {offsets = [0, 16], sizes = [16, 8], strides = [1, 1]} : vector<16x96xf32> to vector<16x8xf32>
    %48 = vector.shape_cast %47 : vector<16x8xf32> to vector<2x8x8xf32>
    %49 = vector.extract_strided_slice %34 {offsets = [0, 48], sizes = [16, 8], strides = [1, 1]} : vector<16x96xf32> to vector<16x8xf32>
    %50 = vector.shape_cast %49 : vector<16x8xf32> to vector<2x8x8xf32>
    %51 = vector.extract_strided_slice %34 {offsets = [0, 80], sizes = [16, 8], strides = [1, 1]} : vector<16x96xf32> to vector<16x8xf32>
    %52 = vector.shape_cast %51 : vector<16x8xf32> to vector<2x8x8xf32>
    %53 = vector.extract_strided_slice %34 {offsets = [0, 24], sizes = [16, 8], strides = [1, 1]} : vector<16x96xf32> to vector<16x8xf32>
    %54 = vector.shape_cast %53 : vector<16x8xf32> to vector<2x8x8xf32>
    %55 = vector.extract_strided_slice %34 {offsets = [0, 56], sizes = [16, 8], strides = [1, 1]} : vector<16x96xf32> to vector<16x8xf32>
    %56 = vector.shape_cast %55 : vector<16x8xf32> to vector<2x8x8xf32>
    %57 = vector.extract_strided_slice %34 {offsets = [0, 88], sizes = [16, 8], strides = [1, 1]} : vector<16x96xf32> to vector<16x8xf32>
    %58 = vector.shape_cast %57 : vector<16x8xf32> to vector<2x8x8xf32>
    %59 = tpu.concatenate %36, %42, %48, %54 in 0 : vector<2x8x8xf32>, vector<2x8x8xf32>, vector<2x8x8xf32>, vector<2x8x8xf32> -> vector<8x8x8xf32>
    %cst_15 = arith.constant 0.353553385 : f32
    %60 = vector.broadcast %cst_15 : f32 to vector<8x8x8xf32>
    %61 = arith.mulf %59, %60 : vector<8x8x8xf32>
    %62 = tpu.concatenate %38, %44, %50, %56 in 0 : vector<2x8x8xf32>, vector<2x8x8xf32>, vector<2x8x8xf32>, vector<2x8x8xf32> -> vector<8x8x8xf32>
    %63 = tpu.concatenate %40, %46, %52, %58 in 0 : vector<2x8x8xf32>, vector<2x8x8xf32>, vector<2x8x8xf32>, vector<2x8x8xf32> -> vector<8x8x8xf32>
    "tpu.trace_start"() <{level = 10 : i32, message = "bqd,bkd->bqk"}> : () -> ()
    %cst_16 = arith.constant dense<0.000000e+00> : vector<8x8x8xf32>
    %64 = tpu.matmul %61, %62, %cst_16 {dimension_numbers = #tpu.dot_dimension_numbers<[2], [2], [1], [1], [0, 0, 0, 1, 1, 1], [0], [0]>} : vector<8x8x8xf32>, vector<8x8x8xf32>, vector<8x8x8xf32> -> vector<8x8x8xf32>
    %cst_17 = arith.constant -1.000000e+30 : f32
    "tpu.trace_stop"() : () -> ()
    %65 = vector.shape_cast %27 : vector<1x8x8xi1> to vector<1x8x8xi1>
    %66 = vector.broadcast %65 : vector<1x8x8xi1> to vector<8x8x8xi1>
    %67 = vector.broadcast %cst_17 : f32 to vector<8x8x8xf32>
    %68 = arith.select %66, %64, %67 : vector<8x8x8xi1>, vector<8x8x8xf32>
    %cst_18 = arith.constant dense<0xFF800000> : vector<8x8xf32>
    %69 = vector.multi_reduction <maximumf>, %68, %cst_18 [2] : vector<8x8x8xf32> to vector<8x8xf32>
    %70 = vector.shape_cast %69 : vector<8x8xf32> to vector<8x8x1xf32>
    %71 = vector.broadcast %70 : vector<8x8x1xf32> to vector<8x8x8xf32>
    %72 = arith.subf %68, %71 : vector<8x8x8xf32>
    %73 = math.exp %72 : vector<8x8x8xf32>
    %cst_19 = arith.constant dense<0.000000e+00> : vector<8x8xf32>
    %74 = vector.multi_reduction <add>, %73, %cst_19 [2] : vector<8x8x8xf32> to vector<8x8xf32>
    %75 = vector.shape_cast %74 : vector<8x8xf32> to vector<8x8x1xf32>
    %76 = tpu.reciprocal %75 {approx = true} : vector<8x8x1xf32> -> vector<8x8x1xf32>
    %77 = vector.broadcast %76 : vector<8x8x1xf32> to vector<8x8x8xf32>
    %78 = arith.mulf %73, %77 : vector<8x8x8xf32>
    "tpu.trace_start"() <{level = 10 : i32, message = "bqk,bkd->bqd"}> : () -> ()
    %cst_20 = arith.constant dense<0.000000e+00> : vector<8x8x8xf32>
    %79 = tpu.matmul %78, %63, %cst_20 {dimension_numbers = #tpu.dot_dimension_numbers<[2], [1], [1], [2], [0, 0, 0, 1, 1, 2], [0], [0]>} : vector<8x8x8xf32>, vector<8x8x8xf32>, vector<8x8x8xf32> -> vector<8x8x8xf32>
    "tpu.trace_stop"() : () -> ()
    %80 = vector.extract_strided_slice %79 {offsets = [0, 0, 0], sizes = [2, 8, 8], strides = [1, 1, 1]} : vector<8x8x8xf32> to vector<2x8x8xf32>
    %81 = vector.shape_cast %80 : vector<2x8x8xf32> to vector<16x8xf32>
    %82 = vector.extract_strided_slice %79 {offsets = [2, 0, 0], sizes = [2, 8, 8], strides = [1, 1, 1]} : vector<8x8x8xf32> to vector<2x8x8xf32>
    %83 = vector.shape_cast %82 : vector<2x8x8xf32> to vector<16x8xf32>
    %84 = vector.extract_strided_slice %79 {offsets = [4, 0, 0], sizes = [2, 8, 8], strides = [1, 1, 1]} : vector<8x8x8xf32> to vector<2x8x8xf32>
    %85 = vector.shape_cast %84 : vector<2x8x8xf32> to vector<16x8xf32>
    %86 = vector.extract_strided_slice %79 {offsets = [6, 0, 0], sizes = [2, 8, 8], strides = [1, 1, 1]} : vector<8x8x8xf32> to vector<2x8x8xf32>
    %87 = vector.shape_cast %86 : vector<2x8x8xf32> to vector<16x8xf32>
    %88 = tpu.concatenate %81, %83, %85, %87 in 1 : vector<16x8xf32>, vector<16x8xf32>, vector<16x8xf32>, vector<16x8xf32> -> vector<16x32xf32>
    %c0_21 = arith.constant 0 : index
    %c0_22 = arith.constant 0 : index
    %c0_23 = arith.constant 0 : index
    %89 = vector.load %arg5[%c0_21, %c0_22, %c0_23] : memref<2x32x32xf32, #tpu.memory_space<vmem>>, vector<1x32x32xf32>
    %90 = vector.shape_cast %89 : vector<1x32x32xf32> to vector<32x32xf32>
    %cst_24 = arith.constant dense<0.000000e+00> : vector<16x32xf32>
    %91 = tpu.matmul %88, %90, %cst_24 {dimension_numbers = #tpu.dot_dimension_numbers<[1], [0], [0], [1], [0, 0, 1, 1], [], []>} : vector<16x32xf32>, vector<32x32xf32>, vector<16x32xf32> -> vector<16x32xf32>
    %c0_25 = arith.constant 0 : index
    %c0_26 = arith.constant 0 : index
    %c0_27 = arith.constant 0 : index
    %92 = vector.load %arg6[%c0_25, %c0_26, %c0_27] : memref<2x1x32xf32, #tpu.memory_space<vmem>>, vector<1x1x32xf32>
    %93 = vector.shape_cast %92 : vector<1x1x32xf32> to vector<1x32xf32>
    %94 = vector.broadcast %93 : vector<1x32xf32> to vector<16x32xf32>
    %95 = arith.addf %91, %94 : vector<16x32xf32>
    %96 = arith.addf %23, %95 : vector<16x32xf32>
    %c0_28 = arith.constant 0 : index
    %c0_29 = arith.constant 0 : index
    %c0_30 = arith.constant 0 : index
    %97 = vector.load %arg7[%c0_28, %c0_29, %c0_30] : memref<2x1x32xf32, #tpu.memory_space<vmem>>, vector<1x1x32xf32>
    %98 = vector.shape_cast %97 : vector<1x1x32xf32> to vector<1x32xf32>
    %c0_31 = arith.constant 0 : index
    %c0_32 = arith.constant 0 : index
    %c0_33 = arith.constant 0 : index
    %99 = vector.load %arg8[%c0_31, %c0_32, %c0_33] : memref<2x1x32xf32, #tpu.memory_space<vmem>>, vector<1x1x32xf32>
    %100 = vector.shape_cast %99 : vector<1x1x32xf32> to vector<1x32xf32>
    %cst_34 = arith.constant dense<0.000000e+00> : vector<16xf32>
    %101 = vector.multi_reduction <add>, %96, %cst_34 [1] : vector<16x32xf32> to vector<16xf32>
    %102 = vector.shape_cast %101 : vector<16xf32> to vector<16x1xf32>
    %cst_35 = arith.constant 3.200000e+01 : f32
    %103 = vector.broadcast %cst_35 : f32 to vector<16x1xf32>
    %104 = arith.divf %102, %103 : vector<16x1xf32>
    %105 = vector.broadcast %104 : vector<16x1xf32> to vector<16x32xf32>
    %106 = arith.subf %96, %105 : vector<16x32xf32>
    %107 = arith.mulf %106, %106 : vector<16x32xf32>
    %cst_36 = arith.constant dense<0.000000e+00> : vector<16xf32>
    %108 = vector.multi_reduction <add>, %107, %cst_36 [1] : vector<16x32xf32> to vector<16xf32>
    %109 = vector.shape_cast %108 : vector<16xf32> to vector<16x1xf32>
    %cst_37 = arith.constant 3.200000e+01 : f32
    %110 = vector.broadcast %cst_37 : f32 to vector<16x1xf32>
    %111 = arith.divf %109, %110 : vector<16x1xf32>
    %112 = vector.broadcast %104 : vector<16x1xf32> to vector<16x32xf32>
    %113 = arith.subf %96, %112 : vector<16x32xf32>
    %cst_38 = arith.constant 9.99999974E-6 : f32
    %114 = vector.broadcast %cst_38 : f32 to vector<16x1xf32>
    %115 = arith.addf %111, %114 : vector<16x1xf32>
    %116 = math.rsqrt %115 : vector<16x1xf32>
    %117 = vector.broadcast %116 : vector<16x1xf32> to vector<16x32xf32>
    %118 = arith.mulf %113, %117 : vector<16x32xf32>
    %119 = vector.broadcast %98 : vector<1x32xf32> to vector<16x32xf32>
    %120 = arith.mulf %118, %119 : vector<16x32xf32>
    %121 = vector.broadcast %100 : vector<1x32xf32> to vector<16x32xf32>
    %122 = arith.addf %120, %121 : vector<16x32xf32>
    %c0_39 = arith.constant 0 : index
    %c0_40 = arith.constant 0 : index
    %c0_41 = arith.constant 0 : index
    %123 = vector.load %arg9[%c0_39, %c0_40, %c0_41] : memref<2x32x2048xf32, #tpu.memory_space<vmem>>, vector<1x32x2048xf32>
    %124 = vector.shape_cast %123 : vector<1x32x2048xf32> to vector<32x2048xf32>
    %cst_42 = arith.constant dense<0.000000e+00> : vector<16x2048xf32>
    %125 = tpu.matmul %122, %124, %cst_42 {dimension_numbers = #tpu.dot_dimension_numbers<[1], [0], [0], [1], [0, 0, 1, 1], [], []>} : vector<16x32xf32>, vector<32x2048xf32>, vector<16x2048xf32> -> vector<16x2048xf32>
    %c0_43 = arith.constant 0 : index
    %c0_44 = arith.constant 0 : index
    %c0_45 = arith.constant 0 : index
    %126 = vector.load %arg10[%c0_43, %c0_44, %c0_45] : memref<2x1x2048xf32, #tpu.memory_space<vmem>>, vector<1x1x2048xf32>
    %127 = vector.shape_cast %126 : vector<1x1x2048xf32> to vector<1x2048xf32>
    %128 = vector.broadcast %127 : vector<1x2048xf32> to vector<16x2048xf32>
    %129 = arith.addf %125, %128 : vector<16x2048xf32>
    %cst_46 = arith.constant 0.000000e+00 : f32
    %130 = vector.broadcast %cst_46 : f32 to vector<16x2048xf32>
    %131 = arith.maximumf %129, %130 : vector<16x2048xf32>
    %c0_47 = arith.constant 0 : index
    %c0_48 = arith.constant 0 : index
    %c0_49 = arith.constant 0 : index
    %132 = vector.load %arg11[%c0_47, %c0_48, %c0_49] : memref<2x2048x32xf32, #tpu.memory_space<vmem>>, vector<1x2048x32xf32>
    %133 = vector.shape_cast %132 : vector<1x2048x32xf32> to vector<2048x32xf32>
    %cst_50 = arith.constant dense<0.000000e+00> : vector<16x32xf32>
    %134 = tpu.matmul %131, %133, %cst_50 {dimension_numbers = #tpu.dot_dimension_numbers<[1], [0], [0], [1], [0, 0, 1, 1], [], []>} : vector<16x2048xf32>, vector<2048x32xf32>, vector<16x32xf32> -> vector<16x32xf32>
    %c0_51 = arith.constant 0 : index
    %c0_52 = arith.constant 0 : index
    %c0_53 = arith.constant 0 : index
    %135 = vector.load %arg12[%c0_51, %c0_52, %c0_53] : memref<2x1x32xf32, #tpu.memory_space<vmem>>, vector<1x1x32xf32>
    %136 = vector.shape_cast %135 : vector<1x1x32xf32> to vector<1x32xf32>
    %137 = vector.broadcast %136 : vector<1x32xf32> to vector<16x32xf32>
    %138 = arith.addf %134, %137 : vector<16x32xf32>
    %139 = arith.addf %122, %138 : vector<16x32xf32>
    %c0_54 = arith.constant 0 : index
    %c0_55 = arith.constant 0 : index
    %c0_56 = arith.constant 0 : index
    %140 = vector.load %arg13[%c0_54, %c0_55, %c0_56] : memref<2x1x32xf32, #tpu.memory_space<vmem>>, vector<1x1x32xf32>
    %141 = vector.shape_cast %140 : vector<1x1x32xf32> to vector<1x32xf32>
    %c0_57 = arith.constant 0 : index
    %c0_58 = arith.constant 0 : index
    %c0_59 = arith.constant 0 : index
    %142 = vector.load %arg14[%c0_57, %c0_58, %c0_59] : memref<2x1x32xf32, #tpu.memory_space<vmem>>, vector<1x1x32xf32>
    %143 = vector.shape_cast %142 : vector<1x1x32xf32> to vector<1x32xf32>
    %cst_60 = arith.constant dense<0.000000e+00> : vector<16xf32>
    %144 = vector.multi_reduction <add>, %139, %cst_60 [1] : vector<16x32xf32> to vector<16xf32>
    %145 = vector.shape_cast %144 : vector<16xf32> to vector<16x1xf32>
    %cst_61 = arith.constant 3.200000e+01 : f32
    %146 = vector.broadcast %cst_61 : f32 to vector<16x1xf32>
    %147 = arith.divf %145, %146 : vector<16x1xf32>
    %148 = vector.broadcast %147 : vector<16x1xf32> to vector<16x32xf32>
    %149 = arith.subf %139, %148 : vector<16x32xf32>
    %150 = arith.mulf %149, %149 : vector<16x32xf32>
    %cst_62 = arith.constant dense<0.000000e+00> : vector<16xf32>
    %151 = vector.multi_reduction <add>, %150, %cst_62 [1] : vector<16x32xf32> to vector<16xf32>
    %152 = vector.shape_cast %151 : vector<16xf32> to vector<16x1xf32>
    %cst_63 = arith.constant 3.200000e+01 : f32
    %153 = vector.broadcast %cst_63 : f32 to vector<16x1xf32>
    %154 = arith.divf %152, %153 : vector<16x1xf32>
    %155 = vector.broadcast %147 : vector<16x1xf32> to vector<16x32xf32>
    %156 = arith.subf %139, %155 : vector<16x32xf32>
    %cst_64 = arith.constant 9.99999974E-6 : f32
    %157 = vector.broadcast %cst_64 : f32 to vector<16x1xf32>
    %158 = arith.addf %154, %157 : vector<16x1xf32>
    %159 = math.rsqrt %158 : vector<16x1xf32>
    %160 = vector.broadcast %159 : vector<16x1xf32> to vector<16x32xf32>
    %161 = arith.mulf %156, %160 : vector<16x32xf32>
    %162 = vector.broadcast %141 : vector<1x32xf32> to vector<16x32xf32>
    %163 = arith.mulf %161, %162 : vector<16x32xf32>
    %164 = vector.broadcast %143 : vector<1x32xf32> to vector<16x32xf32>
    %165 = arith.addf %163, %164 : vector<16x32xf32>
    %c1 = arith.constant 1 : index
    %c0_65 = arith.constant 0 : index
    %c0_66 = arith.constant 0 : index
    %166 = vector.load %arg3[%c1, %c0_65, %c0_66] : memref<2x32x96xf32, #tpu.memory_space<vmem>>, vector<1x32x96xf32>
    %167 = vector.shape_cast %166 : vector<1x32x96xf32> to vector<32x96xf32>
    %cst_67 = arith.constant dense<0.000000e+00> : vector<16x96xf32>
    %168 = tpu.matmul %165, %167, %cst_67 {dimension_numbers = #tpu.dot_dimension_numbers<[1], [0], [0], [1], [0, 0, 1, 1], [], []>} : vector<16x32xf32>, vector<32x96xf32>, vector<16x96xf32> -> vector<16x96xf32>
    %c1_68 = arith.constant 1 : index
    %c0_69 = arith.constant 0 : index
    %c0_70 = arith.constant 0 : index
    %169 = vector.load %arg4[%c1_68, %c0_69, %c0_70] : memref<2x1x96xf32, #tpu.memory_space<vmem>>, vector<1x1x96xf32>
    %170 = vector.shape_cast %169 : vector<1x1x96xf32> to vector<1x96xf32>
    %171 = vector.broadcast %170 : vector<1x96xf32> to vector<16x96xf32>
    %172 = arith.addf %168, %171 : vector<16x96xf32>
    %173 = vector.extract_strided_slice %172 {offsets = [0, 0], sizes = [16, 8], strides = [1, 1]} : vector<16x96xf32> to vector<16x8xf32>
    %174 = vector.shape_cast %173 : vector<16x8xf32> to vector<2x8x8xf32>
    %175 = vector.extract_strided_slice %172 {offsets = [0, 32], sizes = [16, 8], strides = [1, 1]} : vector<16x96xf32> to vector<16x8xf32>
    %176 = vector.shape_cast %175 : vector<16x8xf32> to vector<2x8x8xf32>
    %177 = vector.extract_strided_slice %172 {offsets = [0, 64], sizes = [16, 8], strides = [1, 1]} : vector<16x96xf32> to vector<16x8xf32>
    %178 = vector.shape_cast %177 : vector<16x8xf32> to vector<2x8x8xf32>
    %179 = vector.extract_strided_slice %172 {offsets = [0, 8], sizes = [16, 8], strides = [1, 1]} : vector<16x96xf32> to vector<16x8xf32>
    %180 = vector.shape_cast %179 : vector<16x8xf32> to vector<2x8x8xf32>
    %181 = vector.extract_strided_slice %172 {offsets = [0, 40], sizes = [16, 8], strides = [1, 1]} : vector<16x96xf32> to vector<16x8xf32>
    %182 = vector.shape_cast %181 : vector<16x8xf32> to vector<2x8x8xf32>
    %183 = vector.extract_strided_slice %172 {offsets = [0, 72], sizes = [16, 8], strides = [1, 1]} : vector<16x96xf32> to vector<16x8xf32>
    %184 = vector.shape_cast %183 : vector<16x8xf32> to vector<2x8x8xf32>
    %185 = vector.extract_strided_slice %172 {offsets = [0, 16], sizes = [16, 8], strides = [1, 1]} : vector<16x96xf32> to vector<16x8xf32>
    %186 = vector.shape_cast %185 : vector<16x8xf32> to vector<2x8x8xf32>
    %187 = vector.extract_strided_slice %172 {offsets = [0, 48], sizes = [16, 8], strides = [1, 1]} : vector<16x96xf32> to vector<16x8xf32>
    %188 = vector.shape_cast %187 : vector<16x8xf32> to vector<2x8x8xf32>
    %189 = vector.extract_strided_slice %172 {offsets = [0, 80], sizes = [16, 8], strides = [1, 1]} : vector<16x96xf32> to vector<16x8xf32>
    %190 = vector.shape_cast %189 : vector<16x8xf32> to vector<2x8x8xf32>
    %191 = vector.extract_strided_slice %172 {offsets = [0, 24], sizes = [16, 8], strides = [1, 1]} : vector<16x96xf32> to vector<16x8xf32>
    %192 = vector.shape_cast %191 : vector<16x8xf32> to vector<2x8x8xf32>
    %193 = vector.extract_strided_slice %172 {offsets = [0, 56], sizes = [16, 8], strides = [1, 1]} : vector<16x96xf32> to vector<16x8xf32>
    %194 = vector.shape_cast %193 : vector<16x8xf32> to vector<2x8x8xf32>
    %195 = vector.extract_strided_slice %172 {offsets = [0, 88], sizes = [16, 8], strides = [1, 1]} : vector<16x96xf32> to vector<16x8xf32>
    %196 = vector.shape_cast %195 : vector<16x8xf32> to vector<2x8x8xf32>
    %197 = tpu.concatenate %174, %180, %186, %192 in 0 : vector<2x8x8xf32>, vector<2x8x8xf32>, vector<2x8x8xf32>, vector<2x8x8xf32> -> vector<8x8x8xf32>
    %cst_71 = arith.constant 0.353553385 : f32
    %198 = vector.broadcast %cst_71 : f32 to vector<8x8x8xf32>
    %199 = arith.mulf %197, %198 : vector<8x8x8xf32>
    %200 = tpu.concatenate %176, %182, %188, %194 in 0 : vector<2x8x8xf32>, vector<2x8x8xf32>, vector<2x8x8xf32>, vector<2x8x8xf32> -> vector<8x8x8xf32>
    %201 = tpu.concatenate %178, %184, %190, %196 in 0 : vector<2x8x8xf32>, vector<2x8x8xf32>, vector<2x8x8xf32>, vector<2x8x8xf32> -> vector<8x8x8xf32>
    "tpu.trace_start"() <{level = 10 : i32, message = "bqd,bkd->bqk"}> : () -> ()
    %cst_72 = arith.constant dense<0.000000e+00> : vector<8x8x8xf32>
    %202 = tpu.matmul %199, %200, %cst_72 {dimension_numbers = #tpu.dot_dimension_numbers<[2], [2], [1], [1], [0, 0, 0, 1, 1, 1], [0], [0]>} : vector<8x8x8xf32>, vector<8x8x8xf32>, vector<8x8x8xf32> -> vector<8x8x8xf32>
    %cst_73 = arith.constant -1.000000e+30 : f32
    "tpu.trace_stop"() : () -> ()
    %203 = vector.shape_cast %27 : vector<1x8x8xi1> to vector<1x8x8xi1>
    %204 = vector.broadcast %203 : vector<1x8x8xi1> to vector<8x8x8xi1>
    %205 = vector.broadcast %cst_73 : f32 to vector<8x8x8xf32>
    %206 = arith.select %204, %202, %205 : vector<8x8x8xi1>, vector<8x8x8xf32>
    %cst_74 = arith.constant dense<0xFF800000> : vector<8x8xf32>
    %207 = vector.multi_reduction <maximumf>, %206, %cst_74 [2] : vector<8x8x8xf32> to vector<8x8xf32>
    %208 = vector.shape_cast %207 : vector<8x8xf32> to vector<8x8x1xf32>
    %209 = vector.broadcast %208 : vector<8x8x1xf32> to vector<8x8x8xf32>
    %210 = arith.subf %206, %209 : vector<8x8x8xf32>
    %211 = math.exp %210 : vector<8x8x8xf32>
    %cst_75 = arith.constant dense<0.000000e+00> : vector<8x8xf32>
    %212 = vector.multi_reduction <add>, %211, %cst_75 [2] : vector<8x8x8xf32> to vector<8x8xf32>
    %213 = vector.shape_cast %212 : vector<8x8xf32> to vector<8x8x1xf32>
    %214 = tpu.reciprocal %213 {approx = true} : vector<8x8x1xf32> -> vector<8x8x1xf32>
    %215 = vector.broadcast %214 : vector<8x8x1xf32> to vector<8x8x8xf32>
    %216 = arith.mulf %211, %215 : vector<8x8x8xf32>
    "tpu.trace_start"() <{level = 10 : i32, message = "bqk,bkd->bqd"}> : () -> ()
    %cst_76 = arith.constant dense<0.000000e+00> : vector<8x8x8xf32>
    %217 = tpu.matmul %216, %201, %cst_76 {dimension_numbers = #tpu.dot_dimension_numbers<[2], [1], [1], [2], [0, 0, 0, 1, 1, 2], [0], [0]>} : vector<8x8x8xf32>, vector<8x8x8xf32>, vector<8x8x8xf32> -> vector<8x8x8xf32>
    "tpu.trace_stop"() : () -> ()
    %218 = vector.extract_strided_slice %217 {offsets = [0, 0, 0], sizes = [2, 8, 8], strides = [1, 1, 1]} : vector<8x8x8xf32> to vector<2x8x8xf32>
    %219 = vector.shape_cast %218 : vector<2x8x8xf32> to vector<16x8xf32>
    %220 = vector.extract_strided_slice %217 {offsets = [2, 0, 0], sizes = [2, 8, 8], strides = [1, 1, 1]} : vector<8x8x8xf32> to vector<2x8x8xf32>
    %221 = vector.shape_cast %220 : vector<2x8x8xf32> to vector<16x8xf32>
    %222 = vector.extract_strided_slice %217 {offsets = [4, 0, 0], sizes = [2, 8, 8], strides = [1, 1, 1]} : vector<8x8x8xf32> to vector<2x8x8xf32>
    %223 = vector.shape_cast %222 : vector<2x8x8xf32> to vector<16x8xf32>
    %224 = vector.extract_strided_slice %217 {offsets = [6, 0, 0], sizes = [2, 8, 8], strides = [1, 1, 1]} : vector<8x8x8xf32> to vector<2x8x8xf32>
    %225 = vector.shape_cast %224 : vector<2x8x8xf32> to vector<16x8xf32>
    %226 = tpu.concatenate %219, %221, %223, %225 in 1 : vector<16x8xf32>, vector<16x8xf32>, vector<16x8xf32>, vector<16x8xf32> -> vector<16x32xf32>
    %c1_77 = arith.constant 1 : index
    %c0_78 = arith.constant 0 : index
    %c0_79 = arith.constant 0 : index
    %227 = vector.load %arg5[%c1_77, %c0_78, %c0_79] : memref<2x32x32xf32, #tpu.memory_space<vmem>>, vector<1x32x32xf32>
    %228 = vector.shape_cast %227 : vector<1x32x32xf32> to vector<32x32xf32>
    %cst_80 = arith.constant dense<0.000000e+00> : vector<16x32xf32>
    %229 = tpu.matmul %226, %228, %cst_80 {dimension_numbers = #tpu.dot_dimension_numbers<[1], [0], [0], [1], [0, 0, 1, 1], [], []>} : vector<16x32xf32>, vector<32x32xf32>, vector<16x32xf32> -> vector<16x32xf32>
    %c1_81 = arith.constant 1 : index
    %c0_82 = arith.constant 0 : index
    %c0_83 = arith.constant 0 : index
    %230 = vector.load %arg6[%c1_81, %c0_82, %c0_83] : memref<2x1x32xf32, #tpu.memory_space<vmem>>, vector<1x1x32xf32>
    %231 = vector.shape_cast %230 : vector<1x1x32xf32> to vector<1x32xf32>
    %232 = vector.broadcast %231 : vector<1x32xf32> to vector<16x32xf32>
    %233 = arith.addf %229, %232 : vector<16x32xf32>
    %234 = arith.addf %165, %233 : vector<16x32xf32>
    %c1_84 = arith.constant 1 : index
    %c0_85 = arith.constant 0 : index
    %c0_86 = arith.constant 0 : index
    %235 = vector.load %arg7[%c1_84, %c0_85, %c0_86] : memref<2x1x32xf32, #tpu.memory_space<vmem>>, vector<1x1x32xf32>
    %236 = vector.shape_cast %235 : vector<1x1x32xf32> to vector<1x32xf32>
    %c1_87 = arith.constant 1 : index
    %c0_88 = arith.constant 0 : index
    %c0_89 = arith.constant 0 : index
    %237 = vector.load %arg8[%c1_87, %c0_88, %c0_89] : memref<2x1x32xf32, #tpu.memory_space<vmem>>, vector<1x1x32xf32>
    %238 = vector.shape_cast %237 : vector<1x1x32xf32> to vector<1x32xf32>
    %cst_90 = arith.constant dense<0.000000e+00> : vector<16xf32>
    %239 = vector.multi_reduction <add>, %234, %cst_90 [1] : vector<16x32xf32> to vector<16xf32>
    %240 = vector.shape_cast %239 : vector<16xf32> to vector<16x1xf32>
    %cst_91 = arith.constant 3.200000e+01 : f32
    %241 = vector.broadcast %cst_91 : f32 to vector<16x1xf32>
    %242 = arith.divf %240, %241 : vector<16x1xf32>
    %243 = vector.broadcast %242 : vector<16x1xf32> to vector<16x32xf32>
    %244 = arith.subf %234, %243 : vector<16x32xf32>
    %245 = arith.mulf %244, %244 : vector<16x32xf32>
    %cst_92 = arith.constant dense<0.000000e+00> : vector<16xf32>
    %246 = vector.multi_reduction <add>, %245, %cst_92 [1] : vector<16x32xf32> to vector<16xf32>
    %247 = vector.shape_cast %246 : vector<16xf32> to vector<16x1xf32>
    %cst_93 = arith.constant 3.200000e+01 : f32
    %248 = vector.broadcast %cst_93 : f32 to vector<16x1xf32>
    %249 = arith.divf %247, %248 : vector<16x1xf32>
    %250 = vector.broadcast %242 : vector<16x1xf32> to vector<16x32xf32>
    %251 = arith.subf %234, %250 : vector<16x32xf32>
    %cst_94 = arith.constant 9.99999974E-6 : f32
    %252 = vector.broadcast %cst_94 : f32 to vector<16x1xf32>
    %253 = arith.addf %249, %252 : vector<16x1xf32>
    %254 = math.rsqrt %253 : vector<16x1xf32>
    %255 = vector.broadcast %254 : vector<16x1xf32> to vector<16x32xf32>
    %256 = arith.mulf %251, %255 : vector<16x32xf32>
    %257 = vector.broadcast %236 : vector<1x32xf32> to vector<16x32xf32>
    %258 = arith.mulf %256, %257 : vector<16x32xf32>
    %259 = vector.broadcast %238 : vector<1x32xf32> to vector<16x32xf32>
    %260 = arith.addf %258, %259 : vector<16x32xf32>
    %c1_95 = arith.constant 1 : index
    %c0_96 = arith.constant 0 : index
    %c0_97 = arith.constant 0 : index
    %261 = vector.load %arg9[%c1_95, %c0_96, %c0_97] : memref<2x32x2048xf32, #tpu.memory_space<vmem>>, vector<1x32x2048xf32>
    %262 = vector.shape_cast %261 : vector<1x32x2048xf32> to vector<32x2048xf32>
    %cst_98 = arith.constant dense<0.000000e+00> : vector<16x2048xf32>
    %263 = tpu.matmul %260, %262, %cst_98 {dimension_numbers = #tpu.dot_dimension_numbers<[1], [0], [0], [1], [0, 0, 1, 1], [], []>} : vector<16x32xf32>, vector<32x2048xf32>, vector<16x2048xf32> -> vector<16x2048xf32>
    %c1_99 = arith.constant 1 : index
    %c0_100 = arith.constant 0 : index
    %c0_101 = arith.constant 0 : index
    %264 = vector.load %arg10[%c1_99, %c0_100, %c0_101] : memref<2x1x2048xf32, #tpu.memory_space<vmem>>, vector<1x1x2048xf32>
    %265 = vector.shape_cast %264 : vector<1x1x2048xf32> to vector<1x2048xf32>
    %266 = vector.broadcast %265 : vector<1x2048xf32> to vector<16x2048xf32>
    %267 = arith.addf %263, %266 : vector<16x2048xf32>
    %cst_102 = arith.constant 0.000000e+00 : f32
    %268 = vector.broadcast %cst_102 : f32 to vector<16x2048xf32>
    %269 = arith.maximumf %267, %268 : vector<16x2048xf32>
    %c1_103 = arith.constant 1 : index
    %c0_104 = arith.constant 0 : index
    %c0_105 = arith.constant 0 : index
    %270 = vector.load %arg11[%c1_103, %c0_104, %c0_105] : memref<2x2048x32xf32, #tpu.memory_space<vmem>>, vector<1x2048x32xf32>
    %271 = vector.shape_cast %270 : vector<1x2048x32xf32> to vector<2048x32xf32>
    %cst_106 = arith.constant dense<0.000000e+00> : vector<16x32xf32>
    %272 = tpu.matmul %269, %271, %cst_106 {dimension_numbers = #tpu.dot_dimension_numbers<[1], [0], [0], [1], [0, 0, 1, 1], [], []>} : vector<16x2048xf32>, vector<2048x32xf32>, vector<16x32xf32> -> vector<16x32xf32>
    %c1_107 = arith.constant 1 : index
    %c0_108 = arith.constant 0 : index
    %c0_109 = arith.constant 0 : index
    %273 = vector.load %arg12[%c1_107, %c0_108, %c0_109] : memref<2x1x32xf32, #tpu.memory_space<vmem>>, vector<1x1x32xf32>
    %274 = vector.shape_cast %273 : vector<1x1x32xf32> to vector<1x32xf32>
    %275 = vector.broadcast %274 : vector<1x32xf32> to vector<16x32xf32>
    %276 = arith.addf %272, %275 : vector<16x32xf32>
    %277 = arith.addf %260, %276 : vector<16x32xf32>
    %c1_110 = arith.constant 1 : index
    %c0_111 = arith.constant 0 : index
    %c0_112 = arith.constant 0 : index
    %278 = vector.load %arg13[%c1_110, %c0_111, %c0_112] : memref<2x1x32xf32, #tpu.memory_space<vmem>>, vector<1x1x32xf32>
    %279 = vector.shape_cast %278 : vector<1x1x32xf32> to vector<1x32xf32>
    %c1_113 = arith.constant 1 : index
    %c0_114 = arith.constant 0 : index
    %c0_115 = arith.constant 0 : index
    %280 = vector.load %arg14[%c1_113, %c0_114, %c0_115] : memref<2x1x32xf32, #tpu.memory_space<vmem>>, vector<1x1x32xf32>
    %281 = vector.shape_cast %280 : vector<1x1x32xf32> to vector<1x32xf32>
    %cst_116 = arith.constant dense<0.000000e+00> : vector<16xf32>
    %282 = vector.multi_reduction <add>, %277, %cst_116 [1] : vector<16x32xf32> to vector<16xf32>
    %283 = vector.shape_cast %282 : vector<16xf32> to vector<16x1xf32>
    %cst_117 = arith.constant 3.200000e+01 : f32
    %284 = vector.broadcast %cst_117 : f32 to vector<16x1xf32>
    %285 = arith.divf %283, %284 : vector<16x1xf32>
    %286 = vector.broadcast %285 : vector<16x1xf32> to vector<16x32xf32>
    %287 = arith.subf %277, %286 : vector<16x32xf32>
    %288 = arith.mulf %287, %287 : vector<16x32xf32>
    %cst_118 = arith.constant dense<0.000000e+00> : vector<16xf32>
    %289 = vector.multi_reduction <add>, %288, %cst_118 [1] : vector<16x32xf32> to vector<16xf32>
    %290 = vector.shape_cast %289 : vector<16xf32> to vector<16x1xf32>
    %cst_119 = arith.constant 3.200000e+01 : f32
    %291 = vector.broadcast %cst_119 : f32 to vector<16x1xf32>
    %292 = arith.divf %290, %291 : vector<16x1xf32>
    %293 = vector.broadcast %285 : vector<16x1xf32> to vector<16x32xf32>
    %294 = arith.subf %277, %293 : vector<16x32xf32>
    %cst_120 = arith.constant 9.99999974E-6 : f32
    %295 = vector.broadcast %cst_120 : f32 to vector<16x1xf32>
    %296 = arith.addf %292, %295 : vector<16x1xf32>
    %297 = math.rsqrt %296 : vector<16x1xf32>
    %298 = vector.broadcast %297 : vector<16x1xf32> to vector<16x32xf32>
    %299 = arith.mulf %294, %298 : vector<16x32xf32>
    %300 = vector.broadcast %279 : vector<1x32xf32> to vector<16x32xf32>
    %301 = arith.mulf %299, %300 : vector<16x32xf32>
    %302 = vector.broadcast %281 : vector<1x32xf32> to vector<16x32xf32>
    %303 = arith.addf %301, %302 : vector<16x32xf32>
    %c0_121 = arith.constant 0 : index
    %c0_122 = arith.constant 0 : index
    %304 = vector.load %arg15[%c0_121, %c0_122] : memref<32x16xf32, #tpu.memory_space<vmem>>, vector<32x16xf32>
    %cst_123 = arith.constant dense<0.000000e+00> : vector<16x16xf32>
    %305 = tpu.matmul %303, %304, %cst_123 {dimension_numbers = #tpu.dot_dimension_numbers<[1], [0], [0], [1], [0, 0, 1, 1], [], []>} : vector<16x32xf32>, vector<32x16xf32>, vector<16x16xf32> -> vector<16x16xf32>
    %c0_124 = arith.constant 0 : index
    %c0_125 = arith.constant 0 : index
    %306 = vector.load %arg16[%c0_124, %c0_125] : memref<1x16xf32, #tpu.memory_space<vmem>>, vector<1x16xf32>
    %307 = vector.broadcast %306 : vector<1x16xf32> to vector<16x16xf32>
    %308 = arith.addf %305, %307 : vector<16x16xf32>
    %cst_126 = arith.constant 0.000000e+00 : f32
    %309 = vector.broadcast %cst_126 : f32 to vector<16x16xf32>
    %310 = arith.maximumf %308, %309 : vector<16x16xf32>
    %c0_127 = arith.constant 0 : index
    %c0_128 = arith.constant 0 : index
    %311 = vector.load %arg17[%c0_127, %c0_128] : memref<16x2xf32, #tpu.memory_space<vmem>>, vector<16x2xf32>
    %cst_129 = arith.constant dense<0.000000e+00> : vector<16x2xf32>
    %312 = tpu.matmul %310, %311, %cst_129 {dimension_numbers = #tpu.dot_dimension_numbers<[1], [0], [0], [1], [0, 0, 1, 1], [], []>} : vector<16x16xf32>, vector<16x2xf32>, vector<16x2xf32> -> vector<16x2xf32>
    %c0_130 = arith.constant 0 : index
    %c0_131 = arith.constant 0 : index
    %313 = vector.load %arg18[%c0_130, %c0_131] : memref<1x2xf32, #tpu.memory_space<vmem>>, vector<1x2xf32>
    %314 = vector.broadcast %313 : vector<1x2xf32> to vector<16x2xf32>
    %315 = arith.addf %312, %314 : vector<16x2xf32>
    %cst_132 = arith.constant dense<0xFF800000> : vector<16xf32>
    %316 = vector.multi_reduction <maximumf>, %315, %cst_132 [1] : vector<16x2xf32> to vector<16xf32>
    %317 = vector.shape_cast %316 : vector<16xf32> to vector<16x1xf32>
    %318 = vector.broadcast %317 : vector<16x1xf32> to vector<16x2xf32>
    %319 = arith.subf %315, %318 : vector<16x2xf32>
    %320 = math.exp %319 : vector<16x2xf32>
    %cst_133 = arith.constant dense<0.000000e+00> : vector<16xf32>
    %321 = vector.multi_reduction <add>, %320, %cst_133 [1] : vector<16x2xf32> to vector<16xf32>
    %322 = vector.shape_cast %321 : vector<16xf32> to vector<16x1xf32>
    %323 = math.log %322 : vector<16x1xf32>
    %324 = vector.broadcast %323 : vector<16x1xf32> to vector<16x2xf32>
    %325 = arith.subf %319, %324 : vector<16x2xf32>
    %326 = vector.shape_cast %325 : vector<16x2xf32> to vector<2x8x2xf32>
    %c0_134 = arith.constant 0 : index
    %c0_135 = arith.constant 0 : index
    %c0_136 = arith.constant 0 : index
    %327 = vector.load %arg19[%c0_134, %c0_135, %c0_136] : memref<2x8x2xf32, #tpu.memory_space<vmem>>, vector<2x8x2xf32>
    tpu.vector_store %arg19[%c0_134, %c0_135, %c0_136], %326 {strides = array<i32>} : memref<2x8x2xf32, #tpu.memory_space<vmem>>, vector<2x8x2xf32>,
    return
  }
}

</mosaic_0001>

<bundles_post_ra>
// kernel: tpu_custom_call.1
= control target key start
LH: loop header
LB: loop body
LE: loop exit
PB: predicated region body
PF: predicated region fallthrough
CT: control target
= control target key end

     0   :  { %vm79_vm0 = vcmask 1043456   ;;  %vm72_vm1 = vcmask 31744   ;;  %v160_v0 = vlaneseq  ;;  %s9220_s24 = smov 30   ;;  %vm174_vm3 = vcmask 244736   ;;  %s9224_s25 = smov 112   ;;  %s12251_s1 = inlined_call_operand.vmem [shape: f32[4,30], index: 1, kind: input, shape index: {}]   ;;  %s12252_s0 = inlined_call_operand.vmem [shape: f32[2,8,4], index: 0, kind: input, shape index: {}]   ;;  %s12253_s3 = inlined_call_operand.vmem [shape: f32[2,32,96], index: 3, kind: input, shape index: {}]   ;;  %s12254_s2 = inlined_call_operand.vmem [shape: f32[1,30], index: 2, kind: input, shape index: {}]   ;;  %s12255_s4 = inlined_call_operand.vmem [shape: f32[2,1,96], index: 4, kind: input, shape index: {}]   ;;  %s12256_s5 = inlined_call_operand.vmem [shape: f32[2,32,32], index: 5, kind: input, shape index: {}]   ;;  %s12257_s6 = inlined_call_operand.vmem [shape: f32[2,1,32], index: 6, kind: input, shape index: {}]   ;;  %s12258_s9 = inlined_call_operand.vmem [shape: f32[2,32,2048], index: 9, kind: input, shape index: {}]   ;;  %s12259_s7 = inlined_call_operand.vmem [shape: f32[2,1,32], index: 7, kind: input, shape index: {}]   ;;  %s12260_s8 = inlined_call_operand.vmem [shape: f32[2,1,32], index: 8, kind: input, shape index: {}]   ;;  %s12261_s11 = inlined_call_operand.vmem [shape: f32[2,2048,32], index: 11, kind: input, shape index: {}]   ;;  %s12262_s10 = inlined_call_operand.vmem [shape: f32[2,1,2048], index: 10, kind: input, shape index: {}]   ;;  %s12263_s12 = inlined_call_operand.vmem [shape: f32[2,1,32], index: 12, kind: input, shape index: {}]   ;;  %s12264_s13 = inlined_call_operand.vmem [shape: f32[2,1,32], index: 13, kind: input, shape index: {}]   ;;  %s12265_s14 = inlined_call_operand.vmem [shape: f32[2,1,32], index: 14, kind: input, shape index: {}]   ;;  %s12266_s15 = inlined_call_operand.vmem [shape: f32[32,16], index: 15, kind: input, shape index: {}]   ;;  %s12267_s17 = inlined_call_operand.vmem [shape: f32[16,2], index: 17, kind: input, shape index: {}]   ;;  %s12268_s16 = inlined_call_operand.vmem [shape: f32[1,16], index: 16, kind: input, shape index: {}]   ;;  %s12269_s18 = inlined_call_operand.vmem [shape: f32[1,2], index: 18, kind: input, shape index: {}]   ;;  %s12270_s19 = inlined_call_operand.vmem [shape: f32[2,8,2], index: 19, kind: output, shape index: {}]  }
   0x1   :  { %12285 = sst [smem:[#allocation2_spill]] %s12251_s1  ;;  %vm189_vm4 = vcmask 261120   ;;  %v7054_v27 = vld [vmem:[%s12255_s4] ss:$0 sm:$0xff]  ;;  %v9221_v29 = vmov 0.0   ;;  %vm9223_vm5 = vmmov 0  }
   0x2   :  { %12286 = sst [smem:[#allocation3_spill]] %s12252_s0  ;;  %s12289_s20 = sld [smem:[#allocation2_spill]]  ;;  %v9340_v4 = vshrl.u32 %v160_v0, 7  ;;  %v9342_v5 = vand.u32 127, %v160_v0  ;;  %vm301_vm6 = vcmask 64512   ;;  %vm1648_vm8 = vcmask 130048  }
   0x3   :  { %12287 = sst [smem:[#allocation4_spill]] %s12253_s3  ;;  %s12290_s22 = sld [smem:[#allocation3_spill]]  ;;  %vm1651_vm9 = vcmask 195584   ;;  %vm7019_vm10 = vcmask 15360  }
   0x4   :  { %12288 = sst [smem:[#allocation5_spill]] %s12254_s2  ;;  %v162_v6 = vcvt.s32.f32 %v9340_v4  ;;  %vm165_vm2 = vcmp.eq.s32.totalorder %v9342_v5, 0  ;;  %s12291_s26 = sld [smem:[#allocation4_spill]]  ;;  %vm9472_vm7 = vcmp.le.s32.totalorder %v9342_v5, %v9340_v4 }
   0x5   :  { %s12283_s2 = smov 104   ;;  %s12281_s27 = smov 96  }
   0x6   :  { %v166_v7 = vsub.f32 0.0, %v162_v6  ;;  %s12279_s28 = smov 64   ;;  %s12277_s23 = smov 8  }
   0x7   :  { %s12275_s29 = smov 16   ;;  %s12273_s1 = smov 24  }
   0x8   :  { %v64_v1 = vld [vmem:[%s12289_s20] sm:$0xf]  ;;  %v167_v8 = vsel %vm165_vm2, %v162_v6, %v166_v7  ;;  %s12298_s30 = smov 8  }
   0x9   :  { %v62_v2 = vld [vmem:[%s12290_s22] sm:$0xff]  ;;  %v63_v3 = vld [vmem:[%s12290_s22 + $0x8] sm:$0xff]  ;;  %8208 = vmatprep.subr.msk.mxu0 %vm79_vm0, %v64_v1  ;;  %v168_v9 = vmul.f32 1.442695, %v167_v8  ;;  %s12292_s22 = sld [smem:[#allocation5_spill]] }
   0xa   :  { %8210 = vmatprep.mubr.msk.f32.mxu0 %vm72_vm1, %v62_v2  ;;  %8209 = vmatpush3.msk.msra.mxu0 %vm79_vm0, %v64_v1  ;;  %v178_v11 = vld [vmem:[%s12291_s26] sm:$0xff]  ;;  %v179_v12 = vld [vmem:[%s12291_s26 + $0x8] sm:$0xff]  ;;  %v180_v14 = vld [vmem:[%s12291_s26 + $0x10] sm:$0xff] }
   0xb   :  { %8211 = vmatmul.mubr.msk.f32.vlgmr.msra.gmra.mrb[0].mxu0 %vm72_vm1, %v63_v3  ;;  %9130 = vpow2.f32 %v168_v9  ;;  %v8435_v13 = vpack.c.bf16 %v179_v12, %v178_v11  ;;  %v181_v15 = vld [vmem:[%s12291_s26 + $0x18] sm:$0xff]  ;;  %8224 = vmatprep.subr.mxu0 %v9221_v29 }
   0xc   :  { %v8439_v16 = vpack.c.bf16 %v181_v15, %v180_v14  ;;  %8226 = vmatprep.mubr.msk.f32.mxu0 %vm9223_vm5, %v9221_v29 }
   0xd   :  { %8436 = vmatprep.subr.bf16.mxu1 %v8435_v13 }
   0xe   :  { %8438 = vmatpush3.bf16.msra.mxu1 %v8435_v13 }
   0xf   :  { %8440 = vmatprep.subr.bf16.mxu1 %v8439_v16  ;;  %v7050_v17 = vld [vmem:[%s12292_s22] ss:$0 sm:$0xff] }
  0x12   :  { %8442 = vmatpush3.bf16.msra.mxu1 %v8439_v16 }
  0x13   :  { %8234 = vmatprep.subr.mxu1 %v9221_v29 }
  0x15   :  { %v9131_v10 = vpop.eup %9130 }
  0x16   :  { %171 = vrot.lane.b32.xlu0 %v9131_v10, %s9220_s24  ;;  %s9222_s24 = smov 120  }
  0x88   :  { %v172_v23 = vpop.permute.xlu0 %171 }
  0xde   :  { %v8212_v18 = vpop.f32.mrb[0].mxu0 }
  0xdf   :  { %v155_v19 = vadd.f32 %v8212_v18, %v7050_v17  ;;  %v149_v20 = vpop.f32.mrb[1].mxu0 }
  0xe0   :  { %v150_v21 = vadd.f32 %v7050_v17, %v149_v20 }
  0xe1   :  { %v159_v22 = vmax.f32 %v155_v19, 0.0 }
  0xe2   :  { %v158_v24 = vmax.f32 %v150_v21, 0.0 }
  0xe3   :  { %v9365_v26 = vsel %vm174_vm3, %v159_v22, %v172_v23 }
  0xe4   :  { %v9361_v25 = vsel %vm174_vm3, %v158_v24, %v172_v23 }
  0xe5   :  { %8221 = vmatprep.mubr.msk.f32.mxu1 %vm189_vm4, %v9361_v25 }
  0xe6   :  { %8222 = vmatmul.mubr.msk.f32.vlgmr.msra.gmra.mrb[0].mxu1 %vm189_vm4, %v9365_v26 }
  0xe7   :  { %8236 = vmatprep.mubr.msk.f32.mxu1 %vm9223_vm5, %v9221_v29 }
 0x1b9   :  { %v8223_v28 = vpop.f32.mrb[0].mxu1 }
 0x1ba   :  { %v9374_v30 = vadd.f32 %v8223_v28, %v7054_v27  ;;  %v262_v31 = vpop.f32.mrb[1].mxu1 }
 0x1bb   :  { %v9376_v32 = vadd.f32 %v7054_v27, %v262_v31 }
 0x1bc   :  { %275 = vrot.lane.b32.xlu1 %v9374_v30, %s9222_s24  ;;  %v292_v42 = vmul.f32 0.35355338, %v9374_v30 }
 0x1bd   :  { %273 = vrot.lane.b32.xlu0 %v9376_v32, %s9222_s24  ;;  %v291_v40 = vmul.f32 0.35355338, %v9376_v32 }
 0x1c0   :  { %279 = vrot.lane.b32.xlu1 %v9376_v32, %s9224_s25 }
 0x1c1   :  { %281 = vrot.lane.b32.xlu0 %v9374_v30, %s9224_s25 }
 0x1c4   :  { %285 = vrot.lane.b32.xlu1 %v9376_v32, %s12283_s2 }
 0x1c5   :  { %287 = vrot.lane.b32.xlu0 %v9374_v30, %s12283_s2 }
 0x1c8   :  { %299 = vrot.lane.b32.xlu1 %v9376_v32, %s12281_s27 }
 0x1c9   :  { %377 = vrot.lane.b32.xlu0 %v9374_v30, %s12281_s27 }
 0x22e   :  { %v9398_v33 = vpop.permute.xlu1 %275 }
 0x22f   :  { %531 = vrot.lane.b32.xlu0 %v9398_v33, %s12281_s27  ;;  %v9402_v34 = vpop.permute.xlu0 %273  ;;  %v294_v45 = vmul.f32 0.35355338, %v9398_v33 }
 0x230   :  { %454 = vrot.lane.b32.xlu1 %v9402_v34, %s12281_s27  ;;  %v293_v46 = vmul.f32 0.35355338, %v9402_v34 }
 0x232   :  { %v9406_v35 = vpop.permute.xlu1 %279 }
 0x233   :  { %v9408_v36 = vpop.permute.xlu0 %281  ;;  %v295_v49 = vmul.f32 0.35355338, %v9406_v35 }
 0x234   :  { %608 = vrot.lane.b32.xlu1 %v9406_v35, %s12281_s27  ;;  %685 = vrot.lane.b32.xlu0 %v9408_v36, %s12281_s27  ;;  %v296_v50 = vmul.f32 0.35355338, %v9408_v36 }
 0x236   :  { %v9414_v37 = vpop.permute.xlu1 %285 }
 0x237   :  { %v9416_v38 = vpop.permute.xlu0 %287  ;;  %v297_v53 = vmul.f32 0.35355338, %v9414_v37 }
 0x238   :  { %762 = vrot.lane.b32.xlu1 %v9414_v37, %s12281_s27  ;;  %839 = vrot.lane.b32.xlu0 %v9416_v38, %s12281_s27  ;;  %v298_v54 = vmul.f32 0.35355338, %v9416_v38 }
 0x23a   :  { %v300_v39 = vpop.permute.xlu1 %299 }
 0x23b   :  { %8225 = vmatpush3.xpose.msk.msra.mxu0 %vm301_vm6, %v300_v39  ;;  %v378_v41 = vpop.permute.xlu0 %377 }
 0x23c   :  { %8229 = vmatprep.subr.mxu0 %v9221_v29 }
 0x23e   :  { %8227 = vmatmul.mubr.msk.f32.vlgmr.msra.gmra.mrb[2].mxu0 %vm301_vm6, %v291_v40 }
 0x23f   :  { %8230 = vmatpush3.xpose.msk.msra.mxu0 %vm301_vm6, %v378_v41  ;;  %8231 = vmatprep.mubr.msk.f32.mxu0 %vm9223_vm5, %v9221_v29 }
 0x240   :  { %8239 = vmatprep.subr.mxu0 %v9221_v29 }
 0x242   :  { %8232 = vmatmul.mubr.msk.f32.vlgmr.msra.gmra.mrb[4].mxu0 %vm301_vm6, %v292_v42 }
 0x243   :  { %8241 = vmatprep.mubr.msk.f32.mxu0 %vm9223_vm5, %v9221_v29 }
 0x2a1   :  { %v532_v43 = vpop.permute.xlu0 %531 }
 0x2a2   :  { %v455_v44 = vpop.permute.xlu1 %454  ;;  %8240 = vmatpush3.xpose.msk.msra.mxu0 %vm301_vm6, %v532_v43 }
 0x2a3   :  { %8235 = vmatpush3.xpose.msk.msra.mxu1 %vm301_vm6, %v455_v44  ;;  %8249 = vmatprep.subr.mxu0 %v9221_v29 }
 0x2a4   :  { %8244 = vmatprep.subr.mxu1 %v9221_v29 }
 0x2a5   :  { %8242 = vmatmul.mubr.msk.f32.vlgmr.msra.gmra.mrb[6].mxu0 %vm301_vm6, %v294_v45 }
 0x2a6   :  { %8237 = vmatmul.mubr.msk.f32.vlgmr.msra.gmra.mrb[2].mxu1 %vm301_vm6, %v293_v46  ;;  %v609_v47 = vpop.permute.xlu1 %608  ;;  %v686_v48 = vpop.permute.xlu0 %685  ;;  %8251 = vmatprep.mubr.msk.f32.mxu0 %vm9223_vm5, %v9221_v29 }
 0x2a7   :  { %8245 = vmatpush3.xpose.msk.msra.mxu1 %vm301_vm6, %v609_v47  ;;  %8250 = vmatpush3.xpose.msk.msra.mxu0 %vm301_vm6, %v686_v48 }
 0x2a8   :  { %8246 = vmatprep.mubr.msk.f32.mxu1 %vm9223_vm5, %v9221_v29  ;;  %8254 = vmatprep.subr.mxu1 %v9221_v29 }
 0x2a9   :  { %8259 = vmatprep.subr.mxu0 %v9221_v29 }
 0x2aa   :  { %8247 = vmatmul.mubr.msk.f32.vlgmr.msra.gmra.mrb[4].mxu1 %vm301_vm6, %v295_v49  ;;  %v763_v51 = vpop.permute.xlu1 %762  ;;  %v840_v52 = vpop.permute.xlu0 %839  ;;  %8252 = vmatmul.mubr.msk.f32.vlgmr.msra.gmra.mrb[8].mxu0 %vm301_vm6, %v296_v50 }
 0x2ab   :  { %8255 = vmatpush3.xpose.msk.msra.mxu1 %vm301_vm6, %v763_v51  ;;  %8260 = vmatpush3.xpose.msk.msra.mxu0 %vm301_vm6, %v840_v52 }
 0x2ac   :  { %8256 = vmatprep.mubr.msk.f32.mxu1 %vm9223_vm5, %v9221_v29  ;;  %8261 = vmatprep.mubr.msk.f32.mxu0 %vm9223_vm5, %v9221_v29 }
 0x2ad   :  { %8264 = vmatprep.subr.mxu1 %v9221_v29  ;;  %8269 = vmatprep.subr.mxu0 %v9221_v29 }
 0x2ae   :  { %8257 = vmatmul.mubr.msk.f32.vlgmr.msra.gmra.mrb[6].mxu1 %vm301_vm6, %v297_v53  ;;  %8262 = vmatmul.mubr.msk.f32.vlgmr.msra.gmra.mrb[10].mxu0 %vm301_vm6, %v298_v54 }
 0x2af   :  { %8266 = vmatprep.mubr.msk.f32.mxu1 %vm9223_vm5, %v9221_v29  ;;  %8271 = vmatprep.mubr.msk.f32.mxu0 %vm9223_vm5, %v9221_v29 }
 0x311   :  { %v373_v56 = vpop.f32.mrb[2].mxu0 }
 0x312   :  { %v918_v57 = vsel %vm9472_vm7, %v373_v56, -1e+30  ;;  %v8228_v58 = vpop.f32.mrb[3].mxu0 }
 0x313   :  { %v926_v59 = vsel %vm301_vm6, %v918_v57, -inf }
 0x314   :  { %927 = vmax.xlane.f32.xlu1 %v926_v59 }
 0x315   :  { %v450_v60 = vpop.f32.mrb[4].mxu0 }
 0x316   :  { %v919_v61 = vsel %vm9472_vm7, %v450_v60, -1e+30  ;;  %v8233_v62 = vpop.f32.mrb[5].mxu0 }
 0x317   :  { %v929_v63 = vsel %vm301_vm6, %v919_v61, -inf }
 0x318   :  { %930 = vmax.xlane.f32.xlu0 %v929_v63 }
 0x378   :  { %v604_v0 = vpop.f32.mrb[6].mxu0 }
 0x379   :  { %v921_v1 = vsel %vm9472_vm7, %v604_v0, -1e+30  ;;  %v527_v2 = vpop.f32.mrb[2].mxu1  ;;  %v8243_v3 = vpop.f32.mrb[7].mxu0 }
 0x37a   :  { %v920_v5 = vsel %vm9472_vm7, %v527_v2, -1e+30  ;;  %v8238_v6 = vpop.f32.mrb[3].mxu1  ;;  %v935_v7 = vsel %vm301_vm6, %v921_v1, -inf }
 0x37b   :  { %936 = vmax.xlane.f32.xlu1 %v935_v7  ;;  %v932_v8 = vsel %vm301_vm6, %v920_v5, -inf }
 0x37c   :  { %933 = vmax.xlane.f32.xlu0 %v932_v8 }
 0x37d   :  { %v681_v9 = vpop.f32.mrb[4].mxu1  ;;  %v758_v10 = vpop.f32.mrb[8].mxu0 }
 0x37e   :  { %v922_v11 = vsel %vm9472_vm7, %v681_v9, -1e+30  ;;  %v923_v12 = vsel %vm9472_vm7, %v758_v10, -1e+30  ;;  %v8248_v13 = vpop.f32.mrb[5].mxu1  ;;  %v8253_v14 = vpop.f32.mrb[9].mxu0 }
 0x37f   :  { %v938_v15 = vsel %vm301_vm6, %v922_v11, -inf  ;;  %v941_v16 = vsel %vm301_vm6, %v923_v12, -inf }
 0x380   :  { %939 = vmax.xlane.f32.xlu0 %v938_v15  ;;  %942 = vmax.xlane.f32.xlu1 %v941_v16 }
 0x381   :  { %v835_v17 = vpop.f32.mrb[6].mxu1  ;;  %v912_v18 = vpop.f32.mrb[10].mxu0 }
 0x382   :  { %v924_v19 = vsel %vm9472_vm7, %v835_v17, -1e+30  ;;  %v925_v20 = vsel %vm9472_vm7, %v912_v18, -1e+30  ;;  %v8258_v21 = vpop.f32.mrb[7].mxu1  ;;  %v8263_v22 = vpop.f32.mrb[11].mxu0 }
 0x383   :  { %v944_v23 = vsel %vm301_vm6, %v924_v19, -inf  ;;  %v947_v24 = vsel %vm301_vm6, %v925_v20, -inf }
 0x384   :  { %945 = vmax.xlane.f32.xlu0 %v944_v23  ;;  %948 = vmax.xlane.f32.xlu1 %v947_v24 }
 0x395   :  { %1090 = vrot.lane.b32.xlu1 %v9374_v30, %s12279_s28 }
 0x399   :  { %1166 = vrot.lane.b32.xlu1 %v9402_v34, %s12279_s28 }
 0x39a   :  { %1014 = vrot.lane.b32.xlu0 %v9376_v32, %s12279_s28 }
 0x39d   :  { %1318 = vrot.lane.b32.xlu1 %v9406_v35, %s12279_s28 }
 0x39e   :  { %1242 = vrot.lane.b32.xlu0 %v9398_v33, %s12279_s28 }
 0x3a1   :  { %v928_v27 = vpop.xlane.xlu1 %927 }
 0x3a2   :  { %1394 = vrot.lane.b32.xlu0 %v9408_v36, %s12279_s28  ;;  %v950_v31 = vsub.f32 %v918_v57, %v928_v27 }
 0x3a4   :  { %v958_v30 = vmul.f32 1.442695, %v950_v31 }
 0x3a5   :  { %v931_v28 = vpop.xlane.xlu0 %930 }
 0x3a6   :  { %v951_v39 = vsub.f32 %v919_v61, %v931_v28  ;;  %9132 = vpow2.f32 %v958_v30 }
 0x3a8   :  { %v960_v40 = vmul.f32 1.442695, %v951_v39 }
 0x3aa   :  { %9134 = vpow2.f32 %v960_v40 }
 0x3b0   :  { %v9512_v34 = vpop.eup %9132 }
 0x3b1   :  { %v974_v35 = vsel %vm301_vm6, %v9512_v34, 0.0 }
 0x3b4   :  { %v9514_v32 = vpop.eup %9134 }
 0x3b5   :  { %v977_v33 = vsel %vm301_vm6, %v9514_v32, 0.0 }
 0x3c1   :  { %975 = vadd.xlane.f32.xlu0 %v974_v35  ;;  %978 = vadd.xlane.f32.xlu1 %v977_v33 }
 0x408   :  { %v937_v36 = vpop.xlane.xlu1 %936 }
 0x409   :  { %v953_v41 = vsub.f32 %v921_v1, %v937_v36  ;;  %v934_v42 = vpop.xlane.xlu0 %933 }
 0x40a   :  { %v952_v43 = vsub.f32 %v920_v5, %v934_v42 }
 0x40b   :  { %v964_v44 = vmul.f32 1.442695, %v953_v41 }
 0x40c   :  { %v962_v45 = vmul.f32 1.442695, %v952_v43 }
 0x40d   :  { %9136 = vpow2.f32 %v964_v44  ;;  %v940_v46 = vpop.xlane.xlu0 %939  ;;  %v943_v47 = vpop.xlane.xlu1 %942 }
 0x40e   :  { %9138 = vpow2.f32 %v962_v45  ;;  %v954_v48 = vsub.f32 %v922_v11, %v940_v46  ;;  %v955_v49 = vsub.f32 %v923_v12, %v943_v47  ;;  %v1654_v47 = vld [vmem:[%s12256_s5] sm:$0xff] }
 0x410   :  { %v966_v50 = vmul.f32 1.442695, %v954_v48  ;;  %v968_v51 = vmul.f32 1.442695, %v955_v49  ;;  %v1655_v48 = vld [vmem:[%s12256_s5 + $0x8] sm:$0xff] }
 0x411   :  { %v946_v52 = vpop.xlane.xlu0 %945  ;;  %v949_v53 = vpop.xlane.xlu1 %948  ;;  %v8443_v49 = vpack.c.bf16 %v1655_v48, %v1654_v47  ;;  %v1826_v47 = vld [vmem:[%s12258_s9 + $0x108] sm:$0xff] }
 0x412   :  { %9140 = vpow2.f32 %v966_v50  ;;  %v956_v54 = vsub.f32 %v924_v19, %v946_v52  ;;  %v957_v56 = vsub.f32 %v925_v20, %v949_v53  ;;  %v1656_v50 = vld [vmem:[%s12256_s5 + $0x10] sm:$0xff]  ;;  %v1842_v48 = vld [vmem:[%s12258_s9 + $0x188] sm:$0xff] }
 0x413   :  { %9142 = vpow2.f32 %v968_v51  ;;  %v1657_v51 = vld [vmem:[%s12256_s5 + $0x18] sm:$0xff] }
 0x414   :  { %v970_v57 = vmul.f32 1.442695, %v956_v54  ;;  %v972_v58 = vmul.f32 1.442695, %v957_v56  ;;  %v8447_v52 = vpack.c.bf16 %v1657_v51, %v1656_v50  ;;  %v8455_v50 = vpack.c.bf16 %v1842_v48, %v1826_v47  ;;  %v1844_v51 = vld [vmem:[%s12258_s9 + $0x198] sm:$0xff]  ;;  %v1834_v48 = vld [vmem:[%s12258_s9 + $0x148] sm:$0xff] }
 0x415   :  { %v1015_v59 = vpop.permute.xlu0 %1014  ;;  %v1091_v60 = vpop.permute.xlu1 %1090 }
 0x416   :  { %9144 = vpow2.f32 %v970_v57  ;;  %8265 = vmatpush3.msra.mxu1 %v1015_v59  ;;  %8270 = vmatpush3.msra.mxu0 %v1091_v60 }
 0x417   :  { %v9137_v61 = vpop.eup %9136  ;;  %9146 = vpow2.f32 %v972_v58  ;;  %8274 = vmatprep.subr.mxu1 %v9221_v29  ;;  %8279 = vmatprep.subr.mxu0 %v9221_v29 }
 0x418   :  { %v9139_v62 = vpop.eup %9138  ;;  %v983_v63 = vsel %vm301_vm6, %v9137_v61, 0.0 }
 0x419   :  { %984 = vadd.xlane.f32.xlu1 %v983_v63  ;;  %v980_v0 = vsel %vm301_vm6, %v9139_v62, 0.0  ;;  %v1243_v10 = vpop.permute.xlu0 %1242  ;;  %v1167_v11 = vpop.permute.xlu1 %1166 }
 0x41a   :  { %981 = vadd.xlane.f32.xlu0 %v980_v0 }
 0x41c   :  { %v9141_v1 = vpop.eup %9140 }
 0x41d   :  { %v9143_v2 = vpop.eup %9142  ;;  %v986_v3 = vsel %vm301_vm6, %v9141_v1, 0.0  ;;  %v1395_v12 = vpop.permute.xlu0 %1394 }
 0x41e   :  { %987 = vadd.xlane.f32.xlu0 %v986_v3  ;;  %v989_v5 = vsel %vm301_vm6, %v9143_v2, 0.0  ;;  %v1319_v13 = vpop.permute.xlu1 %1318 }
 0x41f   :  { %990 = vadd.xlane.f32.xlu1 %v989_v5 }
 0x420   :  { %v9526_v6 = vpop.eup %9144 }
 0x421   :  { %v9528_v7 = vpop.eup %9146  ;;  %v992_v8 = vsel %vm301_vm6, %v9526_v6, 0.0 }
 0x422   :  { %993 = vadd.xlane.f32.xlu0 %v992_v8  ;;  %v995_v9 = vsel %vm301_vm6, %v9528_v7, 0.0 }
 0x423   :  { %996 = vadd.xlane.f32.xlu1 %v995_v9 }
 0x434   :  { %1470 = vrot.lane.b32.xlu1 %v9414_v37, %s12279_s28 }
 0x438   :  { %1546 = vrot.lane.b32.xlu0 %v9416_v38, %s12279_s28 }
 0x44e   :  { %v976_v14 = vpop.xlane.xlu0 %975  ;;  %v979_v15 = vpop.xlane.xlu1 %978 }
 0x44f   :  { %9148 = vrcp.f32 %v976_v14 }
 0x450   :  { %9150 = vrcp.f32 %v979_v15  ;;  %v7081_v15 = vld [vmem:[%s12257_s6] ss:$0 sm:$0xff] }
 0x459   :  { %v9149_v16 = vpop.eup %9148 }
 0x45a   :  { %v9151_v17 = vpop.eup %9150  ;;  %v1006_v18 = vmul.f32 %v9149_v16, %v9512_v34 }
 0x45b   :  { %v1007_v19 = vmul.f32 %v9151_v17, %v9514_v32 }
 0x45c   :  { %8267 = vmatmul.mubr.msk.f32.vlgmr.msra.gmra.mrb[8].mxu1 %vm301_vm6, %v1006_v18 }
 0x45d   :  { %8272 = vmatmul.mubr.msk.f32.vlgmr.msra.gmra.mrb[12].mxu0 %vm301_vm6, %v1007_v19  ;;  %8275 = vmatpush3.msra.mxu1 %v1167_v11 }
 0x45e   :  { %8280 = vmatpush3.msra.mxu0 %v1243_v10  ;;  %8281 = vmatprep.mubr.msk.f32.mxu0 %vm9223_vm5, %v9221_v29 }
 0x45f   :  { %8289 = vmatprep.subr.mxu0 %v9221_v29  ;;  %8276 = vmatprep.mubr.msk.f32.mxu1 %vm9223_vm5, %v9221_v29 }
 0x460   :  { %8284 = vmatprep.subr.mxu1 %v9221_v29 }
 0x4a6   :  { %v985_v37 = vpop.xlane.xlu1 %984 }
 0x4a7   :  { %9152 = vrcp.f32 %v985_v37  ;;  %v982_v38 = vpop.xlane.xlu0 %981 }
 0x4a8   :  { %9154 = vrcp.f32 %v982_v38 }
 0x4ab   :  { %v988_v20 = vpop.xlane.xlu0 %987 }
 0x4ac   :  { %9156 = vrcp.f32 %v988_v20  ;;  %v991_v21 = vpop.xlane.xlu1 %990 }
 0x4ad   :  { %9158 = vrcp.f32 %v991_v21 }
 0x4af   :  { %v994_v22 = vpop.xlane.xlu0 %993 }
 0x4b0   :  { %9160 = vrcp.f32 %v994_v22  ;;  %v997_v23 = vpop.xlane.xlu1 %996 }
 0x4b1   :  { %v9153_v24 = vpop.eup %9152  ;;  %9162 = vrcp.f32 %v997_v23 }
 0x4b2   :  { %v9155_v27 = vpop.eup %9154  ;;  %v1009_v28 = vmul.f32 %v9153_v24, %v9137_v61 }
 0x4b3   :  { %v1008_v31 = vmul.f32 %v9155_v27, %v9139_v62  ;;  %v1547_v33 = vpop.permute.xlu0 %1546 }
 0x4b4   :  { %8282 = vmatmul.mubr.msk.f32.vlgmr.msra.gmra.mrb[14].mxu0 %vm301_vm6, %v1009_v28  ;;  %v1471_v32 = vpop.permute.xlu1 %1470 }
 0x4b5   :  { %8290 = vmatpush3.msra.mxu0 %v1395_v12  ;;  %8277 = vmatmul.mubr.msk.f32.vlgmr.msra.gmra.mrb[10].mxu1 %vm301_vm6, %v1008_v31 }
 0x4b6   :  { %v9157_v39 = vpop.eup %9156  ;;  %8285 = vmatpush3.msra.mxu1 %v1319_v13  ;;  %8286 = vmatprep.mubr.msk.f32.mxu1 %vm9223_vm5, %v9221_v29 }
 0x4b7   :  { %v9159_v30 = vpop.eup %9158  ;;  %v1010_v40 = vmul.f32 %v9157_v39, %v9141_v1  ;;  %8291 = vmatprep.mubr.msk.f32.mxu0 %vm9223_vm5, %v9221_v29  ;;  %8294 = vmatprep.subr.mxu1 %v9221_v29 }
 0x4b8   :  { %v1011_v34 = vmul.f32 %v9159_v30, %v9143_v2  ;;  %8299 = vmatprep.subr.mxu0 %v9221_v29 }
 0x4b9   :  { %8287 = vmatmul.mubr.msk.f32.vlgmr.msra.gmra.mrb[12].mxu1 %vm301_vm6, %v1010_v40  ;;  %v1794_v40 = vld [vmem:[%s12258_s9 + $0x8] sm:$0xff] }
 0x4ba   :  { %v9161_v35 = vpop.eup %9160  ;;  %8292 = vmatmul.mubr.msk.f32.vlgmr.msra.gmra.mrb[16].mxu0 %vm301_vm6, %v1011_v34  ;;  %8295 = vmatpush3.msra.mxu1 %v1471_v32  ;;  %v1810_v34 = vld [vmem:[%s12258_s9 + $0x88] sm:$0xff]  ;;  %v1796_v32 = vld [vmem:[%s12258_s9 + $0x18] sm:$0xff] }
 0x4bb   :  { %v9163_v36 = vpop.eup %9162  ;;  %v1012_v41 = vmul.f32 %v9161_v35, %v9526_v6  ;;  %8300 = vmatpush3.msra.mxu0 %v1547_v33  ;;  %8296 = vmatprep.mubr.msk.f32.mxu1 %vm9223_vm5, %v9221_v29  ;;  %v8451_v35 = vpack.c.bf16 %v1810_v34, %v1794_v40  ;;  %v1812_v33 = vld [vmem:[%s12258_s9 + $0x98] sm:$0xff]  ;;  %v1802_v40 = vld [vmem:[%s12258_s9 + $0x48] sm:$0xff] }
 0x4bc   :  { %v1013_v42 = vmul.f32 %v9163_v36, %v9528_v7  ;;  %8301 = vmatprep.mubr.msk.f32.mxu0 %vm9223_vm5, %v9221_v29  ;;  %8444 = vmatprep.subr.bf16.mxu1 %v8443_v49  ;;  %v1793_v36 = vld [vmem:[%s12258_s9] sm:$0xff]  ;;  %v1818_v34 = vld [vmem:[%s12258_s9 + $0xc8] sm:$0xff] }
 0x4bd   :  { %8297 = vmatmul.mubr.msk.f32.vlgmr.msra.gmra.mrb[14].mxu1 %vm301_vm6, %v1012_v41  ;;  %v1809_v41 = vld [vmem:[%s12258_s9 + $0x80] sm:$0xff]  ;;  %8452 = vmatprep.subr.bf16.mxu0 %v8451_v35  ;;  %v1820_v35 = vld [vmem:[%s12258_s9 + $0xd8] sm:$0xff] }
 0x4be   :  { %8302 = vmatmul.mubr.msk.f32.vlgmr.msra.gmra.mrb[18].mxu0 %vm301_vm6, %v1013_v42  ;;  %8446 = vmatpush3.bf16.msra.mxu1 %v8443_v49  ;;  %v8459_v42 = vpack.c.bf16 %v1812_v33, %v1796_v32  ;;  %v1828_v49 = vld [vmem:[%s12258_s9 + $0x118] sm:$0xff] }
 0x4bf   :  { %2011 = vmatprep.mubr.f32.mxu0 %v9221_v29  ;;  %8448 = vmatprep.subr.bf16.mxu1 %v8447_v52  ;;  %v1804_v32 = vld [vmem:[%s12258_s9 + $0x58] sm:$0xff] }
 0x4c0   :  { %v8491_v47 = vpack.c.bf16 %v1820_v35, %v1804_v32  ;;  %v2614_v32 = vld [vmem:[%s12261_s11 + $0x98] sm:$0xff]  ;;  %v2645_v35 = vld [vmem:[%s12261_s11 + $0x190] sm:$0xff] }
 0x4c2   :  { %8450 = vmatpush3.bf16.msra.mxu1 %v8447_v52  ;;  %v1825_v52 = vld [vmem:[%s12258_s9 + $0x100] sm:$0xff] }
 0x4c3   :  { %8460 = vmatprep.subr.bf16.mxu1 %v8459_v42 }
 0x52f   :  { %v1086_v43 = vpop.f32.mrb[8].mxu1 }
 0x530   :  { %v1162_v44 = vpop.f32.mrb[12].mxu0  ;;  %v8268_v45 = vpop.f32.mrb[9].mxu1 }
 0x531   :  { %v8273_v46 = vpop.f32.mrb[13].mxu0  ;;  %v1811_v45 = vld [vmem:[%s12258_s9 + $0x90] sm:$0xff] }
 0x587   :  { %v1314_v53 = vpop.f32.mrb[14].mxu0 }
 0x588   :  { %v1238_v54 = vpop.f32.mrb[10].mxu1  ;;  %1626 = vrot.lane.b32.xlu0 %v1314_v53, %s12277_s23  ;;  %v8283_v56 = vpop.f32.mrb[15].mxu0  ;;  %v1841_v53 = vld [vmem:[%s12258_s9 + $0x180] sm:$0xff] }
 0x589   :  { %1624 = vrot.lane.b32.xlu1 %v1238_v54, %s12277_s23  ;;  %v8278_v57 = vpop.f32.mrb[11].mxu1  ;;  %v8463_v54 = vpack.c.bf16 %v1844_v51, %v1828_v49  ;;  %v8457_v56 = vpack.c.bf16 %v1841_v53, %v1825_v52  ;;  %v1850_v49 = vld [vmem:[%s12258_s9 + $0x1c8] sm:$0xff]  ;;  %v1852_v51 = vld [vmem:[%s12258_s9 + $0x1d8] sm:$0xff] }
 0x58a   :  { %v1827_v57 = vld [vmem:[%s12258_s9 + $0x110] sm:$0xff] }
 0x58c   :  { %v1390_v58 = vpop.f32.mrb[12].mxu1 }
 0x58d   :  { %v1466_v59 = vpop.f32.mrb[16].mxu0  ;;  %1632 = vrot.lane.b32.xlu1 %v1390_v58, %s12275_s29  ;;  %v8288_v60 = vpop.f32.mrb[13].mxu1  ;;  %v1843_v58 = vld [vmem:[%s12258_s9 + $0x190] sm:$0xff] }
 0x58e   :  { %1634 = vrot.lane.b32.xlu0 %v1466_v59, %s12275_s29  ;;  %v8293_v61 = vpop.f32.mrb[17].mxu0  ;;  %v8465_v59 = vpack.c.bf16 %v1843_v58, %v1827_v57  ;;  %v1798_v60 = vld [vmem:[%s12258_s9 + $0x28] sm:$0xff]  ;;  %v1835_v57 = vld [vmem:[%s12258_s9 + $0x150] sm:$0xff]  ;;  %s12295_s29 = smov 104  }
 0x58f   :  { %v1814_v61 = vld [vmem:[%s12258_s9 + $0xa8] sm:$0xff]  ;;  %v1851_v58 = vld [vmem:[%s12258_s9 + $0x1d0] sm:$0xff] }
 0x590   :  { %v1542_v62 = vpop.f32.mrb[14].mxu1 }
 0x591   :  { %v1618_v63 = vpop.f32.mrb[18].mxu0  ;;  %1640 = vrot.lane.b32.xlu1 %v1542_v62, %s12273_s1  ;;  %v8298_v0 = vpop.f32.mrb[15].mxu1  ;;  %v1800_v62 = vld [vmem:[%s12258_s9 + $0x38] sm:$0xff] }
 0x592   :  { %1642 = vrot.lane.b32.xlu0 %v1618_v63, %s12273_s1  ;;  %v8303_v1 = vpop.f32.mrb[19].mxu0  ;;  %v8467_v63 = vpack.c.bf16 %v1814_v61, %v1798_v60  ;;  %v1816_v0 = vld [vmem:[%s12258_s9 + $0xb8] sm:$0xff]  ;;  %v1806_v61 = vld [vmem:[%s12258_s9 + $0x68] sm:$0xff] }
 0x593   :  { %v8475_v1 = vpack.c.bf16 %v1816_v0, %v1800_v62  ;;  %v1822_v62 = vld [vmem:[%s12258_s9 + $0xe8] sm:$0xff]  ;;  %v1824_v0 = vld [vmem:[%s12258_s9 + $0xf8] sm:$0xff] }
 0x5fa   :  { %v1627_v2 = vpop.permute.xlu0 %1626 }
 0x5fb   :  { %v1625_v3 = vpop.permute.xlu1 %1624  ;;  %v1647_v8 = vsel %vm301_vm6, %v1162_v44, %v1627_v2  ;;  %v1795_v44 = vld [vmem:[%s12258_s9 + $0x10] sm:$0xff] }
 0x5fc   :  { %v1646_v7 = vsel %vm301_vm6, %v1086_v43, %v1625_v3  ;;  %v8453_v43 = vpack.c.bf16 %v1809_v41, %v1793_v36  ;;  %v8461_v46 = vpack.c.bf16 %v1811_v45, %v1795_v44  ;;  %v1801_v41 = vld [vmem:[%s12258_s9 + $0x40] sm:$0xff]  ;;  %v1803_v44 = vld [vmem:[%s12258_s9 + $0x50] sm:$0xff] }
 0x5fd   :  { %v1819_v45 = vld [vmem:[%s12258_s9 + $0xd0] sm:$0xff] }
 0x5fe   :  { %8454 = vmatpush1.bf16.msra.mxu0 %v8453_v43  ;;  %v1817_v43 = vld [vmem:[%s12258_s9 + $0xc0] sm:$0xff]  ;;  %v8493_v53 = vpack.c.bf16 %v1819_v45, %v1803_v44  ;;  %v2598_v44 = vld [vmem:[%s12261_s11 + $0x18] sm:$0xff] }
 0x5ff   :  { %v1633_v5 = vpop.permute.xlu1 %1632  ;;  %8456 = vmatprep.subr.bf16.mxu0 %v8455_v50  ;;  %v1836_v50 = vld [vmem:[%s12258_s9 + $0x158] sm:$0xff]  ;;  %v8485_v52 = vpack.c.bf16 %v1817_v43, %v1801_v41  ;;  %v2597_v43 = vld [vmem:[%s12261_s11 + $0x10] sm:$0xff] }
 0x600   :  { %v1635_v6 = vpop.permute.xlu0 %1634  ;;  %v1649_v9 = vsel %vm1648_vm8, %v1646_v7, %v1633_v5  ;;  %v8495_v60 = vpack.c.bf16 %v1852_v51, %v1836_v50  ;;  %v2616_v50 = vld [vmem:[%s12261_s11 + $0xa8] sm:$0xff]  ;;  %v2647_v51 = vld [vmem:[%s12261_s11 + $0x1a0] sm:$0xff] }
 0x601   :  { %v1650_v11 = vsel %vm1648_vm8, %v1647_v8, %v1635_v6 }
 0x602   :  { %8458 = vmatpush1.bf16.msra.mxu0 %v8457_v56  ;;  %v1849_v56 = vld [vmem:[%s12258_s9 + $0x1c0] sm:$0xff] }
 0x603   :  { %v1641_v10 = vpop.permute.xlu1 %1640  ;;  %8468 = vmatprep.subr.bf16.mxu0 %v8467_v63  ;;  %v1808_v63 = vld [vmem:[%s12258_s9 + $0x78] sm:$0xff] }
 0x604   :  { %v1652_v12 = vsel %vm1651_vm9, %v1649_v9, %v1641_v10  ;;  %v1643_v13 = vpop.permute.xlu0 %1642 }
 0x605   :  { %v1653_v14 = vsel %vm1651_vm9, %v1650_v11, %v1643_v13  ;;  %8312 = vmatprep.mubr.msk.f32.mxu1 %vm189_vm4, %v1652_v12  ;;  %v7084_v11 = vld [vmem:[%s12259_s7] ss:$0 sm:$0xff] }
 0x606   :  { %8313 = vmatmul.mubr.msk.f32.vlgmr.msra.gmra.mrb[16].mxu1 %vm189_vm4, %v1653_v14  ;;  %v1797_v12 = vld [vmem:[%s12258_s9 + $0x20] sm:$0xff] }
 0x607   :  { %2088 = vmatprep.mubr.f32.mxu1 %v9221_v29  ;;  %8462 = vmatpush1.bf16.msra.mxu1 %v8461_v46  ;;  %v8483_v46 = vpack.c.bf16 %v1818_v34, %v1802_v40  ;;  %v2628_v40 = vld [vmem:[%s12261_s11 + $0x108] sm:$0xff]  ;;  %v2613_v34 = vld [vmem:[%s12261_s11 + $0x90] sm:$0xff] }
 0x608   :  { %8464 = vmatprep.subr.bf16.mxu1 %v8463_v54  ;;  %v1833_v54 = vld [vmem:[%s12258_s9 + $0x140] sm:$0xff]  ;;  %v8519_v45 = vpack.c.bf16 %v2614_v32, %v2613_v34  ;;  %v2638_v34 = vld [vmem:[%s12261_s11 + $0x158] sm:$0xff] }
 0x609   :  { %v2623_v32 = vld [vmem:[%s12261_s11 + $0xe0] sm:$0xff] }
 0x60b   :  { %8466 = vmatpush1.bf16.msra.mxu1 %v8465_v59  ;;  %v8487_v59 = vpack.c.bf16 %v1850_v49, %v1834_v48  ;;  %v2630_v48 = vld [vmem:[%s12261_s11 + $0x118] sm:$0xff]  ;;  %v2615_v49 = vld [vmem:[%s12261_s11 + $0xa0] sm:$0xff] }
 0x60c   :  { %8476 = vmatprep.subr.bf16.mxu1 %v8475_v1  ;;  %v8489_v1 = vpack.c.bf16 %v1849_v56, %v1833_v54  ;;  %v2599_v56 = vld [vmem:[%s12261_s11 + $0x20] sm:$0xff] }
 0x6d9   :  { %v8314_v16 = vpop.f32.mrb[16].mxu1 }
 0x6da   :  { %v1743_v17 = vadd.f32 %v8314_v16, %v7081_v15  ;;  %v1737_v18 = vpop.f32.mrb[17].mxu1  ;;  %v1799_v16 = vld [vmem:[%s12258_s9 + $0x30] sm:$0xff] }
 0x6db   :  { %v1738_v19 = vadd.f32 %v7081_v15, %v1737_v18  ;;  %v1813_v15 = vld [vmem:[%s12258_s9 + $0xa0] sm:$0xff] }
 0x6dc   :  { %v1747_v37 = vadd.f32 %v1743_v17, %v9365_v26  ;;  %v1815_v17 = vld [vmem:[%s12258_s9 + $0xb0] sm:$0xff]  ;;  %v7085_v18 = vld [vmem:[%s12260_s8] ss:$0 sm:$0xff] }
 0x6dd   :  { %v1746_v38 = vadd.f32 %v1738_v19, %v9361_v25  ;;  %v1830_v19 = vld [vmem:[%s12258_s9 + $0x128] sm:$0xff] }
 0x6de   :  { %v1753_v20 = vsel %vm189_vm4, %v1747_v37, 0.0 }
 0x6df   :  { %1754 = vadd.xlane.f32.xlu0 %v1753_v20  ;;  %v1750_v21 = vsel %vm189_vm4, %v1746_v38, 0.0  ;;  %v1832_v20 = vld [vmem:[%s12258_s9 + $0x138] sm:$0xff] }
 0x6e0   :  { %1751 = vadd.xlane.f32.xlu1 %v1750_v21  ;;  %v1848_v21 = vld [vmem:[%s12258_s9 + $0x1b8] sm:$0xff] }
 0x76c   :  { %v1755_v22 = vpop.xlane.xlu0 %1754 }
 0x76d   :  { %v1758_v23 = vmul.f32 0.03125, %v1755_v22  ;;  %v1752_v24 = vpop.xlane.xlu1 %1751  ;;  %v8469_v22 = vpack.c.bf16 %v1813_v15, %v1797_v12  ;;  %v1840_v12 = vld [vmem:[%s12258_s9 + $0x178] sm:$0xff] }
 0x76e   :  { %v1757_v27 = vmul.f32 0.03125, %v1752_v24  ;;  %v1829_v24 = vld [vmem:[%s12258_s9 + $0x120] sm:$0xff] }
 0x76f   :  { %v9601_v28 = vsub.f32 %v1747_v37, %v1758_v23  ;;  %v8477_v23 = vpack.c.bf16 %v1815_v17, %v1799_v16  ;;  %v1837_v16 = vld [vmem:[%s12258_s9 + $0x160] sm:$0xff] }
 0x770   :  { %v9603_v31 = vsub.f32 %v1746_v38, %v1757_v27  ;;  %v1846_v38 = vld [vmem:[%s12258_s9 + $0x1a8] sm:$0xff]  ;;  %v1853_v17 = vld [vmem:[%s12258_s9 + $0x1e0] sm:$0xff] }
 0x771   :  { %v1762_v39 = vmul.f32 %v9601_v28, %v9601_v28 }
 0x772   :  { %v1761_v25 = vmul.f32 %v9603_v31, %v9603_v31 }
 0x773   :  { %v1766_v26 = vsel %vm189_vm4, %v1762_v39, 0.0  ;;  %v1831_v39 = vld [vmem:[%s12258_s9 + $0x130] sm:$0xff] }
 0x774   :  { %1767 = vadd.xlane.f32.xlu1 %v1766_v26  ;;  %v1763_v30 = vsel %vm189_vm4, %v1761_v25, 0.0  ;;  %v1847_v25 = vld [vmem:[%s12258_s9 + $0x1b0] sm:$0xff]  ;;  %v8471_v26 = vpack.c.bf16 %v1846_v38, %v1830_v19 }
 0x775   :  { %1764 = vadd.xlane.f32.xlu0 %v1763_v30  ;;  %v8479_v30 = vpack.c.bf16 %v1848_v21, %v1832_v20  ;;  %v8481_v36 = vpack.c.bf16 %v1847_v25, %v1831_v39  ;;  %v1855_v19 = vld [vmem:[%s12258_s9 + $0x1f0] sm:$0xff]  ;;  %v2611_v20 = vld [vmem:[%s12261_s11 + $0x80] sm:$0xff]  ;;  %v2612_v21 = vld [vmem:[%s12261_s11 + $0x88] sm:$0xff] }
 0x776   :  { %v2596_v39 = vld [vmem:[%s12261_s11 + $0x8] sm:$0xff]  ;;  %v8515_v25 = vpack.c.bf16 %v2612_v21, %v2611_v20  ;;  %v2621_v21 = vld [vmem:[%s12261_s11 + $0xd0] sm:$0xff] }
 0x777   :  { %v2636_v20 = vld [vmem:[%s12261_s11 + $0x148] sm:$0xff] }
 0x801   :  { %v1768_v2 = vpop.xlane.xlu1 %1767 }
 0x802   :  { %v1770_v3 = vmul.f32 0.03125, %v1768_v2  ;;  %v1765_v5 = vpop.xlane.xlu0 %1764  ;;  %v8497_v2 = vpack.c.bf16 %v1851_v58, %v1835_v57  ;;  %v2600_v57 = vld [vmem:[%s12261_s11 + $0x28] sm:$0xff]  ;;  %v8523_v58 = vpack.c.bf16 %v2616_v50, %v2615_v49 }
 0x803   :  { %v1769_v6 = vmul.f32 0.03125, %v1765_v5  ;;  %v1821_v5 = vld [vmem:[%s12258_s9 + $0xe0] sm:$0xff]  ;;  %v2640_v49 = vld [vmem:[%s12261_s11 + $0x168] sm:$0xff] }
 0x804   :  { %v1772_v7 = vadd.f32 1e-05, %v1770_v3  ;;  %v1805_v3 = vld [vmem:[%s12258_s9 + $0x60] sm:$0xff] }
 0x805   :  { %v1771_v8 = vadd.f32 1e-05, %v1769_v6  ;;  %v1807_v6 = vld [vmem:[%s12258_s9 + $0x70] sm:$0xff] }
 0x806   :  { %9164 = vrsqrt.f32 %v1772_v7  ;;  %v1823_v7 = vld [vmem:[%s12258_s9 + $0xf0] sm:$0xff] }
 0x807   :  { %9166 = vrsqrt.f32 %v1771_v8  ;;  %v8499_v8 = vpack.c.bf16 %v1822_v62, %v1806_v61  ;;  %v8509_v15 = vpack.c.bf16 %v1823_v7, %v1807_v6  ;;  %v2632_v61 = vld [vmem:[%s12261_s11 + $0x128] sm:$0xff]  ;;  %v2617_v62 = vld [vmem:[%s12261_s11 + $0xb0] sm:$0xff]  ;;  %v2602_v6 = vld [vmem:[%s12261_s11 + $0x38] sm:$0xff] }
 0x810   :  { %v9165_v9 = vpop.eup %9164 }
 0x811   :  { %v9167_v10 = vpop.eup %9166  ;;  %v1776_v13 = vmul.f32 %v9165_v9, %v9601_v28  ;;  %v8507_v9 = vpack.c.bf16 %v1824_v0, %v1808_v63  ;;  %v2618_v63 = vld [vmem:[%s12261_s11 + $0xb8] sm:$0xff]  ;;  %v2649_v0 = vld [vmem:[%s12261_s11 + $0x1b0] sm:$0xff] }
 0x812   :  { %v1775_v14 = vmul.f32 %v9167_v10, %v9603_v31  ;;  %v1845_v31 = vld [vmem:[%s12258_s9 + $0x1a0] sm:$0xff]  ;;  %v1838_v10 = vld [vmem:[%s12258_s9 + $0x168] sm:$0xff]  ;;  %v8527_v7 = vpack.c.bf16 %v2618_v63, %v2617_v62  ;;  %v2641_v62 = vld [vmem:[%s12261_s11 + $0x170] sm:$0xff] }
 0x813   :  { %v1784_v27 = vmul.f32 %v7084_v11, %v1776_v13  ;;  %v8473_v33 = vpack.c.bf16 %v1845_v31, %v1829_v24  ;;  %v1856_v13 = vld [vmem:[%s12258_s9 + $0x1f8] sm:$0xff]  ;;  %v8505_v24 = vpack.c.bf16 %v1853_v17, %v1837_v16  ;;  %v2595_v31 = vld [vmem:[%s12261_s11] sm:$0xff] }
 0x814   :  { %v1783_v37 = vmul.f32 %v7084_v11, %v1775_v14  ;;  %v1854_v11 = vld [vmem:[%s12258_s9 + $0x1e8] sm:$0xff]  ;;  %v8501_v14 = vpack.c.bf16 %v1821_v5, %v1805_v3  ;;  %v8511_v38 = vpack.c.bf16 %v1856_v13, %v1840_v12  ;;  %v2601_v5 = vld [vmem:[%s12261_s11 + $0x30] sm:$0xff]  ;;  %v2651_v13 = vld [vmem:[%s12261_s11 + $0x1c0] sm:$0xff] }
 0x815   :  { %v9736_v42 = vadd.f32 %v7085_v18, %v1784_v27  ;;  %v2620_v12 = vld [vmem:[%s12261_s11 + $0xc8] sm:$0xff]  ;;  %v2603_v17 = vld [vmem:[%s12261_s11 + $0x40] sm:$0xff]  ;;  %v2642_v63 = vld [vmem:[%s12261_s11 + $0x178] sm:$0xff] }
 0x816   :  { %v9706_v28 = vadd.f32 %v7085_v18, %v1783_v37  ;;  %v1839_v18 = vld [vmem:[%s12258_s9 + $0x170] sm:$0xff]  ;;  %v8503_v37 = vpack.c.bf16 %v1854_v11, %v1838_v10  ;;  %v2634_v10 = vld [vmem:[%s12261_s11 + $0x138] sm:$0xff]  ;;  %v2619_v11 = vld [vmem:[%s12261_s11 + $0xc0] sm:$0xff] }
 0x817   :  { %v8513_v27 = vpack.c.bf16 %v1855_v19, %v1839_v18  ;;  %v2604_v18 = vld [vmem:[%s12261_s11 + $0x48] sm:$0xff]  ;;  %v8531_v19 = vpack.c.bf16 %v2620_v12, %v2619_v11  ;;  %v10077_v11 = vsub.s32 1, %v9340_v4  ;;  %v10080_v12 = vsub.s32 3, %v9340_v4 }
 0x818   :  { %7086 = vmatmul.mubr.msk.f32.vlgmr.msra.gmra.mrb[20].mxu0 %vm189_vm4, %v9706_v28  ;;  %7088 = vmatmul.mubr.msk.f32.vlgmr.msra.gmra.mrb[18].mxu1 %vm189_vm4, %v9706_v28 }
 0x819   :  { %8470 = vmatpush1.bf16.msra.mxu0 %v8469_v22  ;;  %8478 = vmatpush1.bf16.msra.mxu1 %v8477_v23  ;;  %v2643_v22 = vld [vmem:[%s12261_s11 + $0x180] sm:$0xff]  ;;  %v2644_v23 = vld [vmem:[%s12261_s11 + $0x188] sm:$0xff] }
 0x81a   :  { %2017 = vmatprep.mubr.f32.mxu0 %v9221_v29  ;;  %2094 = vmatprep.mubr.f32.mxu1 %v9221_v29 }
 0x81b   :  { %8472 = vmatprep.subr.bf16.mxu0 %v8471_v26  ;;  %8480 = vmatprep.subr.bf16.mxu1 %v8479_v30  ;;  %v8547_v26 = vpack.c.bf16 %v2644_v23, %v2643_v22  ;;  %v2627_v30 = vld [vmem:[%s12261_s11 + $0x100] sm:$0xff]  ;;  %v2622_v22 = vld [vmem:[%s12261_s11 + $0xd8] sm:$0xff]  ;;  %v2653_v23 = vld [vmem:[%s12261_s11 + $0x1d0] sm:$0xff] }
 0x81c   :  { %7087 = vmatmul.mubr.msk.f32.gmra.mrb[22].mxu0 %vm189_vm4, %v9736_v42  ;;  %7089 = vmatmul.mubr.msk.f32.gmra.mrb[20].mxu1 %vm189_vm4, %v9736_v42  ;;  %v8549_v41 = vpack.c.bf16 %v2628_v40, %v2627_v30  ;;  %v2637_v40 = vld [vmem:[%s12261_s11 + $0x150] sm:$0xff] }
 0x81d   :  { %8474 = vmatpush1.bf16.msra.mxu0 %v8473_v33  ;;  %8482 = vmatpush1.bf16.msra.mxu1 %v8481_v36  ;;  %v2646_v33 = vld [vmem:[%s12261_s11 + $0x198] sm:$0xff]  ;;  %v8517_v36 = vpack.c.bf16 %v2596_v39, %v2595_v31  ;;  %v2605_v39 = vld [vmem:[%s12261_s11 + $0x50] sm:$0xff] }
 0x81e   :  { %2165 = vmatprep.mubr.f32.mxu0 %v9221_v29  ;;  %2242 = vmatprep.mubr.f32.mxu1 %v9221_v29 }
 0x81f   :  { %8484 = vmatprep.subr.bf16.mxu0 %v8483_v46  ;;  %8492 = vmatprep.subr.bf16.mxu1 %v8491_v47  ;;  %v8551_v46 = vpack.c.bf16 %v2646_v33, %v2645_v35  ;;  %v2629_v47 = vld [vmem:[%s12261_s11 + $0x110] sm:$0xff]  ;;  %v2624_v35 = vld [vmem:[%s12261_s11 + $0xe8] sm:$0xff]  ;;  %v2655_v33 = vld [vmem:[%s12261_s11 + $0x1e0] sm:$0xff] }
 0x820   :  { %7090 = vmatmul.mubr.msk.f32.vlgmr.msra.gmra.mrb[24].mxu0 %vm189_vm4, %v9706_v28  ;;  %7092 = vmatmul.mubr.msk.f32.vlgmr.msra.gmra.mrb[22].mxu1 %vm189_vm4, %v9706_v28  ;;  %v8553_v54 = vpack.c.bf16 %v2630_v48, %v2629_v47  ;;  %v2608_v47 = vld [vmem:[%s12261_s11 + $0x68] sm:$0xff]  ;;  %v2639_v48 = vld [vmem:[%s12261_s11 + $0x160] sm:$0xff] }
 0x821   :  { %8486 = vmatpush1.bf16.msra.mxu0 %v8485_v52  ;;  %8494 = vmatpush1.bf16.msra.mxu1 %v8493_v53  ;;  %v2648_v52 = vld [vmem:[%s12261_s11 + $0x1a8] sm:$0xff]  ;;  %v8521_v53 = vpack.c.bf16 %v2598_v44, %v2597_v43  ;;  %v8569_v43 = vpack.c.bf16 %v2638_v34, %v2637_v40  ;;  %v2607_v44 = vld [vmem:[%s12261_s11 + $0x60] sm:$0xff]  ;;  %v10118_v34 = vsub.s32 7, %v9340_v4 }
 0x822   :  { %2171 = vmatprep.mubr.f32.mxu0 %v9221_v29  ;;  %2248 = vmatprep.mubr.f32.mxu1 %v9221_v29  ;;  %v8541_v50 = vpack.c.bf16 %v2608_v47, %v2607_v44 }
 0x823   :  { %8488 = vmatprep.subr.bf16.mxu0 %v8487_v59  ;;  %8496 = vmatprep.subr.bf16.mxu1 %v8495_v60  ;;  %v8555_v59 = vpack.c.bf16 %v2648_v52, %v2647_v51  ;;  %v2631_v60 = vld [vmem:[%s12261_s11 + $0x120] sm:$0xff]  ;;  %v8573_v51 = vpack.c.bf16 %v2640_v49, %v2639_v48  ;;  %v2625_v52 = vld [vmem:[%s12261_s11 + $0xf0] sm:$0xff]  ;;  %v2662_v48 = vld [vmem:[%s12261_s11 + $0x218] sm:$0xff] }
 0x824   :  { %7091 = vmatmul.mubr.msk.f32.gmra.mrb[26].mxu0 %vm189_vm4, %v9736_v42  ;;  %7093 = vmatmul.mubr.msk.f32.gmra.mrb[24].mxu1 %vm189_vm4, %v9736_v42  ;;  %v8557_v3 = vpack.c.bf16 %v2632_v61, %v2631_v60  ;;  %v2693_v49 = vld [vmem:[%s12261_s11 + $0x310] sm:$0xff] }
 0x825   :  { %8490 = vmatpush1.bf16.msra.mxu0 %v8489_v1  ;;  %8498 = vmatpush1.bf16.msra.mxu1 %v8497_v2  ;;  %v2650_v1 = vld [vmem:[%s12261_s11 + $0x1b8] sm:$0xff]  ;;  %v8525_v2 = vpack.c.bf16 %v2600_v57, %v2599_v56 }
 0x826   :  { %2319 = vmatprep.mubr.f32.mxu0 %v9221_v29  ;;  %2396 = vmatprep.mubr.f32.mxu1 %v9221_v29  ;;  %v2658_v57 = vld [vmem:[%s12261_s11 + $0x1f8] sm:$0xff] }
 0x827   :  { %8500 = vmatprep.subr.bf16.mxu0 %v8499_v8  ;;  %8508 = vmatprep.subr.bf16.mxu1 %v8507_v9  ;;  %v8559_v8 = vpack.c.bf16 %v2650_v1, %v2649_v0  ;;  %v2633_v9 = vld [vmem:[%s12261_s11 + $0x130] sm:$0xff]  ;;  %v8577_v0 = vpack.c.bf16 %v2642_v63, %v2641_v62  ;;  %v2675_v1 = vld [vmem:[%s12261_s11 + $0x280] sm:$0xff]  ;;  %v2680_v62 = vld [vmem:[%s12261_s11 + $0x2a8] sm:$0xff] }
 0x828   :  { %7094 = vmatmul.mubr.msk.f32.vlgmr.msra.gmra.mrb[28].mxu0 %vm189_vm4, %v9706_v28  ;;  %7096 = vmatmul.mubr.msk.f32.vlgmr.msra.gmra.mrb[26].mxu1 %vm189_vm4, %v9706_v28  ;;  %v8561_v16 = vpack.c.bf16 %v2634_v10, %v2633_v9  ;;  %v10069_v9 = vsub.s32 2, %v9340_v4  ;;  %v10074_v10 = vld [vmem:[%s12262_s10] sm:$0xff] }
 0x829   :  { %8502 = vmatpush1.bf16.msra.mxu0 %v8501_v14  ;;  %8510 = vmatpush1.bf16.msra.mxu1 %v8509_v15  ;;  %v2652_v14 = vld [vmem:[%s12261_s11 + $0x1c8] sm:$0xff]  ;;  %v8529_v15 = vpack.c.bf16 %v2602_v6, %v2601_v5  ;;  %v2711_v63 = vld [vmem:[%s12261_s11 + $0x3a0] sm:$0xff] }
 0x82a   :  { %2325 = vmatprep.mubr.f32.mxu0 %v9221_v29  ;;  %2402 = vmatprep.mubr.f32.mxu1 %v9221_v29  ;;  %v2708_v6 = vld [vmem:[%s12261_s11 + $0x388] sm:$0xff] }
 0x82b   :  { %8504 = vmatprep.subr.bf16.mxu0 %v8503_v37  ;;  %8512 = vmatprep.subr.bf16.mxu1 %v8511_v38  ;;  %v8563_v37 = vpack.c.bf16 %v2652_v14, %v2651_v13  ;;  %v2635_v38 = vld [vmem:[%s12261_s11 + $0x140] sm:$0xff]  ;;  %v1872_v14 = vrot.slane %v10074_v10, %v10069_v9 }
 0x82c   :  { %7095 = vmatmul.mubr.msk.f32.gmra.mrb[30].mxu0 %vm189_vm4, %v9736_v42  ;;  %7097 = vmatmul.mubr.msk.f32.gmra.mrb[28].mxu1 %vm189_vm4, %v9736_v42  ;;  %v8565_v31 = vpack.c.bf16 %v2636_v20, %v2635_v38  ;;  %v2691_v20 = vld [vmem:[%s12261_s11 + $0x300] sm:$0xff] }
 0x82d   :  { %8506 = vmatpush1.bf16.msra.mxu0 %v8505_v24  ;;  %8514 = vmatpush1.bf16.msra.mxu1 %v8513_v27  ;;  %v2654_v24 = vld [vmem:[%s12261_s11 + $0x1d8] sm:$0xff]  ;;  %v8533_v27 = vpack.c.bf16 %v2604_v18, %v2603_v17  ;;  %v2659_v17 = vld [vmem:[%s12261_s11 + $0x200] sm:$0xff]  ;;  %v2660_v18 = vld [vmem:[%s12261_s11 + $0x208] sm:$0xff] }
 0x82e   :  { %2473 = vmatprep.mubr.f32.mxu0 %v9221_v29  ;;  %2550 = vmatprep.mubr.f32.mxu1 %v9221_v29  ;;  %v8567_v30 = vpack.c.bf16 %v2654_v24, %v2653_v23 }
 0x82f   :  { %8516 = vmatprep.subr.bf16.mxu0 %v8515_v25  ;;  %8548 = vmatprep.subr.bf16.mxu1 %v8547_v26  ;;  %v2606_v25 = vld [vmem:[%s12261_s11 + $0x58] sm:$0xff]  ;;  %v8535_v26 = vpack.c.bf16 %v2622_v22, %v2621_v21  ;;  %v2692_v21 = vld [vmem:[%s12261_s11 + $0x308] sm:$0xff]  ;;  %v2677_v22 = vld [vmem:[%s12261_s11 + $0x290] sm:$0xff] }
 0x830   :  { %7098 = vmatmul.mubr.msk.f32.vlgmr.msra.gmra.mrb[32].mxu0 %vm189_vm4, %v9706_v28  ;;  %7100 = vmatmul.mubr.msk.f32.vlgmr.msra.gmra.mrb[30].mxu1 %vm189_vm4, %v9706_v28 }
 0x831   :  { %2479 = vmatprep.mubr.f32.mxu0 %v9221_v29  ;;  %2556 = vmatprep.mubr.f32.mxu1 %v9221_v29 }
 0x832   :  { %8518 = vmatpush3.bf16.msra.mxu0 %v8517_v36  ;;  %8550 = vmatpush3.bf16.msra.mxu1 %v8549_v41  ;;  %v2656_v36 = vld [vmem:[%s12261_s11 + $0x1e8] sm:$0xff]  ;;  %v8537_v41 = vpack.c.bf16 %v2606_v25, %v2605_v39  ;;  %v2678_v39 = vld [vmem:[%s12261_s11 + $0x298] sm:$0xff]  ;;  %v2709_v25 = vld [vmem:[%s12261_s11 + $0x390] sm:$0xff] }
 0x833   :  { %8520 = vmatprep.subr.bf16.mxu0 %v8519_v45  ;;  %8552 = vmatprep.subr.bf16.mxu1 %v8551_v46  ;;  %v8539_v45 = vpack.c.bf16 %v2624_v35, %v2623_v32  ;;  %v8571_v46 = vpack.c.bf16 %v2656_v36, %v2655_v33  ;;  %v8581_v32 = vpack.c.bf16 %v2660_v18, %v2659_v17  ;;  %v2661_v36 = vld [vmem:[%s12261_s11 + $0x210] sm:$0xff] }
 0x834   :  { %7099 = vmatmul.mubr.msk.f32.gmra.mrb[34].mxu0 %vm189_vm4, %v9736_v42  ;;  %7101 = vmatmul.mubr.msk.f32.gmra.mrb[32].mxu1 %vm189_vm4, %v9736_v42  ;;  %v8613_v35 = vpack.c.bf16 %v2692_v21, %v2691_v20  ;;  %v2696_v21 = vld [vmem:[%s12261_s11 + $0x328] sm:$0xff] }
 0x836   :  { %8522 = vmatpush3.bf16.msra.mxu0 %v8521_v53  ;;  %8554 = vmatpush3.bf16.msra.mxu1 %v8553_v54  ;;  %v2626_v53 = vld [vmem:[%s12261_s11 + $0xf8] sm:$0xff]  ;;  %v2657_v54 = vld [vmem:[%s12261_s11 + $0x1f0] sm:$0xff] }
 0x837   :  { %8524 = vmatprep.subr.bf16.mxu0 %v8523_v58  ;;  %8556 = vmatprep.subr.bf16.mxu1 %v8555_v59  ;;  %v8543_v56 = vpack.c.bf16 %v2626_v53, %v2625_v52  ;;  %v2609_v58 = vld [vmem:[%s12261_s11 + $0x70] sm:$0xff]  ;;  %v2610_v59 = vld [vmem:[%s12261_s11 + $0x78] sm:$0xff]  ;;  %v8575_v60 = vpack.c.bf16 %v2658_v57, %v2657_v54 }
 0x838   :  { %v8545_v61 = vpack.c.bf16 %v2610_v59, %v2609_v58  ;;  %v2694_v57 = vld [vmem:[%s12261_s11 + $0x318] sm:$0xff]  ;;  %v2679_v58 = vld [vmem:[%s12261_s11 + $0x2a0] sm:$0xff] }
 0x83a   :  { %8526 = vmatpush3.bf16.msra.mxu0 %v8525_v2  ;;  %8558 = vmatpush3.bf16.msra.mxu1 %v8557_v3  ;;  %v2676_v2 = vld [vmem:[%s12261_s11 + $0x288] sm:$0xff]  ;;  %v2707_v3 = vld [vmem:[%s12261_s11 + $0x380] sm:$0xff] }
 0x83b   :  { %8528 = vmatprep.subr.bf16.mxu0 %v8527_v7  ;;  %8560 = vmatprep.subr.bf16.mxu1 %v8559_v8  ;;  %v8579_v5 = vpack.c.bf16 %v2676_v2, %v2675_v1  ;;  %v8611_v7 = vpack.c.bf16 %v2708_v6, %v2707_v3  ;;  %v10066_v8 = vsub.s32 0, %v9340_v4  ;;  %v2663_v1 = vld [vmem:[%s12261_s11 + $0x220] sm:$0xff] }
 0x83d   :  { %v1864_v13 = vrot.slane %v10074_v10, %v10066_v8 }
 0x83e   :  { %8530 = vmatpush3.bf16.msra.mxu0 %v8529_v15  ;;  %8562 = vmatpush3.bf16.msra.mxu1 %v8561_v16  ;;  %v1868_v15 = vrot.slane %v10074_v10, %v10077_v11  ;;  %v1876_v16 = vrot.slane %v10074_v10, %v10080_v12 }
 0x83f   :  { %8532 = vmatprep.subr.bf16.mxu0 %v8531_v19  ;;  %8564 = vmatprep.subr.bf16.mxu1 %v8563_v37  ;;  %v10097_v19 = vsub.s32 5, %v9340_v4 }
 0x841   :  { %v10122_v33 = vrot.slane %v10074_v10, %v10097_v19 }
 0x842   :  { %8534 = vmatpush3.bf16.msra.mxu0 %v8533_v27  ;;  %8566 = vmatpush3.bf16.msra.mxu1 %v8565_v31 }
 0x843   :  { %8536 = vmatprep.subr.bf16.mxu0 %v8535_v26  ;;  %8568 = vmatprep.subr.bf16.mxu1 %v8567_v30  ;;  %v2710_v26 = vld [vmem:[%s12261_s11 + $0x398] sm:$0xff] }
 0x844   :  { %v8615_v47 = vpack.c.bf16 %v2710_v26, %v2709_v25 }
 0x846   :  { %8538 = vmatpush3.bf16.msra.mxu0 %v8537_v41  ;;  %8570 = vmatpush3.bf16.msra.mxu1 %v8569_v43 }
 0x847   :  { %8540 = vmatprep.subr.bf16.mxu0 %v8539_v45  ;;  %8572 = vmatprep.subr.bf16.mxu1 %v8571_v46  ;;  %v8583_v46 = vpack.c.bf16 %v2678_v39, %v2677_v22  ;;  %v2681_v22 = vld [vmem:[%s12261_s11 + $0x2b0] sm:$0xff]  ;;  %v2714_v39 = vld [vmem:[%s12261_s11 + $0x3b8] sm:$0xff] }
 0x84a   :  { %8542 = vmatpush3.bf16.msra.mxu0 %v8541_v50  ;;  %8574 = vmatpush3.bf16.msra.mxu1 %v8573_v51 }
 0x84b   :  { %8544 = vmatprep.subr.bf16.mxu0 %v8543_v56  ;;  %8576 = vmatprep.subr.bf16.mxu1 %v8575_v60 }
 0x84e   :  { %8546 = vmatpush3.bf16.msra.mxu0 %v8545_v61  ;;  %8578 = vmatpush3.bf16.msra.mxu1 %v8577_v0  ;;  %v10141_v61 = vrot.slane %v10074_v10, %v10118_v34  ;;  %v2712_v0 = vld [vmem:[%s12261_s11 + $0x3a8] sm:$0xff] }
 0x84f   :  { %8580 = vmatprep.subr.bf16.mxu0 %v8579_v5  ;;  %8612 = vmatprep.subr.bf16.mxu1 %v8611_v7  ;;  %v8585_v7 = vpack.c.bf16 %v2662_v48, %v2661_v36  ;;  %v8619_v20 = vpack.c.bf16 %v2712_v0, %v2711_v63  ;;  %v2665_v36 = vld [vmem:[%s12261_s11 + $0x230] sm:$0xff]  ;;  %v2698_v48 = vld [vmem:[%s12261_s11 + $0x338] sm:$0xff] }
 0x8eb   :  { %v2013_v37 = vpop.f32.mrb[20].mxu0  ;;  %v2090_v38 = vpop.f32.mrb[18].mxu1 }
 0x8ec   :  { %v2014_v23 = vadd.f32 %v2013_v37, %v1864_v13  ;;  %v2091_v24 = vadd.f32 %v2090_v38, %v1872_v14  ;;  %v2015_v27 = vpop.f32.mrb[21].mxu0  ;;  %v2092_v31 = vpop.f32.mrb[19].mxu1  ;;  %v8587_v38 = vpack.c.bf16 %v2680_v62, %v2679_v58  ;;  %v2667_v58 = vld [vmem:[%s12261_s11 + $0x240] sm:$0xff] }
 0x8ed   :  { %v2016_v30 = vadd.f32 %v2015_v27, %v1868_v15  ;;  %v2093_v40 = vadd.f32 %v2092_v31, %v1876_v16  ;;  %v2682_v27 = vld [vmem:[%s12261_s11 + $0x2b8] sm:$0xff]  ;;  %v2713_v31 = vld [vmem:[%s12261_s11 + $0x3b0] sm:$0xff] }
 0x8ee   :  { %v2563_v50 = vmax.f32 %v2014_v23, 0.0  ;;  %v2565_v51 = vmax.f32 %v2091_v24, 0.0 }
 0x8ef   :  { %v2564_v41 = vmax.f32 %v2016_v30, 0.0  ;;  %v2566_v43 = vmax.f32 %v2093_v40, 0.0  ;;  %v2019_v44 = vpop.f32.mrb[22].mxu0  ;;  %v2096_v45 = vpop.f32.mrb[20].mxu1 }
 0x8f0   :  { %v2020_v52 = vadd.f32 %v2019_v44, %v1864_v13  ;;  %v2097_v53 = vadd.f32 %v2096_v45, %v1872_v14  ;;  %v2021_v54 = vpop.f32.mrb[23].mxu0  ;;  %v2098_v56 = vpop.f32.mrb[21].mxu1  ;;  %v8617_v13 = vpack.c.bf16 %v2694_v57, %v2693_v49  ;;  %v2664_v14 = vld [vmem:[%s12261_s11 + $0x228] sm:$0xff]  ;;  %v8591_v45 = vpack.c.bf16 %v2682_v27, %v2681_v22  ;;  %v2683_v49 = vld [vmem:[%s12261_s11 + $0x2c0] sm:$0xff]  ;;  %v2702_v27 = vld [vmem:[%s12261_s11 + $0x358] sm:$0xff] }
 0x8f1   :  { %v2022_v59 = vadd.f32 %v2021_v54, %v1868_v15  ;;  %v2099_v60 = vadd.f32 %v2098_v56, %v1876_v16  ;;  %2922 = vmatprep.mubr.f32.mxu0 %v2564_v41  ;;  %2997 = vmatprep.mubr.f32.mxu1 %v2566_v43  ;;  %v2695_v15 = vld [vmem:[%s12261_s11 + $0x320] sm:$0xff]  ;;  %v2666_v41 = vld [vmem:[%s12261_s11 + $0x238] sm:$0xff] }
 0x8f2   :  { %2923 = vmatmul.mubr.f32.vlgmr.msra.gmra.mrb[36].mxu0 %v2563_v50  ;;  %2998 = vmatmul.mubr.f32.vlgmr.msra.gmra.mrb[34].mxu1 %v2565_v51  ;;  %v2579_v16 = vmax.f32 %v2020_v52, 0.0  ;;  %v2581_v17 = vmax.f32 %v2097_v53, 0.0  ;;  %v2684_v50 = vld [vmem:[%s12261_s11 + $0x2c8] sm:$0xff]  ;;  %v2715_v51 = vld [vmem:[%s12261_s11 + $0x3c0] sm:$0xff]  ;;  %v8593_v56 = vpack.c.bf16 %v2666_v41, %v2665_v36 }
 0x8f3   :  { %v2580_v2 = vmax.f32 %v2022_v59, 0.0  ;;  %v2582_v3 = vmax.f32 %v2099_v60, 0.0  ;;  %8582 = vmatpush3.bf16.msra.mxu0 %v8581_v32  ;;  %8614 = vmatpush3.bf16.msra.mxu1 %v8613_v35  ;;  %v10155_v5 = vpop.f32.mrb[24].mxu0  ;;  %v10157_v6 = vpop.f32.mrb[22].mxu1  ;;  %v8589_v32 = vpack.c.bf16 %v2664_v14, %v2663_v1  ;;  %v8621_v35 = vpack.c.bf16 %v2696_v21, %v2695_v15  ;;  %v2716_v52 = vld [vmem:[%s12261_s11 + $0x3c8] sm:$0xff]  ;;  %v2699_v1 = vld [vmem:[%s12261_s11 + $0x340] sm:$0xff] }
 0x8f4   :  { %v2169_v18 = vpop.f32.mrb[25].mxu0  ;;  %v2246_v37 = vpop.f32.mrb[23].mxu1  ;;  %8584 = vmatprep.subr.bf16.mxu0 %v8583_v46  ;;  %8616 = vmatprep.subr.bf16.mxu1 %v8615_v47  ;;  %v8623_v46 = vpack.c.bf16 %v2714_v39, %v2713_v31  ;;  %v2697_v47 = vld [vmem:[%s12261_s11 + $0x330] sm:$0xff]  ;;  %v2668_v59 = vld [vmem:[%s12261_s11 + $0x248] sm:$0xff]  ;;  %v8595_v63 = vpack.c.bf16 %v2684_v50, %v2683_v49  ;;  %v8627_v0 = vpack.c.bf16 %v2716_v52, %v2715_v51  ;;  %v2718_v14 = vld [vmem:[%s12261_s11 + $0x3d8] sm:$0xff] }
 0x8f5   :  { %v2170_v23 = vadd.f32 %v2169_v18, %v10122_v33  ;;  %v2247_v24 = vadd.f32 %v2246_v37, %v10141_v61  ;;  %2927 = vmatprep.mubr.f32.mxu0 %v2580_v2  ;;  %3002 = vmatprep.mubr.f32.mxu1 %v2582_v3  ;;  %v8625_v57 = vpack.c.bf16 %v2698_v48, %v2697_v47  ;;  %v2700_v2 = vld [vmem:[%s12261_s11 + $0x348] sm:$0xff]  ;;  %v2685_v3 = vld [vmem:[%s12261_s11 + $0x2d0] sm:$0xff]  ;;  %v2687_v31 = vld [vmem:[%s12261_s11 + $0x2e0] sm:$0xff]  ;;  %v10292_v48 = vsub.s32 6, %v9340_v4 }
 0x8f6   :  { %2928 = vmatmul.mubr.f32.gmra.mrb[38].mxu0 %v2579_v16  ;;  %3003 = vmatmul.mubr.f32.gmra.mrb[36].mxu1 %v2581_v17  ;;  %v8597_v17 = vpack.c.bf16 %v2668_v59, %v2667_v58  ;;  %v8629_v18 = vpack.c.bf16 %v2700_v2, %v2699_v1  ;;  %v2669_v37 = vld [vmem:[%s12261_s11 + $0x250] sm:$0xff]  ;;  %v2688_v39 = vld [vmem:[%s12261_s11 + $0x2e8] sm:$0xff]  ;;  %v2690_v58 = vld [vmem:[%s12261_s11 + $0x2f8] sm:$0xff] }
 0x8f7   :  { %v2568_v25 = vmax.f32 %v2170_v23, 0.0  ;;  %v2570_v26 = vmax.f32 %v2247_v24, 0.0  ;;  %8586 = vmatpush3.bf16.msra.mxu0 %v8585_v7  ;;  %8618 = vmatpush3.bf16.msra.mxu1 %v8617_v13  ;;  %v10182_v30 = vpop.f32.mrb[26].mxu0  ;;  %v10184_v40 = vpop.f32.mrb[24].mxu1  ;;  %v2686_v7 = vld [vmem:[%s12261_s11 + $0x2d8] sm:$0xff]  ;;  %v2717_v13 = vld [vmem:[%s12261_s11 + $0x3d0] sm:$0xff]  ;;  %v8603_v51 = vpack.c.bf16 %v2688_v39, %v2687_v31 }
 0x8f8   :  { %v10192_v43 = vpop.f32.mrb[27].mxu0  ;;  %v10194_v44 = vpop.f32.mrb[25].mxu1  ;;  %8588 = vmatprep.subr.bf16.mxu0 %v8587_v38  ;;  %8620 = vmatprep.subr.bf16.mxu1 %v8619_v20  ;;  %v2670_v38 = vld [vmem:[%s12261_s11 + $0x258] sm:$0xff]  ;;  %v8599_v22 = vpack.c.bf16 %v2686_v7, %v2685_v3  ;;  %v8631_v23 = vpack.c.bf16 %v2718_v14, %v2717_v13  ;;  %v2701_v24 = vld [vmem:[%s12261_s11 + $0x350] sm:$0xff]  ;;  %v2672_v47 = vld [vmem:[%s12261_s11 + $0x268] sm:$0xff] }
 0x8f9   :  { %3072 = vmatprep.mubr.f32.mxu0 %v2568_v25  ;;  %3147 = vmatprep.mubr.f32.mxu1 %v2570_v26  ;;  %v2719_v25 = vld [vmem:[%s12261_s11 + $0x3e0] sm:$0xff]  ;;  %v2720_v26 = vld [vmem:[%s12261_s11 + $0x3e8] sm:$0xff]  ;;  %v8601_v41 = vpack.c.bf16 %v2670_v38, %v2669_v37  ;;  %v2721_v59 = vld [vmem:[%s12261_s11 + $0x3f0] sm:$0xff] }
 0x8fa   :  { %v8635_v52 = vpack.c.bf16 %v2720_v26, %v2719_v25  ;;  %v2673_v13 = vld [vmem:[%s12261_s11 + $0x270] sm:$0xff]  ;;  %v2674_v14 = vld [vmem:[%s12261_s11 + $0x278] sm:$0xff]  ;;  %v2771_v31 = vld [vmem:[%s12261_s11 + $0x580] sm:$0xff] }
 0x8fb   :  { %8590 = vmatpush3.bf16.msra.mxu0 %v8589_v32  ;;  %8622 = vmatpush3.bf16.msra.mxu1 %v8621_v35  ;;  %v10214_v53 = vpop.f32.mrb[28].mxu0  ;;  %v10216_v54 = vpop.f32.mrb[26].mxu1  ;;  %v10279_v32 = vsub.s32 4, %v9340_v4  ;;  %v2689_v4 = vld [vmem:[%s12261_s11 + $0x2f0] sm:$0xff]  ;;  %v2772_v39 = vld [vmem:[%s12261_s11 + $0x588] sm:$0xff]  ;;  %v2723_v26 = vld [vmem:[%s12261_s11 + $0x400] sm:$0xff] }
 0x8fc   :  { %v10224_v60 = vpop.f32.mrb[29].mxu0  ;;  %v10226_v62 = vpop.f32.mrb[27].mxu1  ;;  %8592 = vmatprep.subr.bf16.mxu0 %v8591_v45  ;;  %8624 = vmatprep.subr.bf16.mxu1 %v8623_v46  ;;  %v8633_v45 = vpack.c.bf16 %v2702_v27, %v2701_v24  ;;  %v2671_v46 = vld [vmem:[%s12261_s11 + $0x260] sm:$0xff]  ;;  %v2706_v24 = vld [vmem:[%s12261_s11 + $0x378] sm:$0xff]  ;;  %v10355_v25 = vld [vmem:[%s12262_s10 + $0x8] sm:$0xff] }
 0x8fd   :  { %v8605_v3 = vpack.c.bf16 %v2672_v47, %v2671_v46  ;;  %v2739_v27 = vld [vmem:[%s12261_s11 + $0x480] sm:$0xff] }
 0x8ff   :  { %8594 = vmatpush3.bf16.msra.mxu0 %v8593_v56  ;;  %8626 = vmatpush3.bf16.msra.mxu1 %v8625_v57  ;;  %v10246_v15 = vpop.f32.mrb[30].mxu0  ;;  %v10248_v16 = vpop.f32.mrb[28].mxu1  ;;  %v2703_v56 = vld [vmem:[%s12261_s11 + $0x360] sm:$0xff]  ;;  %v2704_v57 = vld [vmem:[%s12261_s11 + $0x368] sm:$0xff] }
 0x900   :  { %v10256_v20 = vpop.f32.mrb[31].mxu0  ;;  %v10258_v21 = vpop.f32.mrb[29].mxu1  ;;  %8596 = vmatprep.subr.bf16.mxu0 %v8595_v63  ;;  %8628 = vmatprep.subr.bf16.mxu1 %v8627_v0  ;;  %v2722_v63 = vld [vmem:[%s12261_s11 + $0x3f8] sm:$0xff]  ;;  %v1880_v0 = vrot.slane %v10074_v10, %v10279_v32  ;;  %v8637_v7 = vpack.c.bf16 %v2704_v57, %v2703_v56  ;;  %v2741_v56 = vld [vmem:[%s12261_s11 + $0x490] sm:$0xff] }
 0x902   :  { %v2168_v57 = vadd.f32 %v10155_v5, %v1880_v0  ;;  %v2176_v5 = vadd.f32 %v10192_v43, %v10122_v33  ;;  %v2174_v33 = vadd.f32 %v10182_v30, %v1880_v0  ;;  %v2725_v43 = vld [vmem:[%s12261_s11 + $0x410] sm:$0xff]  ;;  %v2758_v0 = vld [vmem:[%s12261_s11 + $0x518] sm:$0xff] }
 0x903   :  { %8598 = vmatpush3.bf16.msra.mxu0 %v8597_v17  ;;  %8630 = vmatpush3.bf16.msra.mxu1 %v8629_v18  ;;  %v10281_v35 = vpop.f32.mrb[32].mxu0  ;;  %v10283_v36 = vpop.f32.mrb[30].mxu1  ;;  %v2705_v17 = vld [vmem:[%s12261_s11 + $0x370] sm:$0xff]  ;;  %v1888_v18 = vrot.slane %v10074_v10, %v10292_v48  ;;  %v2740_v10 = vld [vmem:[%s12261_s11 + $0x488] sm:$0xff] }
 0x904   :  { %v10294_v49 = vpop.f32.mrb[33].mxu0  ;;  %v10296_v50 = vpop.f32.mrb[31].mxu1  ;;  %8600 = vmatprep.subr.bf16.mxu0 %v8599_v22  ;;  %8632 = vmatprep.subr.bf16.mxu1 %v8631_v23  ;;  %v8607_v22 = vpack.c.bf16 %v2690_v58, %v2689_v4  ;;  %v8639_v23 = vpack.c.bf16 %v2722_v63, %v2721_v59  ;;  %v8641_v46 = vpack.c.bf16 %v2706_v24, %v2705_v17  ;;  %v2742_v59 = vld [vmem:[%s12261_s11 + $0x498] sm:$0xff]  ;;  %v2773_v63 = vld [vmem:[%s12261_s11 + $0x590] sm:$0xff]  ;;  %v2567_v24 = vmax.f32 %v2168_v57, 0.0 }
 0x905   :  { %v8643_v47 = vpack.c.bf16 %v2740_v10, %v2739_v27  ;;  %v2245_v4 = vadd.f32 %v10157_v6, %v1888_v18  ;;  %v8675_v58 = vpack.c.bf16 %v2772_v39, %v2771_v31  ;;  %v2253_v6 = vadd.f32 %v10194_v44, %v10141_v61  ;;  %v2726_v44 = vld [vmem:[%s12261_s11 + $0x418] sm:$0xff] }
 0x906   :  { %v2251_v61 = vadd.f32 %v10184_v40, %v1888_v18  ;;  %v2584_v10 = vmax.f32 %v2176_v5, 0.0  ;;  %v2757_v40 = vld [vmem:[%s12261_s11 + $0x510] sm:$0xff]  ;;  %v2743_v18 = vld [vmem:[%s12261_s11 + $0x4a0] sm:$0xff]  ;;  %v2746_v5 = vld [vmem:[%s12261_s11 + $0x4b8] sm:$0xff] }
 0x907   :  { %8602 = vmatpush3.bf16.msra.mxu0 %v8601_v41  ;;  %8634 = vmatpush3.bf16.msra.mxu1 %v8633_v45  ;;  %v10318_v1 = vpop.f32.mrb[34].mxu0  ;;  %v10320_v2 = vpop.f32.mrb[32].mxu1  ;;  %v2724_v41 = vld [vmem:[%s12261_s11 + $0x408] sm:$0xff]  ;;  %v8609_v45 = vpack.c.bf16 %v2674_v14, %v2673_v13  ;;  %v10393_v13 = vrot.slane %v10355_v25, %v10080_v12  ;;  %v2569_v27 = vmax.f32 %v2245_v4, 0.0  ;;  %v2586_v31 = vmax.f32 %v2253_v6, 0.0  ;;  %v2777_v6 = vld [vmem:[%s12261_s11 + $0x5b0] sm:$0xff] }
 0x908   :  { %v10333_v37 = vpop.f32.mrb[35].mxu0  ;;  %v10335_v38 = vpop.f32.mrb[33].mxu1  ;;  %8604 = vmatprep.subr.bf16.mxu0 %v8603_v51  ;;  %8636 = vmatprep.subr.bf16.mxu1 %v8635_v52  ;;  %v2755_v51 = vld [vmem:[%s12261_s11 + $0x500] sm:$0xff]  ;;  %v2756_v52 = vld [vmem:[%s12261_s11 + $0x508] sm:$0xff]  ;;  %v8645_v14 = vpack.c.bf16 %v2724_v41, %v2723_v26  ;;  %v2583_v41 = vmax.f32 %v2174_v33, 0.0 }
 0x909   :  { %v8677_v17 = vpack.c.bf16 %v2756_v52, %v2755_v51  ;;  %v2401_v30 = vadd.f32 %v10226_v62, %v10393_v13  ;;  %v2775_v62 = vld [vmem:[%s12261_s11 + $0x5a0] sm:$0xff]  ;;  %v2776_v26 = vld [vmem:[%s12261_s11 + $0x5a8] sm:$0xff] }
 0x90a   :  { %v2727_v51 = vld [vmem:[%s12261_s11 + $0x420] sm:$0xff]  ;;  %v2728_v52 = vld [vmem:[%s12261_s11 + $0x428] sm:$0xff] }
 0x90b   :  { %8606 = vmatpush3.bf16.msra.mxu0 %v8605_v3  ;;  %8638 = vmatpush3.bf16.msra.mxu1 %v8637_v7  ;;  %v2774_v3 = vld [vmem:[%s12261_s11 + $0x598] sm:$0xff]  ;;  %v10389_v7 = vrot.slane %v10355_v25, %v10077_v11  ;;  %v2574_v57 = vmax.f32 %v2401_v30, 0.0 }
 0x90c   :  { %8608 = vmatprep.subr.bf16.mxu0 %v8607_v22  ;;  %8640 = vmatprep.subr.bf16.mxu1 %v8639_v23  ;;  %v8647_v22 = vpack.c.bf16 %v2742_v59, %v2741_v56  ;;  %v8679_v23 = vpack.c.bf16 %v2774_v3, %v2773_v63  ;;  %v2759_v59 = vld [vmem:[%s12261_s11 + $0x520] sm:$0xff]  ;;  %v2760_v63 = vld [vmem:[%s12261_s11 + $0x528] sm:$0xff]  ;;  %v2745_v3 = vld [vmem:[%s12261_s11 + $0x4b0] sm:$0xff] }
 0x90d   :  { %v2324_v39 = vadd.f32 %v10224_v60, %v10389_v7  ;;  %v2744_v60 = vld [vmem:[%s12261_s11 + $0x4a8] sm:$0xff] }
 0x90e   :  { %v8651_v4 = vpack.c.bf16 %v2744_v60, %v2743_v18  ;;  %v2732_v18 = vld [vmem:[%s12261_s11 + $0x448] sm:$0xff] }
 0x90f   :  { %8610 = vmatpush3.bf16.msra.mxu0 %v8609_v45  ;;  %8642 = vmatpush3.bf16.msra.mxu1 %v8641_v46  ;;  %v2585_v45 = vmax.f32 %v2251_v61, 0.0  ;;  %v8649_v46 = vpack.c.bf16 %v2726_v44, %v2725_v43  ;;  %v2572_v56 = vmax.f32 %v2324_v39, 0.0  ;;  %v2761_v61 = vld [vmem:[%s12261_s11 + $0x530] sm:$0xff]  ;;  %v2762_v43 = vld [vmem:[%s12261_s11 + $0x538] sm:$0xff]  ;;  %v2747_v44 = vld [vmem:[%s12261_s11 + $0x4c0] sm:$0xff] }
 0x910   :  { %8644 = vmatprep.subr.bf16.mxu0 %v8643_v47  ;;  %8676 = vmatprep.subr.bf16.mxu1 %v8675_v58  ;;  %v8681_v47 = vpack.c.bf16 %v2758_v0, %v2757_v40  ;;  %v8683_v58 = vpack.c.bf16 %v2776_v26, %v2775_v62  ;;  %v2780_v39 = vld [vmem:[%s12261_s11 + $0x5c8] sm:$0xff]  ;;  %v8689_v40 = vpack.c.bf16 %v2762_v43, %v2761_v61  ;;  %v2731_v0 = vld [vmem:[%s12261_s11 + $0x440] sm:$0xff] }
 0x911   :  { %v2763_v26 = vld [vmem:[%s12261_s11 + $0x540] sm:$0xff] }
 0x912   :  { %3073 = vmatmul.mubr.f32.vlgmr.msra.gmra.mrb[40].mxu0 %v2567_v24  ;;  %3148 = vmatmul.mubr.f32.vlgmr.msra.gmra.mrb[38].mxu1 %v2569_v27  ;;  %v2730_v24 = vld [vmem:[%s12261_s11 + $0x438] sm:$0xff]  ;;  %v8655_v27 = vpack.c.bf16 %v2746_v5, %v2745_v3  ;;  %v2751_v5 = vld [vmem:[%s12261_s11 + $0x4e0] sm:$0xff] }
 0x913   :  { %3077 = vmatprep.mubr.f32.mxu0 %v2584_v10  ;;  %3152 = vmatprep.mubr.f32.mxu1 %v2586_v31  ;;  %v2748_v10 = vld [vmem:[%s12261_s11 + $0x4c8] sm:$0xff]  ;;  %v2779_v31 = vld [vmem:[%s12261_s11 + $0x5c0] sm:$0xff]  ;;  %v2766_v3 = vld [vmem:[%s12261_s11 + $0x558] sm:$0xff] }
 0x914   :  { %8646 = vmatpush3.bf16.msra.mxu0 %v8645_v14  ;;  %8678 = vmatpush3.bf16.msra.mxu1 %v8677_v17  ;;  %v2778_v14 = vld [vmem:[%s12261_s11 + $0x5b8] sm:$0xff]  ;;  %v8653_v17 = vpack.c.bf16 %v2728_v52, %v2727_v51  ;;  %v8659_v60 = vpack.c.bf16 %v2748_v10, %v2747_v44  ;;  %v8691_v62 = vpack.c.bf16 %v2780_v39, %v2779_v31  ;;  %v2767_v43 = vld [vmem:[%s12261_s11 + $0x560] sm:$0xff]  ;;  %v2768_v44 = vld [vmem:[%s12261_s11 + $0x568] sm:$0xff] }
 0x915   :  { %8648 = vmatprep.subr.bf16.mxu0 %v8647_v22  ;;  %8680 = vmatprep.subr.bf16.mxu1 %v8679_v23  ;;  %v8685_v22 = vpack.c.bf16 %v2760_v63, %v2759_v59  ;;  %v2729_v23 = vld [vmem:[%s12261_s11 + $0x430] sm:$0xff]  ;;  %v8687_v33 = vpack.c.bf16 %v2778_v14, %v2777_v6  ;;  %v2782_v51 = vld [vmem:[%s12261_s11 + $0x5d8] sm:$0xff]  ;;  %v8661_v52 = vpack.c.bf16 %v2732_v18, %v2731_v0  ;;  %v2752_v6 = vld [vmem:[%s12261_s11 + $0x4e8] sm:$0xff] }
 0x916   :  { %3078 = vmatmul.mubr.f32.gmra.mrb[42].mxu0 %v2583_v41  ;;  %3153 = vmatmul.mubr.f32.gmra.mrb[40].mxu1 %v2585_v45  ;;  %v8657_v30 = vpack.c.bf16 %v2730_v24, %v2729_v23  ;;  %v2764_v41 = vld [vmem:[%s12261_s11 + $0x548] sm:$0xff]  ;;  %v2749_v45 = vld [vmem:[%s12261_s11 + $0x4d0] sm:$0xff]  ;;  %v2783_v14 = vld [vmem:[%s12261_s11 + $0x5e0] sm:$0xff]  ;;  %v8701_v18 = vpack.c.bf16 %v2768_v44, %v2767_v43  ;;  %v10609_v43 = vrot.slane %v10355_v25, %v10118_v34 }
 0x917   :  { %3222 = vmatprep.mubr.f32.mxu0 %v2572_v56  ;;  %3297 = vmatprep.mubr.f32.mxu1 %v2574_v57  ;;  %v8693_v56 = vpack.c.bf16 %v2764_v41, %v2763_v26  ;;  %v2733_v57 = vld [vmem:[%s12261_s11 + $0x450] sm:$0xff]  ;;  %v2735_v24 = vld [vmem:[%s12261_s11 + $0x460] sm:$0xff]  ;;  %v2754_v31 = vld [vmem:[%s12261_s11 + $0x4f8] sm:$0xff]  ;;  %v1904_v41 = vrot.slane %v10355_v25, %v10069_v9 }
 0x918   :  { %8650 = vmatpush3.bf16.msra.mxu0 %v8649_v46  ;;  %8682 = vmatpush3.bf16.msra.mxu1 %v8681_v47  ;;  %v2750_v46 = vld [vmem:[%s12261_s11 + $0x4d8] sm:$0xff]  ;;  %v2781_v47 = vld [vmem:[%s12261_s11 + $0x5d0] sm:$0xff] }
 0x919   :  { %8652 = vmatprep.subr.bf16.mxu0 %v8651_v4  ;;  %8684 = vmatprep.subr.bf16.mxu1 %v8683_v58  ;;  %v2734_v4 = vld [vmem:[%s12261_s11 + $0x458] sm:$0xff]  ;;  %v8663_v58 = vpack.c.bf16 %v2750_v46, %v2749_v45  ;;  %v8695_v59 = vpack.c.bf16 %v2782_v51, %v2781_v47  ;;  %v2765_v63 = vld [vmem:[%s12261_s11 + $0x550] sm:$0xff]  ;;  %v2803_v51 = vld [vmem:[%s12261_s11 + $0x680] sm:$0xff] }
 0x91a   :  { %v8697_v23 = vpack.c.bf16 %v2766_v3, %v2765_v63  ;;  %v2753_v10 = vld [vmem:[%s12261_s11 + $0x4f0] sm:$0xff]  ;;  %v2770_v47 = vld [vmem:[%s12261_s11 + $0x578] sm:$0xff] }
 0x91b   :  { %v2785_v39 = vld [vmem:[%s12261_s11 + $0x5f0] sm:$0xff]  ;;  %v8671_v45 = vpack.c.bf16 %v2754_v31, %v2753_v10 }
 0x91c   :  { %8654 = vmatpush3.bf16.msra.mxu0 %v8653_v17  ;;  %8686 = vmatpush3.bf16.msra.mxu1 %v8685_v22  ;;  %v2784_v17 = vld [vmem:[%s12261_s11 + $0x5e8] sm:$0xff]  ;;  %v8665_v22 = vpack.c.bf16 %v2734_v4, %v2733_v57  ;;  %v2769_v26 = vld [vmem:[%s12261_s11 + $0x570] sm:$0xff]  ;;  %v2787_v4 = vld [vmem:[%s12261_s11 + $0x600] sm:$0xff] }
 0x91d   :  { %8656 = vmatprep.subr.bf16.mxu0 %v8655_v27  ;;  %8688 = vmatprep.subr.bf16.mxu1 %v8687_v33  ;;  %v2736_v27 = vld [vmem:[%s12261_s11 + $0x468] sm:$0xff]  ;;  %v8667_v33 = vpack.c.bf16 %v2752_v6, %v2751_v5  ;;  %v8699_v61 = vpack.c.bf16 %v2784_v17, %v2783_v14  ;;  %v8705_v63 = vpack.c.bf16 %v2770_v47, %v2769_v26  ;;  %v2819_v5 = vld [vmem:[%s12261_s11 + $0x700] sm:$0xff]  ;;  %v2805_v14 = vld [vmem:[%s12261_s11 + $0x690] sm:$0xff] }
 0x91e   :  { %v8669_v0 = vpack.c.bf16 %v2736_v27, %v2735_v24  ;;  %v2836_v57 = vld [vmem:[%s12261_s11 + $0x788] sm:$0xff]  ;;  %v2806_v24 = vld [vmem:[%s12261_s11 + $0x698] sm:$0xff]  ;;  %v2837_v27 = vld [vmem:[%s12261_s11 + $0x790] sm:$0xff] }
 0x91f   :  { %v2820_v6 = vld [vmem:[%s12261_s11 + $0x708] sm:$0xff]  ;;  %v8711_v31 = vpack.c.bf16 %v2806_v24, %v2805_v14  ;;  %v2807_v26 = vld [vmem:[%s12261_s11 + $0x6a0] sm:$0xff]  ;;  %v2841_v14 = vld [vmem:[%s12261_s11 + $0x7b0] sm:$0xff] }
 0x920   :  { %8658 = vmatpush3.bf16.msra.mxu0 %v8657_v30  ;;  %8690 = vmatpush3.bf16.msra.mxu1 %v8689_v40  ;;  %v2786_v30 = vld [vmem:[%s12261_s11 + $0x5f8] sm:$0xff]  ;;  %v1896_v40 = vrot.slane %v10355_v25, %v10066_v8  ;;  %v8741_v10 = vpack.c.bf16 %v2820_v6, %v2819_v5  ;;  %v2809_v5 = vld [vmem:[%s12261_s11 + $0x6b0] sm:$0xff] }
 0x921   :  { %8660 = vmatprep.subr.bf16.mxu0 %v8659_v60  ;;  %8692 = vmatprep.subr.bf16.mxu1 %v8691_v62  ;;  %v2737_v60 = vld [vmem:[%s12261_s11 + $0x470] sm:$0xff]  ;;  %v2738_v62 = vld [vmem:[%s12261_s11 + $0x478] sm:$0xff]  ;;  %v8703_v46 = vpack.c.bf16 %v2786_v30, %v2785_v39 }
 0x922   :  { %v2322_v17 = vadd.f32 %v10214_v53, %v1896_v40  ;;  %v2330_v53 = vadd.f32 %v10256_v20, %v10389_v7  ;;  %v2328_v20 = vadd.f32 %v10246_v15, %v1896_v40  ;;  %v2789_v7 = vld [vmem:[%s12261_s11 + $0x610] sm:$0xff]  ;;  %v2555_v15 = vadd.f32 %v10296_v50, %v10609_v43  ;;  %v2822_v40 = vld [vmem:[%s12261_s11 + $0x718] sm:$0xff]  ;;  %v2839_v50 = vld [vmem:[%s12261_s11 + $0x7a0] sm:$0xff] }
 0x923   :  { %v2810_v6 = vld [vmem:[%s12261_s11 + $0x6b8] sm:$0xff]  ;;  %v2793_v24 = vld [vmem:[%s12261_s11 + $0x630] sm:$0xff] }
 0x924   :  { %8662 = vmatpush3.bf16.msra.mxu0 %v8661_v52  ;;  %8694 = vmatpush3.bf16.msra.mxu1 %v8693_v56  ;;  %v2804_v52 = vld [vmem:[%s12261_s11 + $0x688] sm:$0xff]  ;;  %v2835_v56 = vld [vmem:[%s12261_s11 + $0x780] sm:$0xff]  ;;  %v2571_v30 = vmax.f32 %v2322_v17, 0.0  ;;  %v2842_v17 = vld [vmem:[%s12261_s11 + $0x7b8] sm:$0xff] }
 0x925   :  { %8664 = vmatprep.subr.bf16.mxu0 %v8663_v58  ;;  %8696 = vmatprep.subr.bf16.mxu1 %v8695_v59  ;;  %v2788_v58 = vld [vmem:[%s12261_s11 + $0x608] sm:$0xff]  ;;  %v8673_v59 = vpack.c.bf16 %v2738_v62, %v2737_v60  ;;  %v8707_v3 = vpack.c.bf16 %v2804_v52, %v2803_v51  ;;  %v2791_v52 = vld [vmem:[%s12261_s11 + $0x620] sm:$0xff] }
 0x926   :  { %v8709_v44 = vpack.c.bf16 %v2788_v58, %v2787_v4  ;;  %v2578_v4 = vmax.f32 %v2555_v15, 0.0  ;;  %v2813_v15 = vld [vmem:[%s12261_s11 + $0x6d0] sm:$0xff] }
 0x928   :  { %8666 = vmatpush3.bf16.msra.mxu0 %v8665_v22  ;;  %8698 = vmatpush3.bf16.msra.mxu1 %v8697_v23  ;;  %v2399_v22 = vadd.f32 %v10216_v54, %v1904_v41  ;;  %v8739_v23 = vpack.c.bf16 %v2836_v57, %v2835_v56  ;;  %v2407_v54 = vadd.f32 %v10258_v21, %v10393_v13  ;;  %v2790_v13 = vld [vmem:[%s12261_s11 + $0x618] sm:$0xff]  ;;  %v2792_v56 = vld [vmem:[%s12261_s11 + $0x628] sm:$0xff] }
 0x929   :  { %8668 = vmatprep.subr.bf16.mxu0 %v8667_v33  ;;  %8700 = vmatprep.subr.bf16.mxu1 %v8699_v61  ;;  %v2838_v33 = vld [vmem:[%s12261_s11 + $0x798] sm:$0xff]  ;;  %v10605_v61 = vrot.slane %v10355_v25, %v10097_v19  ;;  %v2405_v21 = vadd.f32 %v10248_v16, %v1904_v41  ;;  %v2821_v16 = vld [vmem:[%s12261_s11 + $0x710] sm:$0xff]  ;;  %v2840_v41 = vld [vmem:[%s12261_s11 + $0x7a8] sm:$0xff]  ;;  %v8713_v47 = vpack.c.bf16 %v2790_v13, %v2789_v7 }
 0x92a   :  { %v8743_v39 = vpack.c.bf16 %v2838_v33, %v2837_v27  ;;  %v2590_v60 = vmax.f32 %v2407_v54, 0.0  ;;  %v8745_v51 = vpack.c.bf16 %v2822_v40, %v2821_v16  ;;  %v2794_v27 = vld [vmem:[%s12261_s11 + $0x638] sm:$0xff]  ;;  %v8719_v33 = vpack.c.bf16 %v2810_v6, %v2809_v5  ;;  %v2825_v54 = vld [vmem:[%s12261_s11 + $0x730] sm:$0xff]  ;;  %v2796_v7 = vld [vmem:[%s12261_s11 + $0x648] sm:$0xff] }
 0x92b   :  { %v2478_v62 = vadd.f32 %v10294_v49, %v10605_v61  ;;  %v2808_v49 = vld [vmem:[%s12261_s11 + $0x6a8] sm:$0xff]  ;;  %v2814_v16 = vld [vmem:[%s12261_s11 + $0x6d8] sm:$0xff]  ;;  %v2845_v40 = vld [vmem:[%s12261_s11 + $0x7d0] sm:$0xff] }
 0x92c   :  { %8670 = vmatpush3.bf16.msra.mxu0 %v8669_v0  ;;  %8702 = vmatpush3.bf16.msra.mxu1 %v8701_v18  ;;  %v2573_v0 = vmax.f32 %v2399_v22, 0.0  ;;  %v2588_v18 = vmax.f32 %v2330_v53, 0.0  ;;  %v8715_v58 = vpack.c.bf16 %v2808_v49, %v2807_v26  ;;  %v8717_v22 = vpack.c.bf16 %v2792_v56, %v2791_v52  ;;  %v2846_v26 = vld [vmem:[%s12261_s11 + $0x7d8] sm:$0xff]  ;;  %v2815_v56 = vld [vmem:[%s12261_s11 + $0x6e0] sm:$0xff]  ;;  %v2800_v5 = vld [vmem:[%s12261_s11 + $0x668] sm:$0xff] }
 0x92d   :  { %8672 = vmatprep.subr.bf16.mxu0 %v8671_v45  ;;  %8704 = vmatprep.subr.bf16.mxu1 %v8703_v46  ;;  %v2587_v45 = vmax.f32 %v2328_v20, 0.0  ;;  %v2589_v46 = vmax.f32 %v2405_v21, 0.0  ;;  %v2576_v57 = vmax.f32 %v2478_v62, 0.0  ;;  %v8751_v53 = vpack.c.bf16 %v2842_v17, %v2841_v14  ;;  %v2795_v21 = vld [vmem:[%s12261_s11 + $0x640] sm:$0xff]  ;;  %v2828_v62 = vld [vmem:[%s12261_s11 + $0x748] sm:$0xff]  ;;  %v2830_v52 = vld [vmem:[%s12261_s11 + $0x758] sm:$0xff] }
 0x92e   :  { %v8725_v49 = vpack.c.bf16 %v2796_v7, %v2795_v21  ;;  %v2831_v17 = vld [vmem:[%s12261_s11 + $0x760] sm:$0xff]  ;;  %v2834_v21 = vld [vmem:[%s12261_s11 + $0x778] sm:$0xff] }
 0x930   :  { %8674 = vmatpush3.bf16.msra.mxu0 %v8673_v59  ;;  %8706 = vmatpush3.bf16.msra.mxu1 %v8705_v63  ;;  %v8747_v59 = vpack.c.bf16 %v2840_v41, %v2839_v50  ;;  %v2823_v63 = vld [vmem:[%s12261_s11 + $0x720] sm:$0xff]  ;;  %v2797_v41 = vld [vmem:[%s12261_s11 + $0x650] sm:$0xff] }
 0x931   :  { %8708 = vmatprep.subr.bf16.mxu0 %v8707_v3  ;;  %8740 = vmatprep.subr.bf16.mxu1 %v8739_v23  ;;  %v2824_v3 = vld [vmem:[%s12261_s11 + $0x728] sm:$0xff] }
 0x932   :  { %v8749_v23 = vpack.c.bf16 %v2824_v3, %v2823_v63  ;;  %v2799_v3 = vld [vmem:[%s12261_s11 + $0x660] sm:$0xff] }
 0x933   :  { %3223 = vmatmul.mubr.f32.vlgmr.msra.gmra.mrb[44].mxu0 %v2571_v30  ;;  %3298 = vmatmul.mubr.f32.vlgmr.msra.gmra.mrb[42].mxu1 %v2573_v0  ;;  %v2844_v30 = vld [vmem:[%s12261_s11 + $0x7c8] sm:$0xff]  ;;  %v8721_v0 = vpack.c.bf16 %v2794_v27, %v2793_v24  ;;  %v2818_v24 = vld [vmem:[%s12261_s11 + $0x6f8] sm:$0xff]  ;;  %v2849_v27 = vld [vmem:[%s12261_s11 + $0x7f0] sm:$0xff] }
 0x934   :  { %3227 = vmatprep.mubr.f32.mxu0 %v2588_v18  ;;  %3302 = vmatprep.mubr.f32.mxu1 %v2590_v60  ;;  %v2827_v60 = vld [vmem:[%s12261_s11 + $0x740] sm:$0xff] }
 0x935   :  { %8710 = vmatpush3.bf16.msra.mxu0 %v8709_v44  ;;  %8742 = vmatpush3.bf16.msra.mxu1 %v8741_v10  ;;  %v2826_v44 = vld [vmem:[%s12261_s11 + $0x738] sm:$0xff]  ;;  %v2811_v10 = vld [vmem:[%s12261_s11 + $0x6c0] sm:$0xff]  ;;  %v8757_v50 = vpack.c.bf16 %v2828_v62, %v2827_v60  ;;  %v2484_v60 = vadd.f32 %v10333_v37, %v10605_v61  ;;  %v2561_v62 = vadd.f32 %v10335_v38, %v10609_v43 }
 0x936   :  { %8712 = vmatprep.subr.bf16.mxu0 %v8711_v31  ;;  %8744 = vmatprep.subr.bf16.mxu1 %v8743_v39  ;;  %v2812_v31 = vld [vmem:[%s12261_s11 + $0x6c8] sm:$0xff]  ;;  %v2843_v39 = vld [vmem:[%s12261_s11 + $0x7c0] sm:$0xff]  ;;  %v8753_v20 = vpack.c.bf16 %v2826_v44, %v2825_v54  ;;  %v8733_v54 = vpack.c.bf16 %v2800_v5, %v2799_v3 }
 0x937   :  { %3228 = vmatmul.mubr.f32.gmra.mrb[46].mxu0 %v2587_v45  ;;  %3303 = vmatmul.mubr.f32.gmra.mrb[44].mxu1 %v2589_v46  ;;  %v8723_v13 = vpack.c.bf16 %v2812_v31, %v2811_v10  ;;  %v8755_v18 = vpack.c.bf16 %v2844_v30, %v2843_v39  ;;  %v2798_v45 = vld [vmem:[%s12261_s11 + $0x658] sm:$0xff]  ;;  %v8727_v46 = vpack.c.bf16 %v2814_v16, %v2813_v15  ;;  %v2801_v10 = vld [vmem:[%s12261_s11 + $0x670] sm:$0xff] }
 0x938   :  { %3372 = vmatprep.mubr.f32.mxu0 %v2576_v57  ;;  %3447 = vmatprep.mubr.f32.mxu1 %v2578_v4  ;;  %v2816_v57 = vld [vmem:[%s12261_s11 + $0x6e8] sm:$0xff]  ;;  %v2847_v4 = vld [vmem:[%s12261_s11 + $0x7e0] sm:$0xff]  ;;  %v1920_v31 = vrot.slane %v10355_v25, %v10292_v48 }
 0x939   :  { %8714 = vmatpush3.bf16.msra.mxu0 %v8713_v47  ;;  %8746 = vmatpush3.bf16.msra.mxu1 %v8745_v51  ;;  %v8759_v47 = vpack.c.bf16 %v2846_v26, %v2845_v40  ;;  %v2829_v51 = vld [vmem:[%s12261_s11 + $0x750] sm:$0xff]  ;;  %v8731_v6 = vpack.c.bf16 %v2816_v57, %v2815_v56 }
 0x93a   :  { %8716 = vmatprep.subr.bf16.mxu0 %v8715_v58  ;;  %8748 = vmatprep.subr.bf16.mxu1 %v8747_v59  ;;  %v2848_v58 = vld [vmem:[%s12261_s11 + $0x7e8] sm:$0xff]  ;;  %v8729_v59 = vpack.c.bf16 %v2798_v45, %v2797_v41  ;;  %v8761_v63 = vpack.c.bf16 %v2830_v52, %v2829_v51  ;;  %v2559_v26 = vadd.f32 %v10320_v2, %v1920_v31 }
 0x93b   :  { %v8763_v14 = vpack.c.bf16 %v2848_v58, %v2847_v4 }
 0x93c   :  { %v2593_v61 = vmax.f32 %v2559_v26, 0.0 }
 0x93d   :  { %8718 = vmatpush3.bf16.msra.mxu0 %v8717_v22  ;;  %8750 = vmatpush3.bf16.msra.mxu1 %v8749_v23  ;;  %v2832_v22 = vld [vmem:[%s12261_s11 + $0x768] sm:$0xff]  ;;  %v2817_v23 = vld [vmem:[%s12261_s11 + $0x6f0] sm:$0xff] }
 0x93e   :  { %8720 = vmatprep.subr.bf16.mxu0 %v8719_v33  ;;  %8752 = vmatprep.subr.bf16.mxu1 %v8751_v53  ;;  %v2850_v33 = vld [vmem:[%s12261_s11 + $0x7f8] sm:$0xff]  ;;  %v1912_v53 = vrot.slane %v10355_v25, %v10279_v32  ;;  %v8765_v44 = vpack.c.bf16 %v2832_v22, %v2831_v17  ;;  %v8735_v39 = vpack.c.bf16 %v2818_v24, %v2817_v23 }
 0x93f   :  { %v8767_v30 = vpack.c.bf16 %v2850_v33, %v2849_v27 }
 0x940   :  { %v2482_v40 = vadd.f32 %v10318_v1, %v1912_v53  ;;  %v7102_v1 = vld [vmem:[%s12263_s12] ss:$0 sm:$0xff] }
 0x941   :  { %8722 = vmatpush3.bf16.msra.mxu0 %v8721_v0  ;;  %8754 = vmatpush3.bf16.msra.mxu1 %v8753_v20  ;;  %v2802_v0 = vld [vmem:[%s12261_s11 + $0x678] sm:$0xff]  ;;  %v2833_v20 = vld [vmem:[%s12261_s11 + $0x770] sm:$0xff] }
 0x942   :  { %8724 = vmatprep.subr.bf16.mxu0 %v8723_v13  ;;  %8756 = vmatprep.subr.bf16.mxu1 %v8755_v18  ;;  %v8737_v7 = vpack.c.bf16 %v2802_v0, %v2801_v10  ;;  %v8769_v25 = vpack.c.bf16 %v2834_v21, %v2833_v20  ;;  %v2476_v13 = vadd.f32 %v10281_v35, %v1912_v53  ;;  %v2592_v35 = vmax.f32 %v2484_v60, 0.0 }
 0x943   :  { %v2553_v18 = vadd.f32 %v10283_v36, %v1920_v31  ;;  %v2594_v36 = vmax.f32 %v2561_v62, 0.0  ;;  %v2591_v37 = vmax.f32 %v2482_v40, 0.0 }
 0x944   :  { %v2575_v15 = vmax.f32 %v2476_v13, 0.0 }
 0x945   :  { %8726 = vmatpush3.bf16.msra.mxu0 %v8725_v49  ;;  %8758 = vmatpush3.bf16.msra.mxu1 %v8757_v50  ;;  %v2577_v16 = vmax.f32 %v2553_v18, 0.0 }
 0x946   :  { %8728 = vmatprep.subr.bf16.mxu0 %v8727_v46  ;;  %8760 = vmatprep.subr.bf16.mxu1 %v8759_v47 }
 0x949   :  { %8730 = vmatpush3.bf16.msra.mxu0 %v8729_v59  ;;  %8762 = vmatpush3.bf16.msra.mxu1 %v8761_v63 }
 0x94a   :  { %8732 = vmatprep.subr.bf16.mxu0 %v8731_v6  ;;  %8764 = vmatprep.subr.bf16.mxu1 %v8763_v14 }
 0x94d   :  { %8734 = vmatpush3.bf16.msra.mxu0 %v8733_v54  ;;  %8766 = vmatpush3.bf16.msra.mxu1 %v8765_v44 }
 0x94e   :  { %8736 = vmatprep.subr.bf16.mxu0 %v8735_v39  ;;  %8768 = vmatprep.subr.bf16.mxu1 %v8767_v30 }
 0x951   :  { %8738 = vmatpush3.bf16.msra.mxu0 %v8737_v7  ;;  %8770 = vmatpush3.bf16.msra.mxu1 %v8769_v25 }
 0x952   :  { %8331 = vmatprep.subr.mxu1 %v9221_v29 }
 0x954   :  { %3373 = vmatmul.mubr.f32.vlgmr.msra.gmra.mrb[48].mxu0 %v2575_v15  ;;  %3448 = vmatmul.mubr.f32.vlgmr.msra.gmra.mrb[46].mxu1 %v2577_v16 }
 0x955   :  { %3377 = vmatprep.mubr.f32.mxu0 %v2592_v35  ;;  %3452 = vmatprep.mubr.f32.mxu1 %v2594_v36 }
 0x958   :  { %3378 = vmatmul.mubr.f32.gmra.mrb[50].mxu0 %v2591_v37  ;;  %3453 = vmatmul.mubr.f32.gmra.mrb[48].mxu1 %v2593_v61 }
 0x959   :  { %8333 = vmatprep.mubr.msk.f32.mxu1 %vm9223_vm5, %v9221_v29 }
 0x9c5   :  { %v7578_v38 = vpop.f32.mrb[36].mxu0  ;;  %v7616_v43 = vpop.f32.mrb[34].mxu1 }
 0x9c6   :  { %v7579_v2 = vpop.f32.mrb[37].mxu0  ;;  %v7617_v49 = vpop.f32.mrb[35].mxu1 }
 0x9c7   :  { %v7580_v50 = vadd.f32 %v7579_v2, %v7578_v38  ;;  %v7618_v41 = vadd.f32 %v7617_v49, %v7616_v43 }
 0x9c9   :  { %v2925_v45 = vadd.f32 %v7580_v50, %v7102_v1  ;;  %v7581_v46 = vpop.f32.mrb[38].mxu0  ;;  %v7619_v47 = vpop.f32.mrb[36].mxu1 }
 0x9ca   :  { %v7582_v51 = vpop.f32.mrb[39].mxu0  ;;  %v7620_v52 = vpop.f32.mrb[37].mxu1 }
 0x9cb   :  { %v3000_v56 = vadd.f32 %v7618_v41, %v2925_v45  ;;  %v7583_v57 = vadd.f32 %v7582_v51, %v7581_v46  ;;  %v7621_v4 = vadd.f32 %v7620_v52, %v7619_v47 }
 0x9cd   :  { %v2930_v58 = vadd.f32 %v7583_v57, %v7102_v1 }
 0x9cf   :  { %v3005_v59 = vadd.f32 %v7621_v4, %v2930_v58 }
 0x9e5   :  { %v7654_v63 = vpop.f32.mrb[40].mxu0  ;;  %v7692_v3 = vpop.f32.mrb[38].mxu1 }
 0x9e6   :  { %v7655_v5 = vpop.f32.mrb[41].mxu0  ;;  %v7693_v6 = vpop.f32.mrb[39].mxu1 }
 0x9e7   :  { %v7656_v14 = vadd.f32 %v7655_v5, %v7654_v63  ;;  %v7694_v17 = vadd.f32 %v7693_v6, %v7692_v3 }
 0x9e9   :  { %v3075_v22 = vadd.f32 %v7656_v14, %v3000_v56  ;;  %v7657_v23 = vpop.f32.mrb[42].mxu0  ;;  %v7695_v24 = vpop.f32.mrb[40].mxu1 }
 0x9ea   :  { %v7658_v27 = vpop.f32.mrb[43].mxu0  ;;  %v7696_v33 = vpop.f32.mrb[41].mxu1 }
 0x9eb   :  { %v3150_v53 = vadd.f32 %v7694_v17, %v3075_v22  ;;  %v7659_v54 = vadd.f32 %v7658_v27, %v7657_v23  ;;  %v7697_v44 = vadd.f32 %v7696_v33, %v7695_v24  ;;  %v7106_v27 = vld [vmem:[%s12291_s26 + $0x28] sm:$0xff] }
 0x9ed   :  { %v3080_v10 = vadd.f32 %v7659_v54, %v3005_v59  ;;  %v7108_v54 = vld [vmem:[%s12291_s26 + $0x38] sm:$0xff] }
 0x9ef   :  { %v3155_v31 = vadd.f32 %v7697_v44, %v3080_v10 }
 0xa06   :  { %v7730_v39 = vpop.f32.mrb[44].mxu0  ;;  %v7768_v30 = vpop.f32.mrb[42].mxu1 }
 0xa07   :  { %v7731_v0 = vpop.f32.mrb[45].mxu0  ;;  %v7769_v20 = vpop.f32.mrb[43].mxu1 }
 0xa08   :  { %v7732_v21 = vadd.f32 %v7731_v0, %v7730_v39  ;;  %v7770_v7 = vadd.f32 %v7769_v20, %v7768_v30 }
 0xa0a   :  { %v3225_v25 = vadd.f32 %v7732_v21, %v3150_v53  ;;  %v7733_v13 = vpop.f32.mrb[46].mxu0  ;;  %v7771_v18 = vpop.f32.mrb[44].mxu1  ;;  %v7107_v53 = vld [vmem:[%s12291_s26 + $0x30] sm:$0xff] }
 0xa0b   :  { %v7734_v60 = vpop.f32.mrb[47].mxu0  ;;  %v7772_v62 = vpop.f32.mrb[45].mxu1  ;;  %v8775_v44 = vpack.c.bf16 %v7108_v54, %v7107_v53 }
 0xa0c   :  { %v3300_v15 = vadd.f32 %v7770_v7, %v3225_v25  ;;  %v7735_v16 = vadd.f32 %v7734_v60, %v7733_v13  ;;  %v7773_v40 = vadd.f32 %v7772_v62, %v7771_v18  ;;  %v7103_v7 = vld [vmem:[%s12264_s13] ss:$0 sm:$0xff] }
 0xa0d   :  { %v7104_v13 = vld [vmem:[%s12265_s14] ss:$0 sm:$0xff] }
 0xa0e   :  { %v3230_v26 = vadd.f32 %v7735_v16, %v3155_v31 }
 0xa10   :  { %v3305_v35 = vadd.f32 %v7773_v40, %v3230_v26  ;;  %v7110_v26 = vld [vmem:[%s12255_s4 + $0x1] ss:$0 sm:$0xff]  ;;  %s12296_s4 = smov 96  }
 0xa27   :  { %v7806_v36 = vpop.f32.mrb[48].mxu0  ;;  %v7844_v37 = vpop.f32.mrb[46].mxu1 }
 0xa28   :  { %v7807_v61 = vpop.f32.mrb[49].mxu0  ;;  %v7845_v38 = vpop.f32.mrb[47].mxu1 }
 0xa29   :  { %v7808_v43 = vadd.f32 %v7807_v61, %v7806_v36  ;;  %v7846_v1 = vadd.f32 %v7845_v38, %v7844_v37 }
 0xa2b   :  { %v3375_v2 = vadd.f32 %v7808_v43, %v3300_v15  ;;  %v7809_v49 = vpop.f32.mrb[50].mxu0  ;;  %v7847_v50 = vpop.f32.mrb[48].mxu1 }
 0xa2c   :  { %v7810_v41 = vpop.f32.mrb[51].mxu0  ;;  %v7848_v45 = vpop.f32.mrb[49].mxu1 }
 0xa2d   :  { %v3450_v46 = vadd.f32 %v7846_v1, %v3375_v2  ;;  %v7811_v47 = vadd.f32 %v7810_v41, %v7809_v49  ;;  %v7849_v51 = vadd.f32 %v7848_v45, %v7847_v50 }
 0xa2f   :  { %v3380_v52 = vadd.f32 %v7811_v47, %v3305_v35  ;;  %v3458_v56 = vadd.f32 %v3450_v46, %v9706_v28 }
 0xa31   :  { %v3455_v57 = vadd.f32 %v7849_v51, %v3380_v52  ;;  %v3462_v4 = vsel %vm189_vm4, %v3458_v56, 0.0 }
 0xa32   :  { %3463 = vadd.xlane.f32.xlu0 %v3462_v4 }
 0xa33   :  { %v3459_v58 = vadd.f32 %v3455_v57, %v9736_v42  ;;  %v7105_v42 = vld [vmem:[%s12291_s26 + $0x20] sm:$0xff]  ;;  %s12299_s26 = smov 16  }
 0xa34   :  { %v8771_v33 = vpack.c.bf16 %v7106_v27, %v7105_v42 }
 0xa35   :  { %v3465_v59 = vsel %vm189_vm4, %v3459_v58, 0.0 }
 0xa36   :  { %3466 = vadd.xlane.f32.xlu1 %v3465_v59  ;;  %8772 = vmatprep.subr.bf16.mxu0 %v8771_v33 }
 0xa37   :  { %8774 = vmatpush3.bf16.msra.mxu0 %v8771_v33 }
 0xa38   :  { %8776 = vmatprep.subr.bf16.mxu0 %v8775_v44 }
 0xa3b   :  { %8778 = vmatpush3.bf16.msra.mxu0 %v8775_v44 }
 0xa3c   :  { %8326 = vmatprep.subr.mxu0 %v9221_v29 }
 0xabf   :  { %v3464_v63 = vpop.xlane.xlu0 %3463 }
 0xac0   :  { %v3468_v3 = vmul.f32 0.03125, %v3464_v63 }
 0xac2   :  { %v3470_v5 = vsub.f32 %v3458_v56, %v3468_v3 }
 0xac3   :  { %v3467_v6 = vpop.xlane.xlu1 %3466 }
 0xac4   :  { %v3469_v14 = vmul.f32 0.03125, %v3467_v6  ;;  %v3472_v17 = vmul.f32 %v3470_v5, %v3470_v5 }
 0xac6   :  { %v3471_v22 = vsub.f32 %v3459_v58, %v3469_v14  ;;  %v3474_v23 = vsel %vm189_vm4, %v3472_v17, 0.0 }
 0xac7   :  { %3475 = vadd.xlane.f32.xlu0 %v3474_v23 }
 0xac8   :  { %v3473_v28 = vmul.f32 %v3471_v22, %v3471_v22 }
 0xaca   :  { %v3477_v24 = vsel %vm189_vm4, %v3473_v28, 0.0 }
 0xacb   :  { %3478 = vadd.xlane.f32.xlu1 %v3477_v24 }
 0xb54   :  { %v3476_v10 = vpop.xlane.xlu0 %3475 }
 0xb55   :  { %v3480_v31 = vmul.f32 0.03125, %v3476_v10 }
 0xb57   :  { %v3482_v39 = vadd.f32 1e-05, %v3480_v31 }
 0xb58   :  { %v3479_v30 = vpop.xlane.xlu1 %3478 }
 0xb59   :  { %9168 = vrsqrt.f32 %v3482_v39  ;;  %v3481_v0 = vmul.f32 0.03125, %v3479_v30 }
 0xb5b   :  { %v3483_v20 = vadd.f32 1e-05, %v3481_v0 }
 0xb5d   :  { %9170 = vrsqrt.f32 %v3483_v20 }
 0xb63   :  { %v9169_v21 = vpop.eup %9168 }
 0xb64   :  { %v3486_v25 = vmul.f32 %v9169_v21, %v3470_v5 }
 0xb66   :  { %v3494_v18 = vmul.f32 %v7103_v7, %v3486_v25 }
 0xb67   :  { %v9171_v60 = vpop.eup %9170 }
 0xb68   :  { %v3487_v62 = vmul.f32 %v9171_v60, %v3471_v22  ;;  %v10816_v15 = vadd.f32 %v7104_v13, %v3494_v18 }
 0xb6a   :  { %v3495_v16 = vmul.f32 %v7103_v7, %v3487_v62  ;;  %8323 = vmatprep.mubr.msk.f32.mxu0 %vm189_vm4, %v10816_v15 }
 0xb6c   :  { %v10820_v40 = vadd.f32 %v7104_v13, %v3495_v16 }
 0xb6e   :  { %8324 = vmatmul.mubr.msk.f32.vlgmr.msra.gmra.mrb[52].mxu0 %vm189_vm4, %v10820_v40 }
 0xb6f   :  { %8328 = vmatprep.mubr.msk.f32.mxu0 %vm9223_vm5, %v9221_v29 }
 0xc41   :  { %v8325_v35 = vpop.f32.mrb[52].mxu0 }
 0xc42   :  { %v10829_v36 = vadd.f32 %v8325_v35, %v7110_v26  ;;  %v3589_v37 = vpop.f32.mrb[53].mxu0 }
 0xc43   :  { %v10831_v61 = vadd.f32 %v7110_v26, %v3589_v37 }
 0xc44   :  { %3602 = vrot.lane.b32.xlu1 %v10829_v36, %s9222_s24  ;;  %v3619_v47 = vmul.f32 0.35355338, %v10829_v36 }
 0xc45   :  { %3600 = vrot.lane.b32.xlu0 %v10831_v61, %s9222_s24  ;;  %v3618_v46 = vmul.f32 0.35355338, %v10831_v61  ;;  %s12297_s24 = smov 64  }
 0xc48   :  { %3606 = vrot.lane.b32.xlu1 %v10831_v61, %s9224_s25 }
 0xc49   :  { %3608 = vrot.lane.b32.xlu0 %v10829_v36, %s9224_s25 }
 0xc4c   :  { %3612 = vrot.lane.b32.xlu1 %v10831_v61, %s12295_s29 }
 0xc4d   :  { %3614 = vrot.lane.b32.xlu0 %v10829_v36, %s12295_s29 }
 0xc50   :  { %3626 = vrot.lane.b32.xlu1 %v10831_v61, %s12296_s4 }
 0xc51   :  { %3703 = vrot.lane.b32.xlu0 %v10829_v36, %s12296_s4 }
 0xcb6   :  { %v10849_v38 = vpop.permute.xlu1 %3602 }
 0xcb7   :  { %3857 = vrot.lane.b32.xlu0 %v10849_v38, %s12296_s4  ;;  %v10853_v43 = vpop.permute.xlu0 %3600  ;;  %v3621_v56 = vmul.f32 0.35355338, %v10849_v38 }
 0xcb8   :  { %3780 = vrot.lane.b32.xlu1 %v10853_v43, %s12296_s4  ;;  %v3620_v57 = vmul.f32 0.35355338, %v10853_v43 }
 0xcba   :  { %v10857_v1 = vpop.permute.xlu1 %3606 }
 0xcbb   :  { %v10859_v2 = vpop.permute.xlu0 %3608  ;;  %v3622_v59 = vmul.f32 0.35355338, %v10857_v1 }
 0xcbc   :  { %3934 = vrot.lane.b32.xlu1 %v10857_v1, %s12296_s4  ;;  %4011 = vrot.lane.b32.xlu0 %v10859_v2, %s12296_s4  ;;  %v3623_v63 = vmul.f32 0.35355338, %v10859_v2 }
 0xcbe   :  { %v10865_v49 = vpop.permute.xlu1 %3612 }
 0xcbf   :  { %v10867_v50 = vpop.permute.xlu0 %3614  ;;  %v3624_v6 = vmul.f32 0.35355338, %v10865_v49 }
 0xcc0   :  { %4088 = vrot.lane.b32.xlu1 %v10865_v49, %s12296_s4  ;;  %4165 = vrot.lane.b32.xlu0 %v10867_v50, %s12296_s4  ;;  %v3625_v14 = vmul.f32 0.35355338, %v10867_v50 }
 0xcc2   :  { %v3627_v41 = vpop.permute.xlu1 %3626 }
 0xcc3   :  { %8327 = vmatpush3.xpose.msk.msra.mxu0 %vm301_vm6, %v3627_v41  ;;  %v3704_v45 = vpop.permute.xlu0 %3703 }
 0xcc4   :  { %8332 = vmatpush3.xpose.msk.msra.mxu1 %vm301_vm6, %v3704_v45  ;;  %8336 = vmatprep.subr.mxu0 %v9221_v29 }
 0xcc5   :  { %8341 = vmatprep.subr.mxu1 %v9221_v29 }
 0xcc6   :  { %8329 = vmatmul.mubr.msk.f32.vlgmr.msra.gmra.mrb[54].mxu0 %vm301_vm6, %v3618_v46 }
 0xcc7   :  { %8334 = vmatmul.mubr.msk.f32.vlgmr.msra.gmra.mrb[50].mxu1 %vm301_vm6, %v3619_v47  ;;  %8338 = vmatprep.mubr.msk.f32.mxu0 %vm9223_vm5, %v9221_v29 }
 0xcc8   :  { %8343 = vmatprep.mubr.msk.f32.mxu1 %vm9223_vm5, %v9221_v29 }
 0xd29   :  { %v3858_v51 = vpop.permute.xlu0 %3857 }
 0xd2a   :  { %v3781_v52 = vpop.permute.xlu1 %3780  ;;  %8342 = vmatpush3.xpose.msk.msra.mxu1 %vm301_vm6, %v3858_v51 }
 0xd2b   :  { %8337 = vmatpush3.xpose.msk.msra.mxu0 %vm301_vm6, %v3781_v52  ;;  %8351 = vmatprep.subr.mxu1 %v9221_v29 }
 0xd2c   :  { %8346 = vmatprep.subr.mxu0 %v9221_v29 }
 0xd2d   :  { %8344 = vmatmul.mubr.msk.f32.vlgmr.msra.gmra.mrb[52].mxu1 %vm301_vm6, %v3621_v56 }
 0xd2e   :  { %v3935_v4 = vpop.permute.xlu1 %3934  ;;  %v4012_v58 = vpop.permute.xlu0 %4011  ;;  %8339 = vmatmul.mubr.msk.f32.vlgmr.msra.gmra.mrb[56].mxu0 %vm301_vm6, %v3620_v57  ;;  %8353 = vmatprep.mubr.msk.f32.mxu1 %vm9223_vm5, %v9221_v29 }
 0xd2f   :  { %8347 = vmatpush3.xpose.msk.msra.mxu0 %vm301_vm6, %v3935_v4  ;;  %8352 = vmatpush3.xpose.msk.msra.mxu1 %vm301_vm6, %v4012_v58 }
 0xd30   :  { %8348 = vmatprep.mubr.msk.f32.mxu0 %vm9223_vm5, %v9221_v29  ;;  %8361 = vmatprep.subr.mxu1 %v9221_v29 }
 0xd31   :  { %8356 = vmatprep.subr.mxu0 %v9221_v29 }
 0xd32   :  { %v4089_v3 = vpop.permute.xlu1 %4088  ;;  %8354 = vmatmul.mubr.msk.f32.vlgmr.msra.gmra.mrb[54].mxu1 %vm301_vm6, %v3623_v63  ;;  %v4166_v5 = vpop.permute.xlu0 %4165  ;;  %8349 = vmatmul.mubr.msk.f32.vlgmr.msra.gmra.mrb[58].mxu0 %vm301_vm6, %v3622_v59 }
 0xd33   :  { %8357 = vmatpush3.xpose.msk.msra.mxu0 %vm301_vm6, %v4089_v3  ;;  %8362 = vmatpush3.xpose.msk.msra.mxu1 %vm301_vm6, %v4166_v5 }
 0xd34   :  { %8358 = vmatprep.mubr.msk.f32.mxu0 %vm9223_vm5, %v9221_v29  ;;  %8363 = vmatprep.mubr.msk.f32.mxu1 %vm9223_vm5, %v9221_v29 }
 0xd35   :  { %8366 = vmatprep.subr.mxu0 %v9221_v29  ;;  %8371 = vmatprep.subr.mxu1 %v9221_v29 }
 0xd36   :  { %8359 = vmatmul.mubr.msk.f32.vlgmr.msra.gmra.mrb[60].mxu0 %vm301_vm6, %v3624_v6  ;;  %8364 = vmatmul.mubr.msk.f32.vlgmr.msra.gmra.mrb[56].mxu1 %vm301_vm6, %v3625_v14 }
 0xd37   :  { %8368 = vmatprep.mubr.msk.f32.mxu0 %vm9223_vm5, %v9221_v29  ;;  %8373 = vmatprep.mubr.msk.f32.mxu1 %vm9223_vm5, %v9221_v29 }
 0xd99   :  { %v3699_v17 = vpop.f32.mrb[54].mxu0 }
 0xd9a   :  { %v4242_v22 = vsel %vm9472_vm7, %v3699_v17, -1e+30  ;;  %v8330_v23 = vpop.f32.mrb[55].mxu0  ;;  %v3776_v28 = vpop.f32.mrb[50].mxu1 }
 0xd9b   :  { %v4243_v24 = vsel %vm9472_vm7, %v3776_v28, -1e+30  ;;  %v8335_v42 = vpop.f32.mrb[51].mxu1  ;;  %v4250_v27 = vsel %vm301_vm6, %v4242_v22, -inf }
 0xd9c   :  { %4251 = vmax.xlane.f32.xlu1 %v4250_v27  ;;  %v4253_v33 = vsel %vm301_vm6, %v4243_v24, -inf }
 0xd9d   :  { %4254 = vmax.xlane.f32.xlu0 %v4253_v33 }
 0xe00   :  { %v3930_v53 = vpop.f32.mrb[52].mxu1 }
 0xe01   :  { %v4245_v54 = vsel %vm9472_vm7, %v3930_v53, -1e+30  ;;  %v3853_v44 = vpop.f32.mrb[56].mxu0  ;;  %v8345_v10 = vpop.f32.mrb[53].mxu1 }
 0xe02   :  { %v4244_v31 = vsel %vm9472_vm7, %v3853_v44, -1e+30  ;;  %v8340_v39 = vpop.f32.mrb[57].mxu0  ;;  %v4259_v30 = vsel %vm301_vm6, %v4245_v54, -inf }
 0xe03   :  { %4260 = vmax.xlane.f32.xlu1 %v4259_v30  ;;  %v4256_v0 = vsel %vm301_vm6, %v4244_v31, -inf }
 0xe04   :  { %4257 = vmax.xlane.f32.xlu0 %v4256_v0 }
 0xe05   :  { %v4007_v20 = vpop.f32.mrb[58].mxu0  ;;  %v4084_v21 = vpop.f32.mrb[54].mxu1 }
 0xe06   :  { %v4246_v7 = vsel %vm9472_vm7, %v4007_v20, -1e+30  ;;  %v4247_v25 = vsel %vm9472_vm7, %v4084_v21, -1e+30  ;;  %v8350_v13 = vpop.f32.mrb[59].mxu0  ;;  %v8355_v18 = vpop.f32.mrb[55].mxu1 }
 0xe07   :  { %v4265_v60 = vsel %vm301_vm6, %v4247_v25, -inf  ;;  %v4262_v62 = vsel %vm301_vm6, %v4246_v7, -inf }
 0xe08   :  { %4266 = vmax.xlane.f32.xlu1 %v4265_v60  ;;  %4263 = vmax.xlane.f32.xlu0 %v4262_v62 }
 0xe09   :  { %v4161_v16 = vpop.f32.mrb[60].mxu0  ;;  %v4238_v26 = vpop.f32.mrb[56].mxu1 }
 0xe0a   :  { %v4248_v35 = vsel %vm9472_vm7, %v4161_v16, -1e+30  ;;  %v4249_v37 = vsel %vm9472_vm7, %v4238_v26, -1e+30  ;;  %v8360_v41 = vpop.f32.mrb[61].mxu0  ;;  %v8365_v45 = vpop.f32.mrb[57].mxu1 }
 0xe0b   :  { %v4271_v46 = vsel %vm301_vm6, %v4249_v37, -inf  ;;  %v4268_v47 = vsel %vm301_vm6, %v4248_v35, -inf }
 0xe0c   :  { %4272 = vmax.xlane.f32.xlu1 %v4271_v46  ;;  %4269 = vmax.xlane.f32.xlu0 %v4268_v47 }
 0xe1d   :  { %4414 = vrot.lane.b32.xlu1 %v10829_v36, %s12297_s24 }
 0xe21   :  { %4490 = vrot.lane.b32.xlu1 %v10853_v43, %s12297_s24 }
 0xe22   :  { %4338 = vrot.lane.b32.xlu0 %v10831_v61, %s12297_s24 }
 0xe25   :  { %4642 = vrot.lane.b32.xlu1 %v10857_v1, %s12297_s24 }
 0xe26   :  { %4566 = vrot.lane.b32.xlu0 %v10849_v38, %s12297_s24 }
 0xe29   :  { %v4252_v55 = vpop.xlane.xlu1 %4251 }
 0xe2a   :  { %4718 = vrot.lane.b32.xlu0 %v10859_v2, %s12297_s24  ;;  %v4255_v51 = vpop.xlane.xlu0 %4254  ;;  %v4274_v52 = vsub.f32 %v4242_v22, %v4252_v55 }
 0xe2b   :  { %v4275_v56 = vsub.f32 %v4243_v24, %v4255_v51 }
 0xe2c   :  { %v4282_v36 = vmul.f32 1.442695, %v4274_v52 }
 0xe2d   :  { %v4284_v57 = vmul.f32 1.442695, %v4275_v56 }
 0xe2e   :  { %9172 = vpow2.f32 %v4282_v36 }
 0xe2f   :  { %9174 = vpow2.f32 %v4284_v57 }
 0xe38   :  { %v10957_v43 = vpop.eup %9172 }
 0xe39   :  { %v10959_v61 = vpop.eup %9174  ;;  %v4298_v38 = vsel %vm301_vm6, %v10957_v43, 0.0 }
 0xe3a   :  { %v4301_v1 = vsel %vm301_vm6, %v10959_v61, 0.0 }
 0xe49   :  { %4302 = vadd.xlane.f32.xlu1 %v4301_v1  ;;  %4299 = vadd.xlane.f32.xlu0 %v4298_v38 }
 0xe90   :  { %v4261_v2 = vpop.xlane.xlu1 %4260 }
 0xe91   :  { %v4277_v4 = vsub.f32 %v4245_v54, %v4261_v2  ;;  %v4258_v58 = vpop.xlane.xlu0 %4257 }
 0xe92   :  { %v4276_v59 = vsub.f32 %v4244_v31, %v4258_v58 }
 0xe93   :  { %v4288_v63 = vmul.f32 1.442695, %v4277_v4 }
 0xe94   :  { %v4286_v3 = vmul.f32 1.442695, %v4276_v59 }
 0xe95   :  { %9176 = vpow2.f32 %v4288_v63  ;;  %v4267_v5 = vpop.xlane.xlu1 %4266  ;;  %v4264_v6 = vpop.xlane.xlu0 %4263 }
 0xe96   :  { %9178 = vpow2.f32 %v4286_v3  ;;  %v4279_v14 = vsub.f32 %v4247_v25, %v4267_v5  ;;  %v4278_v17 = vsub.f32 %v4246_v7, %v4264_v6 }
 0xe98   :  { %v4292_v22 = vmul.f32 1.442695, %v4279_v14  ;;  %v4290_v23 = vmul.f32 1.442695, %v4278_v17 }
 0xe99   :  { %v4273_v28 = vpop.xlane.xlu1 %4272  ;;  %v4270_v24 = vpop.xlane.xlu0 %4269 }
 0xe9a   :  { %9180 = vpow2.f32 %v4292_v22  ;;  %v4281_v42 = vsub.f32 %v4249_v37, %v4273_v28  ;;  %v4280_v27 = vsub.f32 %v4248_v35, %v4270_v24  ;;  %v7137_v24 = vld [vmem:[%s12256_s5 + $0x20] sm:$0xff] }
 0xe9b   :  { %9182 = vpow2.f32 %v4290_v23 }
 0xe9c   :  { %v4296_v33 = vmul.f32 1.442695, %v4281_v42  ;;  %v4294_v53 = vmul.f32 1.442695, %v4280_v27  ;;  %v7138_v42 = vld [vmem:[%s12256_s5 + $0x28] sm:$0xff] }
 0xe9d   :  { %v4415_v54 = vpop.permute.xlu1 %4414  ;;  %v4339_v44 = vpop.permute.xlu0 %4338  ;;  %v8779_v27 = vpack.c.bf16 %v7138_v42, %v7137_v24  ;;  %v7165_v24 = vld [vmem:[%s12258_s9 + $0x280] sm:$0xff] }
 0xe9e   :  { %9184 = vpow2.f32 %v4296_v33  ;;  %8367 = vmatpush3.msra.mxu0 %v4339_v44  ;;  %8372 = vmatpush3.msra.mxu1 %v4415_v54  ;;  %v7139_v33 = vld [vmem:[%s12256_s5 + $0x30] sm:$0xff] }
 0xe9f   :  { %v9177_v10 = vpop.eup %9176  ;;  %9186 = vpow2.f32 %v4294_v53  ;;  %8376 = vmatprep.subr.mxu0 %v9221_v29  ;;  %8381 = vmatprep.subr.mxu1 %v9221_v29  ;;  %v7140_v53 = vld [vmem:[%s12256_s5 + $0x38] sm:$0xff]  ;;  %s12300_s5 = smov 24  }
 0xea0   :  { %v9179_v31 = vpop.eup %9178  ;;  %v4307_v39 = vsel %vm301_vm6, %v9177_v10, 0.0  ;;  %v8783_v54 = vpack.c.bf16 %v7140_v53, %v7139_v33  ;;  %v7151_v33 = vld [vmem:[%s12258_s9 + $0x210] sm:$0xff] }
 0xea1   :  { %4308 = vadd.xlane.f32.xlu1 %v4307_v39  ;;  %v4304_v30 = vsel %vm301_vm6, %v9179_v31, 0.0  ;;  %v4491_v62 = vpop.permute.xlu1 %4490  ;;  %v4567_v16 = vpop.permute.xlu0 %4566  ;;  %v7167_v53 = vld [vmem:[%s12258_s9 + $0x290] sm:$0xff] }
 0xea2   :  { %4305 = vadd.xlane.f32.xlu0 %v4304_v30 }
 0xea4   :  { %v9181_v0 = vpop.eup %9180 }
 0xea5   :  { %v9183_v20 = vpop.eup %9182  ;;  %v4313_v21 = vsel %vm301_vm6, %v9181_v0, 0.0  ;;  %v4643_v26 = vpop.permute.xlu1 %4642 }
 0xea6   :  { %4314 = vadd.xlane.f32.xlu1 %v4313_v21  ;;  %v4310_v7 = vsel %vm301_vm6, %v9183_v20, 0.0  ;;  %v4719_v35 = vpop.permute.xlu0 %4718 }
 0xea7   :  { %4311 = vadd.xlane.f32.xlu0 %v4310_v7 }
 0xea8   :  { %v10971_v25 = vpop.eup %9184 }
 0xea9   :  { %v10973_v13 = vpop.eup %9186  ;;  %v4319_v18 = vsel %vm301_vm6, %v10971_v25, 0.0 }
 0xeaa   :  { %4320 = vadd.xlane.f32.xlu1 %v4319_v18  ;;  %v4316_v60 = vsel %vm301_vm6, %v10973_v13, 0.0 }
 0xeab   :  { %4317 = vadd.xlane.f32.xlu0 %v4316_v60 }
 0xebb   :  { %4794 = vrot.lane.b32.xlu1 %v10865_v49, %s12297_s24 }
 0xec1   :  { %4870 = vrot.lane.b32.xlu0 %v10867_v50, %s12297_s24 }
 0xed6   :  { %v4303_v37 = vpop.xlane.xlu1 %4302  ;;  %v4300_v41 = vpop.xlane.xlu0 %4299 }
 0xed7   :  { %9188 = vrcp.f32 %v4303_v37 }
 0xed8   :  { %9190 = vrcp.f32 %v4300_v41 }
 0xee1   :  { %v9189_v45 = vpop.eup %9188 }
 0xee2   :  { %v9191_v46 = vpop.eup %9190  ;;  %v4331_v47 = vmul.f32 %v9189_v45, %v10959_v61 }
 0xee3   :  { %v4330_v55 = vmul.f32 %v9191_v46, %v10957_v43 }
 0xee4   :  { %8374 = vmatmul.mubr.msk.f32.vlgmr.msra.gmra.mrb[58].mxu1 %vm301_vm6, %v4331_v47 }
 0xee5   :  { %8369 = vmatmul.mubr.msk.f32.vlgmr.msra.gmra.mrb[62].mxu0 %vm301_vm6, %v4330_v55  ;;  %8382 = vmatpush3.msra.mxu1 %v4567_v16 }
 0xee6   :  { %8377 = vmatpush3.msra.mxu0 %v4491_v62  ;;  %8383 = vmatprep.mubr.msk.f32.mxu1 %vm9223_vm5, %v9221_v29 }
 0xee7   :  { %8391 = vmatprep.subr.mxu1 %v9221_v29  ;;  %8378 = vmatprep.mubr.msk.f32.mxu0 %vm9223_vm5, %v9221_v29 }
 0xee8   :  { %8386 = vmatprep.subr.mxu0 %v9221_v29 }
 0xf2e   :  { %v4309_v49 = vpop.xlane.xlu1 %4308 }
 0xf2f   :  { %9192 = vrcp.f32 %v4309_v49  ;;  %v4306_v50 = vpop.xlane.xlu0 %4305 }
 0xf30   :  { %9194 = vrcp.f32 %v4306_v50  ;;  %v7142_v50 = vld [vmem:[%s12257_s6 + $0x1] ss:$0 sm:$0xff] }
 0xf33   :  { %v4315_v51 = vpop.xlane.xlu1 %4314 }
 0xf34   :  { %9196 = vrcp.f32 %v4315_v51  ;;  %v4312_v52 = vpop.xlane.xlu0 %4311 }
 0xf35   :  { %9198 = vrcp.f32 %v4312_v52 }
 0xf37   :  { %v4321_v56 = vpop.xlane.xlu1 %4320 }
 0xf38   :  { %9200 = vrcp.f32 %v4321_v56  ;;  %v4318_v36 = vpop.xlane.xlu0 %4317 }
 0xf39   :  { %v9193_v57 = vpop.eup %9192  ;;  %9202 = vrcp.f32 %v4318_v36 }
 0xf3a   :  { %v9195_v43 = vpop.eup %9194  ;;  %v4333_v61 = vmul.f32 %v9193_v57, %v9177_v10 }
 0xf3b   :  { %v4332_v1 = vmul.f32 %v9195_v43, %v9179_v31  ;;  %v4795_v3 = vpop.permute.xlu1 %4794 }
 0xf3c   :  { %8384 = vmatmul.mubr.msk.f32.vlgmr.msra.gmra.mrb[60].mxu1 %vm301_vm6, %v4333_v61  ;;  %v4871_v59 = vpop.permute.xlu0 %4870 }
 0xf3d   :  { %8392 = vmatpush3.msra.mxu1 %v4719_v35  ;;  %8379 = vmatmul.mubr.msk.f32.vlgmr.msra.gmra.mrb[64].mxu0 %vm301_vm6, %v4332_v1 }
 0xf3e   :  { %v9197_v38 = vpop.eup %9196  ;;  %8387 = vmatpush3.msra.mxu0 %v4643_v26  ;;  %8388 = vmatprep.mubr.msk.f32.mxu0 %vm9223_vm5, %v9221_v29 }
 0xf3f   :  { %v9199_v2 = vpop.eup %9198  ;;  %v4335_v4 = vmul.f32 %v9197_v38, %v9181_v0  ;;  %8393 = vmatprep.mubr.msk.f32.mxu1 %vm9223_vm5, %v9221_v29  ;;  %8396 = vmatprep.subr.mxu0 %v9221_v29 }
 0xf40   :  { %v4334_v58 = vmul.f32 %v9199_v2, %v9183_v20  ;;  %8401 = vmatprep.subr.mxu1 %v9221_v29 }
 0xf41   :  { %8394 = vmatmul.mubr.msk.f32.vlgmr.msra.gmra.mrb[62].mxu1 %vm301_vm6, %v4335_v4 }
 0xf42   :  { %v9201_v63 = vpop.eup %9200  ;;  %8389 = vmatmul.mubr.msk.f32.vlgmr.msra.gmra.mrb[66].mxu0 %vm301_vm6, %v4334_v58  ;;  %8402 = vmatpush3.msra.mxu1 %v4871_v59 }
 0xf43   :  { %v9203_v5 = vpop.eup %9202  ;;  %v4337_v6 = vmul.f32 %v9201_v63, %v10971_v25  ;;  %8397 = vmatpush3.msra.mxu0 %v4795_v3  ;;  %8398 = vmatprep.mubr.msk.f32.mxu0 %vm9223_vm5, %v9221_v29 }
 0xf44   :  { %v4336_v14 = vmul.f32 %v9203_v5, %v10973_v13  ;;  %8403 = vmatprep.mubr.msk.f32.mxu1 %vm9223_vm5, %v9221_v29  ;;  %8780 = vmatprep.subr.bf16.mxu0 %v8779_v27 }
 0xf45   :  { %8404 = vmatmul.mubr.msk.f32.vlgmr.msra.gmra.mrb[64].mxu1 %vm301_vm6, %v4337_v6 }
 0xf46   :  { %8399 = vmatmul.mubr.msk.f32.vlgmr.msra.gmra.mrb[68].mxu0 %vm301_vm6, %v4336_v14  ;;  %5338 = vmatprep.mubr.f32.mxu1 %v9221_v29  ;;  %v7166_v14 = vld [vmem:[%s12258_s9 + $0x288] sm:$0xff] }
 0xf47   :  { %8782 = vmatpush3.bf16.msra.mxu0 %v8779_v27 }
 0xf48   :  { %8784 = vmatprep.subr.bf16.mxu0 %v8783_v54 }
 0xf4b   :  { %8786 = vmatpush3.bf16.msra.mxu0 %v8783_v54  ;;  %v8797_v54 = vpack.c.bf16 %v7167_v53, %v7151_v33  ;;  %v7176_v33 = vld [vmem:[%s12258_s9 + $0x2d8] sm:$0xff] }
 0xfb7   :  { %v4486_v17 = vpop.f32.mrb[58].mxu1 }
 0xfb8   :  { %v4410_v22 = vpop.f32.mrb[62].mxu0  ;;  %v8375_v23 = vpop.f32.mrb[59].mxu1 }
 0xfb9   :  { %v8370_v28 = vpop.f32.mrb[63].mxu0  ;;  %v7168_v23 = vld [vmem:[%s12258_s9 + $0x298] sm:$0xff] }
 0xfba   :  { %v7149_v28 = vld [vmem:[%s12258_s9 + $0x200] sm:$0xff] }
 0xfbb   :  { %v8789_v27 = vpack.c.bf16 %v7165_v24, %v7149_v28  ;;  %v7158_v24 = vld [vmem:[%s12258_s9 + $0x248] sm:$0xff] }
0x100f   :  { %v4638_v44 = vpop.f32.mrb[60].mxu1 }
0x1010   :  { %4950 = vrot.lane.b32.xlu0 %v4638_v44, %s12298_s30  ;;  %v4562_v10 = vpop.f32.mrb[64].mxu0  ;;  %v8385_v31 = vpop.f32.mrb[61].mxu1  ;;  %v7182_v44 = vld [vmem:[%s12258_s9 + $0x308] sm:$0xff] }
0x1011   :  { %4948 = vrot.lane.b32.xlu1 %v4562_v10, %s12298_s30  ;;  %v8380_v39 = vpop.f32.mrb[65].mxu0  ;;  %v7198_v10 = vld [vmem:[%s12258_s9 + $0x388] sm:$0xff]  ;;  %v7184_v31 = vld [vmem:[%s12258_s9 + $0x318] sm:$0xff] }
0x1012   :  { %v8791_v39 = vpack.c.bf16 %v7198_v10, %v7182_v44  ;;  %v7157_v44 = vld [vmem:[%s12258_s9 + $0x240] sm:$0xff] }
0x1014   :  { %v4790_v30 = vpop.f32.mrb[62].mxu1 }
0x1015   :  { %v4714_v0 = vpop.f32.mrb[66].mxu0  ;;  %4958 = vrot.lane.b32.xlu0 %v4790_v30, %s12299_s26  ;;  %v8395_v20 = vpop.f32.mrb[63].mxu1  ;;  %v7200_v30 = vld [vmem:[%s12258_s9 + $0x398] sm:$0xff] }
0x1016   :  { %4956 = vrot.lane.b32.xlu1 %v4714_v0, %s12299_s26  ;;  %v8390_v21 = vpop.f32.mrb[67].mxu0  ;;  %v7181_v0 = vld [vmem:[%s12258_s9 + $0x300] sm:$0xff] }
0x1017   :  { %v7197_v20 = vld [vmem:[%s12258_s9 + $0x380] sm:$0xff]  ;;  %v8799_v21 = vpack.c.bf16 %v7200_v30, %v7184_v31  ;;  %v7175_v30 = vld [vmem:[%s12258_s9 + $0x2d0] sm:$0xff] }
0x1018   :  { %v4942_v7 = vpop.f32.mrb[64].mxu1  ;;  %v7173_v31 = vld [vmem:[%s12258_s9 + $0x2c0] sm:$0xff] }
0x1019   :  { %v4866_v25 = vpop.f32.mrb[68].mxu0  ;;  %4966 = vrot.lane.b32.xlu0 %v4942_v7, %s12300_s5  ;;  %v8405_v13 = vpop.f32.mrb[65].mxu1  ;;  %v8793_v7 = vpack.c.bf16 %v7197_v20, %v7181_v0 }
0x101a   :  { %4964 = vrot.lane.b32.xlu1 %v4866_v25, %s12300_s5  ;;  %v8400_v18 = vpop.f32.mrb[69].mxu0  ;;  %v7183_v25 = vld [vmem:[%s12258_s9 + $0x310] sm:$0xff] }
0x101b   :  { %v7199_v13 = vld [vmem:[%s12258_s9 + $0x390] sm:$0xff] }
0x101c   :  { %v8801_v18 = vpack.c.bf16 %v7199_v13, %v7183_v25  ;;  %v7192_v25 = vld [vmem:[%s12258_s9 + $0x358] sm:$0xff] }
0x101d   :  { %v7208_v13 = vld [vmem:[%s12258_s9 + $0x3d8] sm:$0xff] }
0x1082   :  { %v4951_v60 = vpop.permute.xlu0 %4950 }
0x1083   :  { %v4949_v62 = vpop.permute.xlu1 %4948  ;;  %v4971_v35 = vsel %vm301_vm6, %v4486_v17, %v4951_v60  ;;  %v7152_v17 = vld [vmem:[%s12258_s9 + $0x218] sm:$0xff]  ;;  %v7154_v60 = vld [vmem:[%s12258_s9 + $0x228] sm:$0xff] }
0x1084   :  { %v4970_v37 = vsel %vm301_vm6, %v4410_v22, %v4949_v62  ;;  %v8795_v42 = vpack.c.bf16 %v7168_v23, %v7152_v17  ;;  %v7170_v62 = vld [vmem:[%s12258_s9 + $0x2a8] sm:$0xff]  ;;  %v7187_v17 = vld [vmem:[%s12258_s9 + $0x330] sm:$0xff] }
0x1086   :  { %8796 = vmatprep.subr.bf16.mxu0 %v8795_v42  ;;  %v7174_v42 = vld [vmem:[%s12258_s9 + $0x2c8] sm:$0xff] }
0x1087   :  { %v4959_v16 = vpop.permute.xlu0 %4958  ;;  %v8819_v0 = vpack.c.bf16 %v7174_v42, %v7158_v24  ;;  %v7231_v42 = vld [vmem:[%s12261_s11 + $0x800] sm:$0xff] }
0x1088   :  { %v4957_v26 = vpop.permute.xlu1 %4956  ;;  %v4973_v41 = vsel %vm1648_vm8, %v4971_v35, %v4959_v16  ;;  %v7156_v16 = vld [vmem:[%s12258_s9 + $0x238] sm:$0xff] }
0x1089   :  { %v4972_v46 = vsel %vm1648_vm8, %v4970_v37, %v4957_v26  ;;  %v8803_v26 = vpack.c.bf16 %v7170_v62, %v7154_v60  ;;  %v7172_v35 = vld [vmem:[%s12258_s9 + $0x2b8] sm:$0xff]  ;;  %v7189_v62 = vld [vmem:[%s12258_s9 + $0x340] sm:$0xff] }
0x108a   :  { %v8811_v37 = vpack.c.bf16 %v7172_v35, %v7156_v16  ;;  %v7205_v16 = vld [vmem:[%s12258_s9 + $0x3c0] sm:$0xff]  ;;  %v7207_v35 = vld [vmem:[%s12258_s9 + $0x3d0] sm:$0xff] }
0x108b   :  { %v4967_v45 = vpop.permute.xlu0 %4966 }
0x108c   :  { %v4975_v47 = vsel %vm1651_vm9, %v4973_v41, %v4967_v45  ;;  %v4965_v55 = vpop.permute.xlu1 %4964 }
0x108d   :  { %v4974_v49 = vsel %vm1651_vm9, %v4972_v46, %v4965_v55 }
0x108e   :  { %8414 = vmatprep.mubr.msk.f32.mxu0 %vm189_vm4, %v4974_v49 }
0x108f   :  { %8415 = vmatmul.mubr.msk.f32.vlgmr.msra.gmra.mrb[70].mxu0 %vm189_vm4, %v4975_v47 }
0x1090   :  { %5415 = vmatprep.mubr.f32.mxu0 %v9221_v29  ;;  %8798 = vmatpush1.bf16.msra.mxu0 %v8797_v54 }
0x1091   :  { %8800 = vmatprep.subr.bf16.mxu0 %v8799_v21  ;;  %v7190_v21 = vld [vmem:[%s12258_s9 + $0x348] sm:$0xff] }
0x1094   :  { %8802 = vmatpush1.bf16.msra.mxu0 %v8801_v18  ;;  %v8821_v18 = vpack.c.bf16 %v7173_v31, %v7157_v44  ;;  %v7264_v44 = vld [vmem:[%s12261_s11 + $0x908] sm:$0xff]  ;;  %v7249_v31 = vld [vmem:[%s12261_s11 + $0x890] sm:$0xff] }
0x1095   :  { %8812 = vmatprep.subr.bf16.mxu0 %v8811_v37 }
0x1162   :  { %v8416_v51 = vpop.f32.mrb[70].mxu0 }
0x1163   :  { %v5067_v52 = vadd.f32 %v8416_v51, %v7142_v50  ;;  %v5061_v56 = vpop.f32.mrb[71].mxu0 }
0x1164   :  { %v5062_v36 = vadd.f32 %v7142_v50, %v5061_v56  ;;  %v7153_v56 = vld [vmem:[%s12258_s9 + $0x220] sm:$0xff] }
0x1165   :  { %v5071_v57 = vadd.f32 %v5067_v52, %v10820_v40  ;;  %v7147_v52 = vld [vmem:[%s12259_s7 + $0x1] ss:$0 sm:$0xff] }
0x1166   :  { %v5070_v43 = vadd.f32 %v5062_v36, %v10816_v15  ;;  %v7150_v15 = vld [vmem:[%s12258_s9 + $0x208] sm:$0xff] }
0x1167   :  { %v5079_v61 = vsel %vm189_vm4, %v5071_v57, 0.0  ;;  %v8787_v22 = vpack.c.bf16 %v7166_v14, %v7150_v15  ;;  %v7201_v14 = vld [vmem:[%s12258_s9 + $0x3a0] sm:$0xff] }
0x1168   :  { %5080 = vadd.xlane.f32.xlu0 %v5079_v61  ;;  %v5076_v1 = vsel %vm189_vm4, %v5070_v43, 0.0  ;;  %v7155_v61 = vld [vmem:[%s12258_s9 + $0x230] sm:$0xff] }
0x1169   :  { %5077 = vadd.xlane.f32.xlu1 %v5076_v1  ;;  %8788 = vmatprep.subr.bf16.mxu1 %v8787_v22  ;;  %v7171_v1 = vld [vmem:[%s12258_s9 + $0x2b0] sm:$0xff] }
0x116a   :  { %8790 = vmatpush1.bf16.msra.mxu1 %v8789_v27  ;;  %v7203_v22 = vld [vmem:[%s12258_s9 + $0x3b0] sm:$0xff]  ;;  %v7160_v27 = vld [vmem:[%s12258_s9 + $0x258] sm:$0xff] }
0x116b   :  { %8792 = vmatprep.subr.bf16.mxu1 %v8791_v39  ;;  %v8817_v54 = vpack.c.bf16 %v7203_v22, %v7187_v17  ;;  %v7159_v39 = vld [vmem:[%s12258_s9 + $0x250] sm:$0xff]  ;;  %v8827_v20 = vpack.c.bf16 %v7176_v33, %v7160_v27  ;;  %v7248_v17 = vld [vmem:[%s12261_s11 + $0x888] sm:$0xff]  ;;  %v7279_v22 = vld [vmem:[%s12261_s11 + $0x980] sm:$0xff] }
0x116c   :  { %v8829_v60 = vpack.c.bf16 %v7175_v30, %v7159_v39  ;;  %v7232_v27 = vld [vmem:[%s12261_s11 + $0x808] sm:$0xff]  ;;  %v7250_v39 = vld [vmem:[%s12261_s11 + $0x898] sm:$0xff]  ;;  %v7281_v30 = vld [vmem:[%s12261_s11 + $0x990] sm:$0xff] }
0x116e   :  { %8794 = vmatpush1.bf16.msra.mxu1 %v8793_v7  ;;  %v7206_v7 = vld [vmem:[%s12258_s9 + $0x3c8] sm:$0xff] }
0x116f   :  { %8804 = vmatprep.subr.bf16.mxu1 %v8803_v26  ;;  %v7191_v26 = vld [vmem:[%s12258_s9 + $0x350] sm:$0xff]  ;;  %v8823_v37 = vpack.c.bf16 %v7206_v7, %v7190_v21 }
0x1170   :  { %v7233_v7 = vld [vmem:[%s12261_s11 + $0x810] sm:$0xff] }
0x11f5   :  { %v5081_v38 = vpop.xlane.xlu0 %5080 }
0x11f6   :  { %v5083_v2 = vmul.f32 0.03125, %v5081_v38  ;;  %v5078_v4 = vpop.xlane.xlu1 %5077  ;;  %v7148_v38 = vld [vmem:[%s12260_s8 + $0x1] ss:$0 sm:$0xff] }
0x11f7   :  { %v5082_v58 = vmul.f32 0.03125, %v5078_v4 }
0x11f8   :  { %v5085_v59 = vsub.f32 %v5071_v57, %v5083_v2  ;;  %v7186_v2 = vld [vmem:[%s12258_s9 + $0x328] sm:$0xff] }
0x11f9   :  { %v5084_v63 = vsub.f32 %v5070_v43, %v5082_v58  ;;  %v7169_v43 = vld [vmem:[%s12258_s9 + $0x2a0] sm:$0xff]  ;;  %v7202_v58 = vld [vmem:[%s12258_s9 + $0x3a8] sm:$0xff] }
0x11fa   :  { %v5087_v3 = vmul.f32 %v5085_v59, %v5085_v59  ;;  %v8807_v23 = vpack.c.bf16 %v7202_v58, %v7186_v2  ;;  %v7212_v2 = vld [vmem:[%s12258_s9 + $0x3f8] sm:$0xff] }
0x11fb   :  { %v5086_v5 = vmul.f32 %v5084_v63, %v5084_v63 }
0x11fc   :  { %v5091_v6 = vsel %vm189_vm4, %v5087_v3, 0.0  ;;  %v8805_v3 = vpack.c.bf16 %v7169_v43, %v7153_v56  ;;  %v7163_v56 = vld [vmem:[%s12258_s9 + $0x270] sm:$0xff] }
0x11fd   :  { %5092 = vadd.xlane.f32.xlu1 %v5091_v6  ;;  %v5088_v40 = vsel %vm189_vm4, %v5086_v5, 0.0  ;;  %v8813_v5 = vpack.c.bf16 %v7171_v1, %v7155_v61  ;;  %v7185_v6 = vld [vmem:[%s12258_s9 + $0x320] sm:$0xff]  ;;  %v7194_v61 = vld [vmem:[%s12258_s9 + $0x368] sm:$0xff] }
0x11fe   :  { %5089 = vadd.xlane.f32.xlu0 %v5088_v40  ;;  %v8809_v53 = vpack.c.bf16 %v7201_v14, %v7185_v6  ;;  %v7210_v1 = vld [vmem:[%s12258_s9 + $0x3e8] sm:$0xff]  ;;  %v7247_v14 = vld [vmem:[%s12261_s11 + $0x880] sm:$0xff] }
0x11ff   :  { %v8839_v6 = vpack.c.bf16 %v7210_v1, %v7194_v61  ;;  %v8851_v33 = vpack.c.bf16 %v7248_v17, %v7247_v14  ;;  %v7237_v61 = vld [vmem:[%s12261_s11 + $0x830] sm:$0xff]  ;;  %v7238_v1 = vld [vmem:[%s12261_s11 + $0x838] sm:$0xff]  ;;  %v7239_v14 = vld [vmem:[%s12261_s11 + $0x840] sm:$0xff] }
0x1200   :  { %v7240_v17 = vld [vmem:[%s12261_s11 + $0x848] sm:$0xff] }
0x128a   :  { %v5093_v41 = vpop.xlane.xlu1 %5092 }
0x128b   :  { %v5095_v45 = vmul.f32 0.03125, %v5093_v41  ;;  %v5090_v46 = vpop.xlane.xlu0 %5089  ;;  %v8831_v41 = vpack.c.bf16 %v7208_v13, %v7192_v25  ;;  %v7234_v25 = vld [vmem:[%s12261_s11 + $0x818] sm:$0xff]  ;;  %v8855_v13 = vpack.c.bf16 %v7250_v39, %v7249_v31  ;;  %v7241_v31 = vld [vmem:[%s12261_s11 + $0x850] sm:$0xff] }
0x128c   :  { %v5094_v47 = vmul.f32 0.03125, %v5090_v46  ;;  %v7178_v46 = vld [vmem:[%s12258_s9 + $0x2e8] sm:$0xff]  ;;  %v7242_v39 = vld [vmem:[%s12261_s11 + $0x858] sm:$0xff] }
0x128d   :  { %v5097_v55 = vadd.f32 1e-05, %v5095_v45  ;;  %v7162_v45 = vld [vmem:[%s12258_s9 + $0x268] sm:$0xff] }
0x128e   :  { %v5096_v49 = vadd.f32 1e-05, %v5094_v47  ;;  %v7164_v47 = vld [vmem:[%s12258_s9 + $0x278] sm:$0xff] }
0x128f   :  { %9204 = vrsqrt.f32 %v5097_v55  ;;  %v7180_v55 = vld [vmem:[%s12258_s9 + $0x2f8] sm:$0xff] }
0x1290   :  { %9206 = vrsqrt.f32 %v5096_v49  ;;  %v8825_v49 = vpack.c.bf16 %v7205_v16, %v7189_v62  ;;  %v8843_v43 = vpack.c.bf16 %v7180_v55, %v7164_v47  ;;  %v7266_v62 = vld [vmem:[%s12261_s11 + $0x918] sm:$0xff]  ;;  %v7251_v16 = vld [vmem:[%s12261_s11 + $0x8a0] sm:$0xff]  ;;  %v7236_v47 = vld [vmem:[%s12261_s11 + $0x828] sm:$0xff] }
0x1299   :  { %v9205_v50 = vpop.eup %9204 }
0x129a   :  { %v9207_v51 = vpop.eup %9206  ;;  %v5101_v36 = vmul.f32 %v9205_v50, %v5085_v59  ;;  %v7188_v59 = vld [vmem:[%s12258_s9 + $0x338] sm:$0xff]  ;;  %v8833_v50 = vpack.c.bf16 %v7207_v35, %v7191_v26  ;;  %v7252_v26 = vld [vmem:[%s12261_s11 + $0x8a8] sm:$0xff]  ;;  %v7283_v35 = vld [vmem:[%s12261_s11 + $0x9a0] sm:$0xff] }
0x129b   :  { %v5100_v57 = vmul.f32 %v9207_v51, %v5084_v63  ;;  %v7204_v63 = vld [vmem:[%s12258_s9 + $0x3b8] sm:$0xff]  ;;  %v7161_v51 = vld [vmem:[%s12258_s9 + $0x260] sm:$0xff]  ;;  %v8859_v55 = vpack.c.bf16 %v7252_v26, %v7251_v16 }
0x129c   :  { %v5109_v40 = vmul.f32 %v7147_v52, %v5101_v36  ;;  %v8815_v28 = vpack.c.bf16 %v7204_v63, %v7188_v59  ;;  %v7179_v36 = vld [vmem:[%s12258_s9 + $0x2f0] sm:$0xff]  ;;  %v7193_v59 = vld [vmem:[%s12258_s9 + $0x360] sm:$0xff] }
0x129d   :  { %v5108_v4 = vmul.f32 %v7147_v52, %v5100_v57  ;;  %v7177_v52 = vld [vmem:[%s12258_s9 + $0x2e0] sm:$0xff]  ;;  %v8835_v57 = vpack.c.bf16 %v7178_v46, %v7162_v45  ;;  %v8845_v58 = vpack.c.bf16 %v7179_v36, %v7163_v56  ;;  %v7285_v56 = vld [vmem:[%s12261_s11 + $0x9b0] sm:$0xff]  ;;  %v7286_v36 = vld [vmem:[%s12261_s11 + $0x9b8] sm:$0xff] }
0x129e   :  { %v11171_v10 = vadd.f32 %v7148_v38, %v5109_v40  ;;  %v7209_v63 = vld [vmem:[%s12258_s9 + $0x3e0] sm:$0xff] }
0x129f   :  { %v11141_v15 = vadd.f32 %v7148_v38, %v5108_v4  ;;  %v7196_v38 = vld [vmem:[%s12258_s9 + $0x378] sm:$0xff]  ;;  %v8837_v4 = vpack.c.bf16 %v7177_v52, %v7161_v51  ;;  %v7235_v46 = vld [vmem:[%s12261_s11 + $0x820] sm:$0xff]  ;;  %v7253_v51 = vld [vmem:[%s12261_s11 + $0x8b0] sm:$0xff] }
0x12a0   :  { %v8847_v40 = vpack.c.bf16 %v7212_v2, %v7196_v38  ;;  %v7254_v52 = vld [vmem:[%s12261_s11 + $0x8b8] sm:$0xff]  ;;  %v8895_v2 = vpack.c.bf16 %v7286_v36, %v7285_v56  ;;  %v7243_v16 = vld [vmem:[%s12261_s11 + $0x860] sm:$0xff] }
0x12a1   :  { %7215 = vmatmul.mubr.msk.f32.vlgmr.msra.gmra.mrb[66].mxu1 %vm189_vm4, %v11141_v15  ;;  %7217 = vmatmul.mubr.msk.f32.vlgmr.msra.gmra.mrb[72].mxu0 %vm189_vm4, %v11141_v15  ;;  %v8863_v38 = vpack.c.bf16 %v7254_v52, %v7253_v51  ;;  %v7294_v51 = vld [vmem:[%s12261_s11 + $0x9f8] sm:$0xff]  ;;  %v7245_v52 = vld [vmem:[%s12261_s11 + $0x870] sm:$0xff] }
0x12a2   :  { %8806 = vmatpush1.bf16.msra.mxu1 %v8805_v3  ;;  %8814 = vmatpush1.bf16.msra.mxu0 %v8813_v5  ;;  %v7195_v3 = vld [vmem:[%s12258_s9 + $0x370] sm:$0xff]  ;;  %v7246_v56 = vld [vmem:[%s12261_s11 + $0x878] sm:$0xff] }
0x12a3   :  { %5344 = vmatprep.mubr.f32.mxu1 %v9221_v29  ;;  %5421 = vmatprep.mubr.f32.mxu0 %v9221_v29  ;;  %v7211_v5 = vld [vmem:[%s12258_s9 + $0x3f0] sm:$0xff] }
0x12a4   :  { %8808 = vmatprep.subr.bf16.mxu1 %v8807_v23  ;;  %8816 = vmatprep.subr.bf16.mxu0 %v8815_v28  ;;  %v7280_v23 = vld [vmem:[%s12261_s11 + $0x988] sm:$0xff]  ;;  %v8841_v28 = vpack.c.bf16 %v7209_v63, %v7193_v59  ;;  %v8849_v24 = vpack.c.bf16 %v7211_v5, %v7195_v3  ;;  %v7255_v59 = vld [vmem:[%s12261_s11 + $0x8c0] sm:$0xff] }
0x12a5   :  { %7216 = vmatmul.mubr.msk.f32.gmra.mrb[68].mxu1 %vm189_vm4, %v11171_v10  ;;  %7218 = vmatmul.mubr.msk.f32.gmra.mrb[74].mxu0 %vm189_vm4, %v11171_v10  ;;  %v7256_v63 = vld [vmem:[%s12261_s11 + $0x8c8] sm:$0xff]  ;;  %v7287_v3 = vld [vmem:[%s12261_s11 + $0x9c0] sm:$0xff] }
0x12a6   :  { %8810 = vmatpush1.bf16.msra.mxu1 %v8809_v53  ;;  %8818 = vmatpush1.bf16.msra.mxu0 %v8817_v54  ;;  %v8883_v53 = vpack.c.bf16 %v7280_v23, %v7279_v22  ;;  %v7263_v54 = vld [vmem:[%s12261_s11 + $0x900] sm:$0xff]  ;;  %v7288_v5 = vld [vmem:[%s12261_s11 + $0x9c8] sm:$0xff]  ;;  %v8867_v22 = vpack.c.bf16 %v7256_v63, %v7255_v59 }
0x12a7   :  { %5492 = vmatprep.mubr.f32.mxu1 %v9221_v29  ;;  %5569 = vmatprep.mubr.f32.mxu0 %v9221_v29  ;;  %v8885_v21 = vpack.c.bf16 %v7264_v44, %v7263_v54  ;;  %v8899_v23 = vpack.c.bf16 %v7288_v5, %v7287_v3  ;;  %v8869_v54 = vpack.c.bf16 %v7240_v17, %v7239_v14  ;;  %v7344_v59 = vld [vmem:[%s12261_s11 + $0xb88] sm:$0xff]  ;;  %v11503_v3 = vld [vmem:[%s12262_s10 + $0x10] sm:$0xff]  ;;  %v7295_v17 = vld [vmem:[%s12261_s11 + $0xa00] sm:$0xff] }
0x12a8   :  { %8820 = vmatprep.subr.bf16.mxu1 %v8819_v0  ;;  %8828 = vmatprep.subr.bf16.mxu0 %v8827_v20  ;;  %v7282_v0 = vld [vmem:[%s12261_s11 + $0x998] sm:$0xff]  ;;  %v8853_v20 = vpack.c.bf16 %v7232_v27, %v7231_v42  ;;  %v7257_v42 = vld [vmem:[%s12261_s11 + $0x8d0] sm:$0xff]  ;;  %v5191_v5 = vrot.slane %v11503_v3, %v10066_v8  ;;  %v5203_v14 = vrot.slane %v11503_v3, %v10080_v12 }
0x12a9   :  { %7219 = vmatmul.mubr.msk.f32.vlgmr.msra.gmra.mrb[70].mxu1 %vm189_vm4, %v11141_v15  ;;  %7221 = vmatmul.mubr.msk.f32.vlgmr.msra.gmra.mrb[76].mxu0 %vm189_vm4, %v11141_v15  ;;  %v7258_v27 = vld [vmem:[%s12261_s11 + $0x8d8] sm:$0xff] }
0x12aa   :  { %8822 = vmatpush1.bf16.msra.mxu1 %v8821_v18  ;;  %8830 = vmatpush1.bf16.msra.mxu0 %v8829_v60  ;;  %v8887_v18 = vpack.c.bf16 %v7282_v0, %v7281_v30  ;;  %v7265_v60 = vld [vmem:[%s12261_s11 + $0x910] sm:$0xff]  ;;  %v8871_v30 = vpack.c.bf16 %v7258_v27, %v7257_v42  ;;  %v7328_v42 = vld [vmem:[%s12261_s11 + $0xb08] sm:$0xff] }
0x12ab   :  { %5498 = vmatprep.mubr.f32.mxu1 %v9221_v29  ;;  %5575 = vmatprep.mubr.f32.mxu0 %v9221_v29  ;;  %v8889_v45 = vpack.c.bf16 %v7266_v62, %v7265_v60  ;;  %v8873_v60 = vpack.c.bf16 %v7242_v39, %v7241_v31  ;;  %v7313_v27 = vld [vmem:[%s12261_s11 + $0xa90] sm:$0xff]  ;;  %v7314_v31 = vld [vmem:[%s12261_s11 + $0xa98] sm:$0xff] }
0x12ac   :  { %8824 = vmatprep.subr.bf16.mxu1 %v8823_v37  ;;  %8832 = vmatprep.subr.bf16.mxu0 %v8831_v41  ;;  %v7284_v37 = vld [vmem:[%s12261_s11 + $0x9a8] sm:$0xff]  ;;  %v8857_v41 = vpack.c.bf16 %v7234_v25, %v7233_v7  ;;  %v7259_v7 = vld [vmem:[%s12261_s11 + $0x8e0] sm:$0xff]  ;;  %v7345_v39 = vld [vmem:[%s12261_s11 + $0xb90] sm:$0xff] }
0x12ad   :  { %7220 = vmatmul.mubr.msk.f32.gmra.mrb[72].mxu1 %vm189_vm4, %v11171_v10  ;;  %7222 = vmatmul.mubr.msk.f32.gmra.mrb[78].mxu0 %vm189_vm4, %v11171_v10  ;;  %v7260_v25 = vld [vmem:[%s12261_s11 + $0x8e8] sm:$0xff] }
0x12ae   :  { %8826 = vmatpush1.bf16.msra.mxu1 %v8825_v49  ;;  %8834 = vmatpush1.bf16.msra.mxu0 %v8833_v50  ;;  %v8891_v49 = vpack.c.bf16 %v7284_v37, %v7283_v35  ;;  %v7268_v50 = vld [vmem:[%s12261_s11 + $0x928] sm:$0xff]  ;;  %v8875_v26 = vpack.c.bf16 %v7260_v25, %v7259_v7  ;;  %v11539_v25 = vrot.slane %v11503_v3, %v10097_v19 }
0x12af   :  { %5646 = vmatprep.mubr.f32.mxu1 %v9221_v29  ;;  %5723 = vmatprep.mubr.f32.mxu0 %v9221_v29  ;;  %v7244_v37 = vld [vmem:[%s12261_s11 + $0x868] sm:$0xff] }
0x12b0   :  { %8836 = vmatprep.subr.bf16.mxu1 %v8835_v57  ;;  %8844 = vmatprep.subr.bf16.mxu0 %v8843_v43  ;;  %v8861_v57 = vpack.c.bf16 %v7236_v47, %v7235_v46  ;;  %v8877_v46 = vpack.c.bf16 %v7244_v37, %v7243_v16  ;;  %v7298_v37 = vld [vmem:[%s12261_s11 + $0xa18] sm:$0xff] }
0x12b1   :  { %7223 = vmatmul.mubr.msk.f32.vlgmr.msra.gmra.mrb[74].mxu1 %vm189_vm4, %v11141_v15  ;;  %7225 = vmatmul.mubr.msk.f32.vlgmr.msra.gmra.mrb[80].mxu0 %vm189_vm4, %v11141_v15 }
0x12b2   :  { %8838 = vmatpush1.bf16.msra.mxu1 %v8837_v4  ;;  %8846 = vmatpush1.bf16.msra.mxu0 %v8845_v58  ;;  %v7269_v4 = vld [vmem:[%s12261_s11 + $0x930] sm:$0xff]  ;;  %v7270_v58 = vld [vmem:[%s12261_s11 + $0x938] sm:$0xff] }
0x12b3   :  { %5652 = vmatprep.mubr.f32.mxu1 %v9221_v29  ;;  %5729 = vmatprep.mubr.f32.mxu0 %v9221_v29 }
0x12b4   :  { %8840 = vmatprep.subr.bf16.mxu1 %v8839_v6  ;;  %8848 = vmatprep.subr.bf16.mxu0 %v8847_v40  ;;  %v8865_v6 = vpack.c.bf16 %v7238_v1, %v7237_v61  ;;  %v8897_v40 = vpack.c.bf16 %v7270_v58, %v7269_v4  ;;  %v7278_v61 = vld [vmem:[%s12261_s11 + $0x978] sm:$0xff]  ;;  %v7343_v4 = vld [vmem:[%s12261_s11 + $0xb80] sm:$0xff] }
0x12b5   :  { %7224 = vmatmul.mubr.msk.f32.gmra.mrb[76].mxu1 %vm189_vm4, %v11171_v10  ;;  %7226 = vmatmul.mubr.msk.f32.gmra.mrb[82].mxu0 %vm189_vm4, %v11171_v10  ;;  %v8947_v63 = vpack.c.bf16 %v7344_v59, %v7343_v4 }
0x12b6   :  { %8842 = vmatpush1.bf16.msra.mxu1 %v8841_v28  ;;  %8850 = vmatpush1.bf16.msra.mxu0 %v8849_v24  ;;  %v7271_v28 = vld [vmem:[%s12261_s11 + $0x940] sm:$0xff]  ;;  %v7272_v24 = vld [vmem:[%s12261_s11 + $0x948] sm:$0xff] }
0x12b7   :  { %5800 = vmatprep.mubr.f32.mxu1 %v9221_v29  ;;  %5877 = vmatprep.mubr.f32.mxu0 %v9221_v29  ;;  %v8901_v44 = vpack.c.bf16 %v7272_v24, %v7271_v28  ;;  %v7327_v24 = vld [vmem:[%s12261_s11 + $0xb00] sm:$0xff] }
0x12b8   :  { %8852 = vmatprep.subr.bf16.mxu1 %v8851_v33  ;;  %8884 = vmatprep.subr.bf16.mxu0 %v8883_v53  ;;  %v7289_v33 = vld [vmem:[%s12261_s11 + $0x9d0] sm:$0xff]  ;;  %v7290_v53 = vld [vmem:[%s12261_s11 + $0x9d8] sm:$0xff]  ;;  %v8949_v7 = vpack.c.bf16 %v7328_v42, %v7327_v24  ;;  %v7332_v24 = vld [vmem:[%s12261_s11 + $0xb28] sm:$0xff] }
0x12b9   :  { %7227 = vmatmul.mubr.msk.f32.vlgmr.msra.gmra.mrb[78].mxu1 %vm189_vm4, %v11141_v15  ;;  %7229 = vmatmul.mubr.msk.f32.vlgmr.msra.gmra.mrb[84].mxu0 %vm189_vm4, %v11141_v15  ;;  %v8903_v0 = vpack.c.bf16 %v7290_v53, %v7289_v33  ;;  %v7317_v42 = vld [vmem:[%s12261_s11 + $0xab0] sm:$0xff] }
0x12ba   :  { %5806 = vmatprep.mubr.f32.mxu1 %v9221_v29  ;;  %5883 = vmatprep.mubr.f32.mxu0 %v9221_v29  ;;  %v7267_v29 = vld [vmem:[%s12261_s11 + $0x920] sm:$0xff] }
0x12bb   :  { %8854 = vmatpush3.bf16.msra.mxu1 %v8853_v20  ;;  %8886 = vmatpush3.bf16.msra.mxu0 %v8885_v21  ;;  %v8893_v43 = vpack.c.bf16 %v7268_v50, %v7267_v29  ;;  %v7273_v20 = vld [vmem:[%s12261_s11 + $0x950] sm:$0xff]  ;;  %v7274_v21 = vld [vmem:[%s12261_s11 + $0x958] sm:$0xff] }
0x12bc   :  { %8856 = vmatprep.subr.bf16.mxu1 %v8855_v13  ;;  %8888 = vmatprep.subr.bf16.mxu0 %v8887_v18  ;;  %v7291_v13 = vld [vmem:[%s12261_s11 + $0x9e0] sm:$0xff]  ;;  %v7292_v18 = vld [vmem:[%s12261_s11 + $0x9e8] sm:$0xff]  ;;  %v8905_v62 = vpack.c.bf16 %v7274_v21, %v7273_v20  ;;  %v7293_v29 = vld [vmem:[%s12261_s11 + $0x9f0] sm:$0xff] }
0x12bd   :  { %7228 = vmatmul.mubr.msk.f32.gmra.mrb[80].mxu1 %vm189_vm4, %v11171_v10  ;;  %7230 = vmatmul.mubr.msk.f32.gmra.mrb[86].mxu0 %vm189_vm4, %v11171_v10  ;;  %v8907_v35 = vpack.c.bf16 %v7292_v18, %v7291_v13  ;;  %v8911_v36 = vpack.c.bf16 %v7294_v51, %v7293_v29  ;;  %v7297_v13 = vld [vmem:[%s12261_s11 + $0xa10] sm:$0xff]  ;;  %v7315_v51 = vld [vmem:[%s12261_s11 + $0xaa0] sm:$0xff] }
0x12be   :  { %v8921_v59 = vpack.c.bf16 %v7298_v37, %v7297_v13  ;;  %v7302_v13 = vld [vmem:[%s12261_s11 + $0xa38] sm:$0xff]  ;;  %v7319_v37 = vld [vmem:[%s12261_s11 + $0xac0] sm:$0xff] }
0x12bf   :  { %8858 = vmatpush3.bf16.msra.mxu1 %v8857_v41  ;;  %8890 = vmatpush3.bf16.msra.mxu0 %v8889_v45  ;;  %v7275_v41 = vld [vmem:[%s12261_s11 + $0x960] sm:$0xff]  ;;  %v7276_v45 = vld [vmem:[%s12261_s11 + $0x968] sm:$0xff] }
0x12c0   :  { %8860 = vmatprep.subr.bf16.mxu1 %v8859_v55  ;;  %8892 = vmatprep.subr.bf16.mxu0 %v8891_v49  ;;  %v8909_v47 = vpack.c.bf16 %v7276_v45, %v7275_v41  ;;  %v7261_v55 = vld [vmem:[%s12261_s11 + $0x8f0] sm:$0xff]  ;;  %v7262_v49 = vld [vmem:[%s12261_s11 + $0x8f8] sm:$0xff] }
0x12c1   :  { %v8879_v50 = vpack.c.bf16 %v7262_v49, %v7261_v55  ;;  %v7329_v41 = vld [vmem:[%s12261_s11 + $0xb10] sm:$0xff] }
0x12c3   :  { %8862 = vmatpush3.bf16.msra.mxu1 %v8861_v57  ;;  %8894 = vmatpush3.bf16.msra.mxu0 %v8893_v43  ;;  %v8881_v57 = vpack.c.bf16 %v7246_v56, %v7245_v52  ;;  %v7277_v43 = vld [vmem:[%s12261_s11 + $0x970] sm:$0xff] }
0x12c4   :  { %8864 = vmatprep.subr.bf16.mxu1 %v8863_v38  ;;  %8896 = vmatprep.subr.bf16.mxu0 %v8895_v2  ;;  %v8913_v1 = vpack.c.bf16 %v7278_v61, %v7277_v43  ;;  %v7311_v38 = vld [vmem:[%s12261_s11 + $0xa80] sm:$0xff]  ;;  %v7312_v2 = vld [vmem:[%s12261_s11 + $0xa88] sm:$0xff] }
0x12c5   :  { %v8915_v58 = vpack.c.bf16 %v7312_v2, %v7311_v38  ;;  %v7347_v43 = vld [vmem:[%s12261_s11 + $0xba0] sm:$0xff]  ;;  %v7348_v61 = vld [vmem:[%s12261_s11 + $0xba8] sm:$0xff] }
0x12c7   :  { %8866 = vmatpush3.bf16.msra.mxu1 %v8865_v6  ;;  %8898 = vmatpush3.bf16.msra.mxu0 %v8897_v40  ;;  %v5199_v6 = vrot.slane %v11503_v3, %v10069_v9  ;;  %v5195_v40 = vrot.slane %v11503_v3, %v10077_v11 }
0x12c8   :  { %8868 = vmatprep.subr.bf16.mxu1 %v8867_v22  ;;  %8900 = vmatprep.subr.bf16.mxu0 %v8899_v23  ;;  %v7296_v22 = vld [vmem:[%s12261_s11 + $0xa08] sm:$0xff] }
0x12c9   :  { %v8917_v21 = vpack.c.bf16 %v7296_v22, %v7295_v17 }
0x12cb   :  { %8870 = vmatpush3.bf16.msra.mxu1 %v8869_v54  ;;  %8902 = vmatpush3.bf16.msra.mxu0 %v8901_v44 }
0x12cc   :  { %8872 = vmatprep.subr.bf16.mxu1 %v8871_v30  ;;  %8904 = vmatprep.subr.bf16.mxu0 %v8903_v0  ;;  %v7346_v30 = vld [vmem:[%s12261_s11 + $0xb98] sm:$0xff] }
0x12cf   :  { %8874 = vmatpush3.bf16.msra.mxu1 %v8873_v60  ;;  %8906 = vmatpush3.bf16.msra.mxu0 %v8905_v62 }
0x12d0   :  { %8876 = vmatprep.subr.bf16.mxu1 %v8875_v26  ;;  %8908 = vmatprep.subr.bf16.mxu0 %v8907_v35  ;;  %v8919_v26 = vpack.c.bf16 %v7314_v31, %v7313_v27  ;;  %v8951_v35 = vpack.c.bf16 %v7346_v30, %v7345_v39 }
0x12d3   :  { %8878 = vmatpush3.bf16.msra.mxu1 %v8877_v46  ;;  %8910 = vmatpush3.bf16.msra.mxu0 %v8909_v47 }
0x12d4   :  { %8880 = vmatprep.subr.bf16.mxu1 %v8879_v50  ;;  %8912 = vmatprep.subr.bf16.mxu0 %v8911_v36  ;;  %v7330_v50 = vld [vmem:[%s12261_s11 + $0xb18] sm:$0xff]  ;;  %v11558_v36 = vrot.slane %v11503_v3, %v10118_v34 }
0x12d7   :  { %8882 = vmatpush3.bf16.msra.mxu1 %v8881_v57  ;;  %8914 = vmatpush3.bf16.msra.mxu0 %v8913_v1  ;;  %v7316_v57 = vld [vmem:[%s12261_s11 + $0xaa8] sm:$0xff]  ;;  %v7299_v1 = vld [vmem:[%s12261_s11 + $0xa20] sm:$0xff] }
0x12d8   :  { %8916 = vmatprep.subr.bf16.mxu1 %v8915_v58  ;;  %8948 = vmatprep.subr.bf16.mxu0 %v8947_v63  ;;  %v8953_v63 = vpack.c.bf16 %v7330_v50, %v7329_v41  ;;  %v7320_v41 = vld [vmem:[%s12261_s11 + $0xac8] sm:$0xff]  ;;  %v7303_v50 = vld [vmem:[%s12261_s11 + $0xa40] sm:$0xff] }
0x1374   :  { %v5340_v23 = vpop.f32.mrb[66].mxu1  ;;  %v5417_v28 = vpop.f32.mrb[72].mxu0 }
0x1375   :  { %v5341_v33 = vadd.f32 %v5340_v23, %v5191_v5  ;;  %v5418_v53 = vadd.f32 %v5417_v28, %v5199_v6  ;;  %v5342_v54 = vpop.f32.mrb[67].mxu1  ;;  %v5419_v44 = vpop.f32.mrb[73].mxu0  ;;  %v8923_v23 = vpack.c.bf16 %v7316_v57, %v7315_v51  ;;  %v8955_v28 = vpack.c.bf16 %v7348_v61, %v7347_v43  ;;  %v7304_v51 = vld [vmem:[%s12261_s11 + $0xa48] sm:$0xff]  ;;  %v7335_v61 = vld [vmem:[%s12261_s11 + $0xb40] sm:$0xff] }
0x1376   :  { %v5343_v0 = vadd.f32 %v5342_v54, %v5195_v40  ;;  %v5420_v20 = vadd.f32 %v5419_v44, %v5203_v14  ;;  %v7349_v54 = vld [vmem:[%s12261_s11 + $0xbb0] sm:$0xff]  ;;  %v7350_v44 = vld [vmem:[%s12261_s11 + $0xbb8] sm:$0xff]  ;;  %v8931_v57 = vpack.c.bf16 %v7320_v41, %v7319_v37  ;;  %v7339_v41 = vld [vmem:[%s12261_s11 + $0xb60] sm:$0xff] }
0x1377   :  { %v5890_v45 = vmax.f32 %v5341_v33, 0.0  ;;  %v5892_v46 = vmax.f32 %v5418_v53, 0.0  ;;  %v7318_v53 = vld [vmem:[%s12261_s11 + $0xab8] sm:$0xff] }
0x1378   :  { %v5891_v18 = vmax.f32 %v5343_v0, 0.0  ;;  %v5893_v60 = vmax.f32 %v5420_v20, 0.0  ;;  %v5346_v62 = vpop.f32.mrb[68].mxu1  ;;  %v5423_v16 = vpop.f32.mrb[74].mxu0 }
0x1379   :  { %v5347_v47 = vadd.f32 %v5346_v62, %v5191_v5  ;;  %v5424_v55 = vadd.f32 %v5423_v16, %v5199_v6  ;;  %v5348_v49 = vpop.f32.mrb[69].mxu1  ;;  %v5425_v29 = vpop.f32.mrb[75].mxu0  ;;  %v7300_v5 = vld [vmem:[%s12261_s11 + $0xa28] sm:$0xff]  ;;  %v7331_v6 = vld [vmem:[%s12261_s11 + $0xb20] sm:$0xff]  ;;  %v8927_v62 = vpack.c.bf16 %v7318_v53, %v7317_v42  ;;  %v8959_v16 = vpack.c.bf16 %v7350_v44, %v7349_v54 }
0x137a   :  { %v5349_v52 = vadd.f32 %v5348_v49, %v5195_v40  ;;  %v5426_v56 = vadd.f32 %v5425_v29, %v5203_v14  ;;  %6251 = vmatprep.mubr.f32.mxu1 %v5891_v18  ;;  %6326 = vmatprep.mubr.f32.mxu0 %v5893_v60  ;;  %v8925_v20 = vpack.c.bf16 %v7300_v5, %v7299_v1  ;;  %v7336_v1 = vld [vmem:[%s12261_s11 + $0xb48] sm:$0xff]  ;;  %v7323_v53 = vld [vmem:[%s12261_s11 + $0xae0] sm:$0xff] }
0x137b   :  { %6252 = vmatmul.mubr.f32.vlgmr.msra.gmra.mrb[82].mxu1 %v5890_v45  ;;  %6327 = vmatmul.mubr.f32.vlgmr.msra.gmra.mrb[88].mxu0 %v5892_v46  ;;  %v5906_v40 = vmax.f32 %v5347_v47, 0.0  ;;  %v5908_v14 = vmax.f32 %v5424_v55, 0.0  ;;  %v7351_v45 = vld [vmem:[%s12261_s11 + $0xbc0] sm:$0xff]  ;;  %v7352_v46 = vld [vmem:[%s12261_s11 + $0xbc8] sm:$0xff] }
0x137c   :  { %v5907_v38 = vmax.f32 %v5349_v52, 0.0  ;;  %v5909_v2 = vmax.f32 %v5426_v56, 0.0  ;;  %8918 = vmatpush3.bf16.msra.mxu1 %v8917_v21  ;;  %8950 = vmatpush3.bf16.msra.mxu0 %v8949_v7  ;;  %v11572_v4 = vpop.f32.mrb[70].mxu1  ;;  %v11574_v58 = vpop.f32.mrb[76].mxu0  ;;  %v8957_v21 = vpack.c.bf16 %v7332_v24, %v7331_v6  ;;  %v7301_v7 = vld [vmem:[%s12261_s11 + $0xa30] sm:$0xff]  ;;  %v8963_v43 = vpack.c.bf16 %v7352_v46, %v7351_v45  ;;  %v7324_v54 = vld [vmem:[%s12261_s11 + $0xae8] sm:$0xff] }
0x137d   :  { %v5496_v17 = vpop.f32.mrb[71].mxu1  ;;  %v5573_v22 = vpop.f32.mrb[77].mxu0  ;;  %8920 = vmatprep.subr.bf16.mxu1 %v8919_v26  ;;  %8952 = vmatprep.subr.bf16.mxu0 %v8951_v35  ;;  %v7333_v26 = vld [vmem:[%s12261_s11 + $0xb30] sm:$0xff]  ;;  %v7334_v35 = vld [vmem:[%s12261_s11 + $0xb38] sm:$0xff]  ;;  %v8929_v49 = vpack.c.bf16 %v7302_v13, %v7301_v7  ;;  %v7355_v44 = vld [vmem:[%s12261_s11 + $0xbe0] sm:$0xff] }
0x137e   :  { %v5497_v27 = vadd.f32 %v5496_v17, %v11539_v25  ;;  %v5574_v33 = vadd.f32 %v5573_v22, %v11558_v36  ;;  %6256 = vmatprep.mubr.f32.mxu1 %v5907_v38  ;;  %6331 = vmatprep.mubr.f32.mxu0 %v5909_v2  ;;  %v8961_v29 = vpack.c.bf16 %v7334_v35, %v7333_v26  ;;  %v7321_v38 = vld [vmem:[%s12261_s11 + $0xad0] sm:$0xff]  ;;  %v7322_v2 = vld [vmem:[%s12261_s11 + $0xad8] sm:$0xff]  ;;  %v7307_v13 = vld [vmem:[%s12261_s11 + $0xa60] sm:$0xff] }
0x137f   :  { %6257 = vmatmul.mubr.f32.gmra.mrb[84].mxu1 %v5906_v40  ;;  %6332 = vmatmul.mubr.f32.gmra.mrb[90].mxu0 %v5908_v14  ;;  %v8933_v40 = vpack.c.bf16 %v7304_v51, %v7303_v50  ;;  %v8965_v14 = vpack.c.bf16 %v7336_v1, %v7335_v61  ;;  %v7305_v17 = vld [vmem:[%s12261_s11 + $0xa50] sm:$0xff]  ;;  %v7306_v22 = vld [vmem:[%s12261_s11 + $0xa58] sm:$0xff]  ;;  %v8935_v24 = vpack.c.bf16 %v7322_v2, %v7321_v38  ;;  %v7340_v45 = vld [vmem:[%s12261_s11 + $0xb68] sm:$0xff] }
0x1380   :  { %v5895_v31 = vmax.f32 %v5497_v27, 0.0  ;;  %v5897_v39 = vmax.f32 %v5574_v33, 0.0  ;;  %8922 = vmatpush3.bf16.msra.mxu1 %v8921_v59  ;;  %8954 = vmatpush3.bf16.msra.mxu0 %v8953_v63  ;;  %v11599_v30 = vpop.f32.mrb[72].mxu1  ;;  %v11601_v0 = vpop.f32.mrb[78].mxu0  ;;  %v7353_v59 = vld [vmem:[%s12261_s11 + $0xbd0] sm:$0xff]  ;;  %v7354_v63 = vld [vmem:[%s12261_s11 + $0xbd8] sm:$0xff]  ;;  %v8939_v35 = vpack.c.bf16 %v7324_v54, %v7323_v53  ;;  %v5207_v51 = vrot.slane %v11503_v3, %v10279_v32 }
0x1381   :  { %v11609_v18 = vpop.f32.mrb[73].mxu1  ;;  %v11611_v60 = vpop.f32.mrb[79].mxu0  ;;  %8924 = vmatprep.subr.bf16.mxu1 %v8923_v23  ;;  %8956 = vmatprep.subr.bf16.mxu0 %v8955_v28  ;;  %v8967_v42 = vpack.c.bf16 %v7354_v63, %v7353_v59  ;;  %v7337_v27 = vld [vmem:[%s12261_s11 + $0xb50] sm:$0xff]  ;;  %v7338_v33 = vld [vmem:[%s12261_s11 + $0xb58] sm:$0xff]  ;;  %v8973_v1 = vpack.c.bf16 %v7340_v45, %v7339_v41  ;;  %v5215_v63 = vrot.slane %v11503_v3, %v10292_v48  ;;  %v7376_v3 = vld [vmem:[%s12261_s11 + $0xc88] sm:$0xff] }
0x1382   :  { %6401 = vmatprep.mubr.f32.mxu1 %v5895_v31  ;;  %6476 = vmatprep.mubr.f32.mxu0 %v5897_v39  ;;  %v7356_v31 = vld [vmem:[%s12261_s11 + $0xbe8] sm:$0xff]  ;;  %v8969_v7 = vpack.c.bf16 %v7338_v33, %v7337_v27  ;;  %v7325_v46 = vld [vmem:[%s12261_s11 + $0xaf0] sm:$0xff]  ;;  %v7358_v50 = vld [vmem:[%s12261_s11 + $0xbf8] sm:$0xff] }
0x1383   :  { %v8971_v37 = vpack.c.bf16 %v7356_v31, %v7355_v44  ;;  %v7309_v38 = vld [vmem:[%s12261_s11 + $0xa70] sm:$0xff]  ;;  %v7310_v2 = vld [vmem:[%s12261_s11 + $0xa78] sm:$0xff]  ;;  %v7407_v27 = vld [vmem:[%s12261_s11 + $0xd80] sm:$0xff]  ;;  %v5572_v41 = vadd.f32 %v11574_v58, %v5215_v63  ;;  %v5580_v58 = vadd.f32 %v11611_v60, %v11558_v36  ;;  %v5578_v36 = vadd.f32 %v11601_v0, %v5215_v63 }
0x1384   :  { %8926 = vmatpush3.bf16.msra.mxu1 %v8925_v20  ;;  %8958 = vmatpush3.bf16.msra.mxu0 %v8957_v21  ;;  %v11631_v47 = vpop.f32.mrb[74].mxu1  ;;  %v11633_v55 = vpop.f32.mrb[80].mxu0  ;;  %v8937_v21 = vpack.c.bf16 %v7306_v22, %v7305_v17  ;;  %v7341_v59 = vld [vmem:[%s12261_s11 + $0xb70] sm:$0xff]  ;;  %v7408_v33 = vld [vmem:[%s12261_s11 + $0xd88] sm:$0xff]  ;;  %v11766_v53 = vld [vmem:[%s12262_s10 + $0x18] sm:$0xff]  ;;  %v8945_v31 = vpack.c.bf16 %v7310_v2, %v7309_v38 }
0x1385   :  { %v11641_v52 = vpop.f32.mrb[75].mxu1  ;;  %v11643_v56 = vpop.f32.mrb[81].mxu0  ;;  %8928 = vmatprep.subr.bf16.mxu1 %v8927_v62  ;;  %8960 = vmatprep.subr.bf16.mxu0 %v8959_v16  ;;  %v7308_v62 = vld [vmem:[%s12261_s11 + $0xa68] sm:$0xff]  ;;  %v7359_v54 = vld [vmem:[%s12261_s11 + $0xc00] sm:$0xff]  ;;  %v9011_v45 = vpack.c.bf16 %v7408_v33, %v7407_v27  ;;  %v5913_v60 = vmax.f32 %v5580_v58, 0.0  ;;  %v7393_v0 = vld [vmem:[%s12261_s11 + $0xd10] sm:$0xff] }
0x1386   :  { %v8941_v61 = vpack.c.bf16 %v7308_v62, %v7307_v13  ;;  %v7360_v44 = vld [vmem:[%s12261_s11 + $0xc08] sm:$0xff]  ;;  %v7391_v13 = vld [vmem:[%s12261_s11 + $0xd00] sm:$0xff]  ;;  %v5912_v27 = vmax.f32 %v5578_v36, 0.0  ;;  %v7365_v58 = vld [vmem:[%s12261_s11 + $0xc30] sm:$0xff] }
0x1387   :  { %v7392_v62 = vld [vmem:[%s12261_s11 + $0xd08] sm:$0xff]  ;;  %v7379_v63 = vld [vmem:[%s12261_s11 + $0xca0] sm:$0xff] }
0x1388   :  { %8930 = vmatpush3.bf16.msra.mxu1 %v8929_v49  ;;  %8962 = vmatpush3.bf16.msra.mxu0 %v8961_v29  ;;  %v11663_v5 = vpop.f32.mrb[76].mxu1  ;;  %v11665_v6 = vpop.f32.mrb[82].mxu0  ;;  %v7326_v49 = vld [vmem:[%s12261_s11 + $0xaf8] sm:$0xff]  ;;  %v7357_v29 = vld [vmem:[%s12261_s11 + $0xbf0] sm:$0xff]  ;;  %v9013_v38 = vpack.c.bf16 %v7392_v62, %v7391_v13  ;;  %v7415_v36 = vld [vmem:[%s12261_s11 + $0xdc0] sm:$0xff] }
0x1389   :  { %v11673_v23 = vpop.f32.mrb[77].mxu1  ;;  %v11675_v28 = vpop.f32.mrb[83].mxu0  ;;  %8932 = vmatprep.subr.bf16.mxu1 %v8931_v57  ;;  %8964 = vmatprep.subr.bf16.mxu0 %v8963_v43  ;;  %v8943_v17 = vpack.c.bf16 %v7326_v49, %v7325_v46  ;;  %v8975_v22 = vpack.c.bf16 %v7358_v50, %v7357_v29  ;;  %v7378_v46 = vld [vmem:[%s12261_s11 + $0xc98] sm:$0xff]  ;;  %v7409_v49 = vld [vmem:[%s12261_s11 + $0xd90] sm:$0xff]  ;;  %v11800_v50 = vrot.slane %v11766_v53, %v10077_v11 }
0x138a   :  { %v7410_v29 = vld [vmem:[%s12261_s11 + $0xd98] sm:$0xff]  ;;  %v7361_v11 = vld [vmem:[%s12261_s11 + $0xc10] sm:$0xff] }
0x138c   :  { %8934 = vmatpush3.bf16.msra.mxu1 %v8933_v40  ;;  %8966 = vmatpush3.bf16.msra.mxu0 %v8965_v14  ;;  %v11695_v39 = vpop.f32.mrb[78].mxu1  ;;  %v11697_v20 = vpop.f32.mrb[84].mxu0 }
0x138d   :  { %v11705_v16 = vpop.f32.mrb[79].mxu1  ;;  %v11707_v26 = vpop.f32.mrb[85].mxu0  ;;  %8936 = vmatprep.subr.bf16.mxu1 %v8935_v24  ;;  %8968 = vmatprep.subr.bf16.mxu0 %v8967_v42  ;;  %v7342_v24 = vld [vmem:[%s12261_s11 + $0xb78] sm:$0xff]  ;;  %v7375_v42 = vld [vmem:[%s12261_s11 + $0xc80] sm:$0xff] }
0x1390   :  { %8938 = vmatpush3.bf16.msra.mxu1 %v8937_v21  ;;  %8970 = vmatpush3.bf16.msra.mxu0 %v8969_v7  ;;  %v11729_v57 = vpop.f32.mrb[80].mxu1  ;;  %v11731_v43 = vpop.f32.mrb[86].mxu0  ;;  %v8977_v21 = vpack.c.bf16 %v7342_v24, %v7341_v59  ;;  %v8979_v7 = vpack.c.bf16 %v7376_v3, %v7375_v42  ;;  %v9015_v59 = vpack.c.bf16 %v7410_v29, %v7409_v49  ;;  %v7412_v42 = vld [vmem:[%s12261_s11 + $0xda8] sm:$0xff]  ;;  %v7414_v49 = vld [vmem:[%s12261_s11 + $0xdb8] sm:$0xff] }
0x1391   :  { %v11744_v40 = vpop.f32.mrb[81].mxu1  ;;  %v11746_v14 = vpop.f32.mrb[87].mxu0  ;;  %8940 = vmatprep.subr.bf16.mxu1 %v8939_v35  ;;  %8972 = vmatprep.subr.bf16.mxu0 %v8971_v37  ;;  %v7377_v35 = vld [vmem:[%s12261_s11 + $0xc90] sm:$0xff]  ;;  %v5495_v37 = vadd.f32 %v11572_v4, %v5207_v51  ;;  %v5503_v4 = vadd.f32 %v11609_v18, %v11539_v25  ;;  %v5501_v25 = vadd.f32 %v11599_v30, %v5207_v51  ;;  %v7394_v51 = vld [vmem:[%s12261_s11 + $0xd18] sm:$0xff] }
0x1392   :  { %v8983_v2 = vpack.c.bf16 %v7378_v46, %v7377_v35  ;;  %v5651_v24 = vadd.f32 %v11641_v52, %v11800_v50  ;;  %v7380_v52 = vld [vmem:[%s12261_s11 + $0xca8] sm:$0xff]  ;;  %v7395_v35 = vld [vmem:[%s12261_s11 + $0xd20] sm:$0xff]  ;;  %v7413_v46 = vld [vmem:[%s12261_s11 + $0xdb0] sm:$0xff] }
0x1393   :  { %v5911_v18 = vmax.f32 %v5503_v4, 0.0  ;;  %v5910_v3 = vmax.f32 %v5501_v25, 0.0  ;;  %v8987_v13 = vpack.c.bf16 %v7380_v52, %v7379_v63  ;;  %v7384_v25 = vld [vmem:[%s12261_s11 + $0xcc8] sm:$0xff]  ;;  %v7385_v52 = vld [vmem:[%s12261_s11 + $0xcd0] sm:$0xff] }
0x1394   :  { %8942 = vmatpush3.bf16.msra.mxu1 %v8941_v61  ;;  %8974 = vmatpush3.bf16.msra.mxu0 %v8973_v1  ;;  %v11804_v61 = vrot.slane %v11766_v53, %v10080_v12  ;;  %v8981_v1 = vpack.c.bf16 %v7360_v44, %v7359_v54  ;;  %v7362_v12 = vld [vmem:[%s12261_s11 + $0xc18] sm:$0xff]  ;;  %v9017_v54 = vpack.c.bf16 %v7394_v51, %v7393_v0  ;;  %v7363_v44 = vld [vmem:[%s12261_s11 + $0xc20] sm:$0xff]  ;;  %v7400_v63 = vld [vmem:[%s12261_s11 + $0xd48] sm:$0xff] }
0x1395   :  { %8944 = vmatprep.subr.bf16.mxu1 %v8943_v17  ;;  %8976 = vmatprep.subr.bf16.mxu0 %v8975_v22  ;;  %v5894_v17 = vmax.f32 %v5495_v37, 0.0  ;;  %v5896_v22 = vmax.f32 %v5572_v41, 0.0  ;;  %v8985_v33 = vpack.c.bf16 %v7362_v12, %v7361_v11  ;;  %v7396_v37 = vld [vmem:[%s12261_s11 + $0xd28] sm:$0xff]  ;;  %v7381_v41 = vld [vmem:[%s12261_s11 + $0xcb0] sm:$0xff]  ;;  %v7399_v51 = vld [vmem:[%s12261_s11 + $0xd40] sm:$0xff] }
0x1396   :  { %v5728_v30 = vadd.f32 %v11643_v56, %v11804_v61  ;;  %v7411_v56 = vld [vmem:[%s12261_s11 + $0xda0] sm:$0xff]  ;;  %v9021_v4 = vpack.c.bf16 %v7396_v37, %v7395_v35  ;;  %v7416_v11 = vld [vmem:[%s12261_s11 + $0xdc8] sm:$0xff] }
0x1397   :  { %v9019_v62 = vpack.c.bf16 %v7412_v42, %v7411_v56  ;;  %v9027_v0 = vpack.c.bf16 %v7416_v11, %v7415_v36  ;;  %v7386_v56 = vld [vmem:[%s12261_s11 + $0xcd8] sm:$0xff]  ;;  %v7417_v42 = vld [vmem:[%s12261_s11 + $0xdd0] sm:$0xff]  ;;  %v7388_v35 = vld [vmem:[%s12261_s11 + $0xce8] sm:$0xff] }
0x1398   :  { %8946 = vmatpush3.bf16.msra.mxu1 %v8945_v31  ;;  %8978 = vmatpush3.bf16.msra.mxu0 %v8977_v21  ;;  %v7364_v31 = vld [vmem:[%s12261_s11 + $0xc28] sm:$0xff]  ;;  %v5899_v21 = vmax.f32 %v5651_v24, 0.0  ;;  %v7419_v37 = vld [vmem:[%s12261_s11 + $0xde0] sm:$0xff] }
0x1399   :  { %8980 = vmatprep.subr.bf16.mxu1 %v8979_v7  ;;  %9012 = vmatprep.subr.bf16.mxu0 %v9011_v45  ;;  %v5901_v7 = vmax.f32 %v5728_v30, 0.0  ;;  %v7382_v45 = vld [vmem:[%s12261_s11 + $0xcb8] sm:$0xff]  ;;  %v8989_v29 = vpack.c.bf16 %v7364_v31, %v7363_v44  ;;  %v7368_v24 = vld [vmem:[%s12261_s11 + $0xc48] sm:$0xff]  ;;  %v8999_v31 = vpack.c.bf16 %v7386_v56, %v7385_v52  ;;  %v7423_v56 = vld [vmem:[%s12261_s11 + $0xe00] sm:$0xff] }
0x139a   :  { %v7370_v44 = vld [vmem:[%s12261_s11 + $0xc58] sm:$0xff]  ;;  %v7472_v52 = vld [vmem:[%s12261_s11 + $0xf88] sm:$0xff] }
0x139b   :  { %6402 = vmatmul.mubr.f32.vlgmr.msra.gmra.mrb[86].mxu1 %v5894_v17  ;;  %6477 = vmatmul.mubr.f32.vlgmr.msra.gmra.mrb[92].mxu0 %v5896_v22  ;;  %v7398_v17 = vld [vmem:[%s12261_s11 + $0xd38] sm:$0xff]  ;;  %v7383_v22 = vld [vmem:[%s12261_s11 + $0xcc0] sm:$0xff] }
0x139c   :  { %6406 = vmatprep.mubr.f32.mxu1 %v5911_v18  ;;  %6481 = vmatprep.mubr.f32.mxu0 %v5913_v60  ;;  %v7367_v60 = vld [vmem:[%s12261_s11 + $0xc40] sm:$0xff]  ;;  %v8995_v30 = vpack.c.bf16 %v7384_v25, %v7383_v22  ;;  %v7422_v22 = vld [vmem:[%s12261_s11 + $0xdf8] sm:$0xff]  ;;  %v5223_v25 = vrot.slane %v11766_v53, %v10066_v8 }
0x139d   :  { %8982 = vmatpush3.bf16.msra.mxu1 %v8981_v1  ;;  %9014 = vmatpush3.bf16.msra.mxu0 %v9013_v38  ;;  %v7366_v1 = vld [vmem:[%s12261_s11 + $0xc38] sm:$0xff]  ;;  %v8991_v38 = vpack.c.bf16 %v7382_v45, %v7381_v41  ;;  %v7420_v41 = vld [vmem:[%s12261_s11 + $0xde8] sm:$0xff] }
0x139e   :  { %8984 = vmatprep.subr.bf16.mxu1 %v8983_v2  ;;  %9016 = vmatprep.subr.bf16.mxu0 %v9015_v59  ;;  %v9023_v2 = vpack.c.bf16 %v7414_v49, %v7413_v46  ;;  %v7397_v59 = vld [vmem:[%s12261_s11 + $0xd30] sm:$0xff]  ;;  %v8993_v12 = vpack.c.bf16 %v7366_v1, %v7365_v58  ;;  %v7371_v49 = vld [vmem:[%s12261_s11 + $0xc60] sm:$0xff]  ;;  %v9035_v58 = vpack.c.bf16 %v7420_v41, %v7419_v37  ;;  %v7474_v37 = vld [vmem:[%s12261_s11 + $0xf98] sm:$0xff] }
0x139f   :  { %6407 = vmatmul.mubr.f32.gmra.mrb[88].mxu1 %v5910_v3  ;;  %6482 = vmatmul.mubr.f32.gmra.mrb[94].mxu0 %v5912_v27  ;;  %v9025_v18 = vpack.c.bf16 %v7398_v17, %v7397_v59  ;;  %v7418_v3 = vld [vmem:[%s12261_s11 + $0xdd8] sm:$0xff]  ;;  %v8997_v27 = vpack.c.bf16 %v7368_v24, %v7367_v60  ;;  %v7403_v1 = vld [vmem:[%s12261_s11 + $0xd60] sm:$0xff]  ;;  %v7421_v17 = vld [vmem:[%s12261_s11 + $0xdf0] sm:$0xff]  ;;  %v5231_v24 = vrot.slane %v11766_v53, %v10069_v9 }
0x13a0   :  { %6551 = vmatprep.mubr.f32.mxu1 %v5899_v21  ;;  %6626 = vmatprep.mubr.f32.mxu0 %v5901_v7  ;;  %v9031_v21 = vpack.c.bf16 %v7418_v3, %v7417_v42  ;;  %v7401_v7 = vld [vmem:[%s12261_s11 + $0xd50] sm:$0xff]  ;;  %v7390_v59 = vld [vmem:[%s12261_s11 + $0xcf8] sm:$0xff]  ;;  %v7471_v9 = vld [vmem:[%s12261_s11 + $0xf80] sm:$0xff]  ;;  %v12016_v41 = vrot.slane %v11766_v53, %v10097_v19 }
0x13a1   :  { %8986 = vmatpush3.bf16.msra.mxu1 %v8985_v33  ;;  %9018 = vmatpush3.bf16.msra.mxu0 %v9017_v54  ;;  %v9029_v33 = vpack.c.bf16 %v7400_v63, %v7399_v51  ;;  %v7369_v54 = vld [vmem:[%s12261_s11 + $0xc50] sm:$0xff]  ;;  %v7439_v51 = vld [vmem:[%s12261_s11 + $0xe80] sm:$0xff]  ;;  %v7440_v63 = vld [vmem:[%s12261_s11 + $0xe88] sm:$0xff] }
0x13a2   :  { %8988 = vmatprep.subr.bf16.mxu1 %v8987_v13  ;;  %9020 = vmatprep.subr.bf16.mxu0 %v9019_v62  ;;  %v7402_v13 = vld [vmem:[%s12261_s11 + $0xd58] sm:$0xff]  ;;  %v7387_v62 = vld [vmem:[%s12261_s11 + $0xce0] sm:$0xff]  ;;  %v9001_v45 = vpack.c.bf16 %v7370_v44, %v7369_v54  ;;  %v7405_v60 = vld [vmem:[%s12261_s11 + $0xd70] sm:$0xff] }
0x13a3   :  { %v9033_v46 = vpack.c.bf16 %v7402_v13, %v7401_v7  ;;  %v7424_v42 = vld [vmem:[%s12261_s11 + $0xe08] sm:$0xff]  ;;  %v7455_v54 = vld [vmem:[%s12261_s11 + $0xf00] sm:$0xff]  ;;  %v5726_v7 = vadd.f32 %v11633_v55, %v5231_v24  ;;  %v9075_v13 = vpack.c.bf16 %v7472_v52, %v7471_v9  ;;  %v5734_v55 = vadd.f32 %v11675_v28, %v11804_v61  ;;  %v7425_v19 = vld [vmem:[%s12261_s11 + $0xe10] sm:$0xff] }
0x13a4   :  { %v7456_v44 = vld [vmem:[%s12261_s11 + $0xf08] sm:$0xff]  ;;  %v5732_v28 = vadd.f32 %v11665_v6, %v5231_v24  ;;  %v7457_v6 = vld [vmem:[%s12261_s11 + $0xf10] sm:$0xff]  ;;  %v7446_v9 = vld [vmem:[%s12261_s11 + $0xeb8] sm:$0xff] }
0x13a5   :  { %8990 = vmatpush3.bf16.msra.mxu1 %v8989_v29  ;;  %9022 = vmatpush3.bf16.msra.mxu0 %v9021_v4  ;;  %v7372_v29 = vld [vmem:[%s12261_s11 + $0xc68] sm:$0xff]  ;;  %v9003_v4 = vpack.c.bf16 %v7388_v35, %v7387_v62  ;;  %v7442_v62 = vld [vmem:[%s12261_s11 + $0xe98] sm:$0xff]  ;;  %v7473_v35 = vld [vmem:[%s12261_s11 + $0xf90] sm:$0xff]  ;;  %v5917_v61 = vmax.f32 %v5734_v55, 0.0 }
0x13a6   :  { %8992 = vmatprep.subr.bf16.mxu1 %v8991_v38  ;;  %9024 = vmatprep.subr.bf16.mxu0 %v9023_v2  ;;  %v7404_v38 = vld [vmem:[%s12261_s11 + $0xd68] sm:$0xff]  ;;  %v7389_v2 = vld [vmem:[%s12261_s11 + $0xcf0] sm:$0xff]  ;;  %v9005_v36 = vpack.c.bf16 %v7372_v29, %v7371_v49  ;;  %v9077_v49 = vpack.c.bf16 %v7456_v44, %v7455_v54  ;;  %v7431_v55 = vld [vmem:[%s12261_s11 + $0xe40] sm:$0xff] }
0x13a7   :  { %v9037_v11 = vpack.c.bf16 %v7404_v38, %v7403_v1  ;;  %v9007_v8 = vpack.c.bf16 %v7390_v59, %v7389_v2  ;;  %v5900_v1 = vmax.f32 %v5726_v7, 0.0  ;;  %v5805_v38 = vadd.f32 %v11705_v16, %v12016_v41  ;;  %v7458_v2 = vld [vmem:[%s12261_s11 + $0xf18] sm:$0xff]  ;;  %v7443_v59 = vld [vmem:[%s12261_s11 + $0xea0] sm:$0xff]  ;;  %v7444_v16 = vld [vmem:[%s12261_s11 + $0xea8] sm:$0xff] }
0x13a8   :  { %v7477_v52 = vld [vmem:[%s12261_s11 + $0xfb0] sm:$0xff]  ;;  %v7447_v7 = vld [vmem:[%s12261_s11 + $0xec0] sm:$0xff] }
0x13a9   :  { %8994 = vmatpush3.bf16.msra.mxu1 %v8993_v12  ;;  %9026 = vmatpush3.bf16.msra.mxu0 %v9025_v18  ;;  %v7373_v12 = vld [vmem:[%s12261_s11 + $0xc70] sm:$0xff]  ;;  %v7374_v18 = vld [vmem:[%s12261_s11 + $0xc78] sm:$0xff] }
0x13aa   :  { %8996 = vmatprep.subr.bf16.mxu1 %v8995_v30  ;;  %9028 = vmatprep.subr.bf16.mxu0 %v9027_v0  ;;  %v9039_v30 = vpack.c.bf16 %v7422_v22, %v7421_v17  ;;  %v7406_v0 = vld [vmem:[%s12261_s11 + $0xd78] sm:$0xff]  ;;  %v9009_v3 = vpack.c.bf16 %v7374_v18, %v7373_v12  ;;  %v7476_v17 = vld [vmem:[%s12261_s11 + $0xfa8] sm:$0xff]  ;;  %v7427_v12 = vld [vmem:[%s12261_s11 + $0xe20] sm:$0xff] }
0x13ab   :  { %v7428_v18 = vld [vmem:[%s12261_s11 + $0xe28] sm:$0xff] }
0x13ad   :  { %8998 = vmatpush3.bf16.msra.mxu1 %v8997_v27  ;;  %9030 = vmatpush3.bf16.msra.mxu0 %v9029_v33  ;;  %v9041_v27 = vpack.c.bf16 %v7406_v0, %v7405_v60  ;;  %v9043_v33 = vpack.c.bf16 %v7440_v63, %v7439_v51  ;;  %v5903_v60 = vmax.f32 %v5805_v38, 0.0  ;;  %v7459_v0 = vld [vmem:[%s12261_s11 + $0xf20] sm:$0xff]  ;;  %v7460_v51 = vld [vmem:[%s12261_s11 + $0xf28] sm:$0xff]  ;;  %v7445_v63 = vld [vmem:[%s12261_s11 + $0xeb0] sm:$0xff] }
0x13ae   :  { %9000 = vmatprep.subr.bf16.mxu1 %v8999_v31  ;;  %9032 = vmatprep.subr.bf16.mxu0 %v9031_v21  ;;  %v7441_v31 = vld [vmem:[%s12261_s11 + $0xe90] sm:$0xff]  ;;  %v5649_v21 = vadd.f32 %v11631_v47, %v5223_v25  ;;  %v5657_v47 = vadd.f32 %v11673_v23, %v11800_v50  ;;  %v5655_v23 = vadd.f32 %v11663_v5, %v5223_v25  ;;  %v5916_v25 = vmax.f32 %v5732_v28, 0.0  ;;  %v7434_v38 = vld [vmem:[%s12261_s11 + $0xe58] sm:$0xff] }
0x13af   :  { %v9047_v29 = vpack.c.bf16 %v7442_v62, %v7441_v31  ;;  %v9055_v54 = vpack.c.bf16 %v7446_v9, %v7445_v63  ;;  %v7461_v31 = vld [vmem:[%s12261_s11 + $0xf30] sm:$0xff]  ;;  %v7479_v62 = vld [vmem:[%s12261_s11 + $0xfc0] sm:$0xff]  ;;  %v7486_v63 = vld [vmem:[%s12261_s11 + $0xff8] sm:$0xff]  ;;  %v5239_v9 = vrot.slane %v11766_v53, %v10279_v32 }
0x13b0   :  { %v5915_v50 = vmax.f32 %v5657_v47, 0.0  ;;  %v5914_v22 = vmax.f32 %v5655_v23, 0.0  ;;  %v7450_v23 = vld [vmem:[%s12261_s11 + $0xed8] sm:$0xff]  ;;  %v7481_v28 = vld [vmem:[%s12261_s11 + $0xfd0] sm:$0xff] }
0x13b1   :  { %9002 = vmatpush3.bf16.msra.mxu1 %v9001_v45  ;;  %9034 = vmatpush3.bf16.msra.mxu0 %v9033_v46  ;;  %v12020_v45 = vrot.slane %v11766_v53, %v10118_v34  ;;  %v9045_v46 = vpack.c.bf16 %v7424_v42, %v7423_v56  ;;  %v7426_v34 = vld [vmem:[%s12261_s11 + $0xe18] sm:$0xff]  ;;  %v9053_v42 = vpack.c.bf16 %v7428_v18, %v7427_v12  ;;  %v7436_v12 = vld [vmem:[%s12261_s11 + $0xe68] sm:$0xff]  ;;  %v7469_v32 = vld [vmem:[%s12261_s11 + $0xf70] sm:$0xff] }
0x13b2   :  { %9004 = vmatprep.subr.bf16.mxu1 %v9003_v4  ;;  %9036 = vmatprep.subr.bf16.mxu0 %v9035_v58  ;;  %v9079_v4 = vpack.c.bf16 %v7474_v37, %v7473_v35  ;;  %v5898_v58 = vmax.f32 %v5649_v21, 0.0  ;;  %v7478_v56 = vld [vmem:[%s12261_s11 + $0xfb8] sm:$0xff]  ;;  %v7480_v35 = vld [vmem:[%s12261_s11 + $0xfc8] sm:$0xff] }
0x13b3   :  { %v5882_v5 = vadd.f32 %v11707_v26, %v12020_v45  ;;  %v7475_v26 = vld [vmem:[%s12261_s11 + $0xfa0] sm:$0xff]  ;;  %v9087_v44 = vpack.c.bf16 %v7478_v56, %v7477_v52  ;;  %v7462_v21 = vld [vmem:[%s12261_s11 + $0xf38] sm:$0xff] }
0x13b4   :  { %v9089_v47 = vpack.c.bf16 %v7462_v21, %v7461_v31 }
0x13b5   :  { %9006 = vmatpush3.bf16.msra.mxu1 %v9005_v36  ;;  %9038 = vmatpush3.bf16.msra.mxu0 %v9037_v11  ;;  %v9049_v36 = vpack.c.bf16 %v7426_v34, %v7425_v19  ;;  %v9081_v11 = vpack.c.bf16 %v7458_v2, %v7457_v6  ;;  %v5905_v24 = vmax.f32 %v5882_v5, 0.0  ;;  %v7482_v19 = vld [vmem:[%s12261_s11 + $0xfd8] sm:$0xff]  ;;  %v7465_v2 = vld [vmem:[%s12261_s11 + $0xf50] sm:$0xff] }
0x13b6   :  { %9008 = vmatprep.subr.bf16.mxu1 %v9007_v8  ;;  %9040 = vmatprep.subr.bf16.mxu0 %v9039_v30  ;;  %v9051_v8 = vpack.c.bf16 %v7444_v16, %v7443_v59  ;;  %v9083_v30 = vpack.c.bf16 %v7476_v17, %v7475_v26  ;;  %v9095_v6 = vpack.c.bf16 %v7482_v19, %v7481_v28  ;;  %v7466_v59 = vld [vmem:[%s12261_s11 + $0xf58] sm:$0xff]  ;;  %v7451_v16 = vld [vmem:[%s12261_s11 + $0xee0] sm:$0xff]  ;;  %v7452_v26 = vld [vmem:[%s12261_s11 + $0xee8] sm:$0xff] }
0x13b7   :  { %v7483_v17 = vld [vmem:[%s12261_s11 + $0xfe0] sm:$0xff]  ;;  %v9067_v18 = vpack.c.bf16 %v7452_v26, %v7451_v16 }
0x13b9   :  { %9010 = vmatpush3.bf16.msra.mxu1 %v9009_v3  ;;  %9042 = vmatpush3.bf16.msra.mxu0 %v9041_v27  ;;  %v9085_v3 = vpack.c.bf16 %v7460_v51, %v7459_v0  ;;  %v7429_v27 = vld [vmem:[%s12261_s11 + $0xe30] sm:$0xff]  ;;  %v7454_v0 = vld [vmem:[%s12261_s11 + $0xef8] sm:$0xff] }
0x13ba   :  { %9044 = vmatprep.subr.bf16.mxu1 %v9043_v33  ;;  %9076 = vmatprep.subr.bf16.mxu0 %v9075_v13  ;;  %v7430_v33 = vld [vmem:[%s12261_s11 + $0xe38] sm:$0xff]  ;;  %v7448_v13 = vld [vmem:[%s12261_s11 + $0xec8] sm:$0xff]  ;;  %v7485_v51 = vld [vmem:[%s12261_s11 + $0xff0] sm:$0xff] }
0x13bb   :  { %v9057_v37 = vpack.c.bf16 %v7430_v33, %v7429_v27  ;;  %v9103_v33 = vpack.c.bf16 %v7486_v63, %v7485_v51 }
0x13bc   :  { %6552 = vmatmul.mubr.f32.vlgmr.msra.gmra.mrb[90].mxu1 %v5898_v58  ;;  %6627 = vmatmul.mubr.f32.vlgmr.msra.gmra.mrb[96].mxu0 %v5900_v1  ;;  %v7464_v58 = vld [vmem:[%s12261_s11 + $0xf48] sm:$0xff]  ;;  %v7449_v1 = vld [vmem:[%s12261_s11 + $0xed0] sm:$0xff] }
0x13bd   :  { %6556 = vmatprep.mubr.f32.mxu1 %v5915_v50  ;;  %6631 = vmatprep.mubr.f32.mxu0 %v5917_v61  ;;  %v7433_v61 = vld [vmem:[%s12261_s11 + $0xe50] sm:$0xff]  ;;  %v9063_v5 = vpack.c.bf16 %v7450_v23, %v7449_v1 }
0x13be   :  { %9046 = vmatpush3.bf16.msra.mxu1 %v9045_v46  ;;  %9078 = vmatpush3.bf16.msra.mxu0 %v9077_v49  ;;  %v7432_v46 = vld [vmem:[%s12261_s11 + $0xe48] sm:$0xff]  ;;  %v9059_v49 = vpack.c.bf16 %v7448_v13, %v7447_v7  ;;  %v5811_v7 = vadd.f32 %v11744_v40, %v12016_v41  ;;  %v5888_v13 = vadd.f32 %v11746_v14, %v12020_v45  ;;  %v7488_v41 = vld [vmem:[%s12263_s12 + $0x1] ss:$0 sm:$0xff] }
0x13bf   :  { %9048 = vmatprep.subr.bf16.mxu1 %v9047_v29  ;;  %9080 = vmatprep.subr.bf16.mxu0 %v9079_v4  ;;  %v9091_v29 = vpack.c.bf16 %v7480_v35, %v7479_v62  ;;  %v7463_v4 = vld [vmem:[%s12261_s11 + $0xf40] sm:$0xff]  ;;  %v9061_v34 = vpack.c.bf16 %v7432_v46, %v7431_v55 }
0x13c0   :  { %6557 = vmatmul.mubr.f32.gmra.mrb[92].mxu1 %v5914_v22  ;;  %6632 = vmatmul.mubr.f32.gmra.mrb[98].mxu0 %v5916_v25  ;;  %v9093_v50 = vpack.c.bf16 %v7464_v58, %v7463_v4  ;;  %v7484_v22 = vld [vmem:[%s12261_s11 + $0xfe8] sm:$0xff]  ;;  %v9065_v25 = vpack.c.bf16 %v7434_v38, %v7433_v61  ;;  %v5919_v55 = vmax.f32 %v5811_v7, 0.0 }
0x13c1   :  { %6701 = vmatprep.mubr.f32.mxu1 %v5903_v60  ;;  %6776 = vmatprep.mubr.f32.mxu0 %v5905_v24  ;;  %v9099_v60 = vpack.c.bf16 %v7484_v22, %v7483_v17  ;;  %v7467_v24 = vld [vmem:[%s12261_s11 + $0xf60] sm:$0xff] }
0x13c2   :  { %9050 = vmatpush3.bf16.msra.mxu1 %v9049_v36  ;;  %9082 = vmatpush3.bf16.msra.mxu0 %v9081_v11  ;;  %v9097_v36 = vpack.c.bf16 %v7466_v59, %v7465_v2  ;;  %v7435_v11 = vld [vmem:[%s12261_s11 + $0xe60] sm:$0xff] }
0x13c3   :  { %9052 = vmatprep.subr.bf16.mxu1 %v9051_v8  ;;  %9084 = vmatprep.subr.bf16.mxu0 %v9083_v30  ;;  %v7468_v8 = vld [vmem:[%s12261_s11 + $0xf68] sm:$0xff]  ;;  %v7453_v30 = vld [vmem:[%s12261_s11 + $0xef0] sm:$0xff]  ;;  %v9069_v52 = vpack.c.bf16 %v7436_v12, %v7435_v11 }
0x13c4   :  { %v9101_v56 = vpack.c.bf16 %v7468_v8, %v7467_v24  ;;  %v9071_v27 = vpack.c.bf16 %v7454_v0, %v7453_v30 }
0x13c6   :  { %9054 = vmatpush3.bf16.msra.mxu1 %v9053_v42  ;;  %9086 = vmatpush3.bf16.msra.mxu0 %v9085_v3  ;;  %v7437_v42 = vld [vmem:[%s12261_s11 + $0xe70] sm:$0xff]  ;;  %v5247_v3 = vrot.slane %v11766_v53, %v10292_v48  ;;  %v5803_v53 = vadd.f32 %v11695_v39, %v5239_v9  ;;  %v5921_v39 = vmax.f32 %v5888_v13, 0.0 }
0x13c7   :  { %9056 = vmatprep.subr.bf16.mxu1 %v9055_v54  ;;  %9088 = vmatprep.subr.bf16.mxu0 %v9087_v44  ;;  %v7438_v54 = vld [vmem:[%s12261_s11 + $0xe78] sm:$0xff] }
0x13c8   :  { %v7470_v44 = vld [vmem:[%s12261_s11 + $0xf78] sm:$0xff]  ;;  %v9073_v31 = vpack.c.bf16 %v7438_v54, %v7437_v42  ;;  %v5880_v21 = vadd.f32 %v11697_v20, %v5247_v3  ;;  %v5902_v62 = vmax.f32 %v5803_v53, 0.0 }
0x13c9   :  { %v9105_v48 = vpack.c.bf16 %v7470_v44, %v7469_v32 }
0x13ca   :  { %9058 = vmatpush3.bf16.msra.mxu1 %v9057_v37  ;;  %9090 = vmatpush3.bf16.msra.mxu0 %v9089_v47  ;;  %v5904_v35 = vmax.f32 %v5880_v21, 0.0  ;;  %v5809_v37 = vadd.f32 %v11729_v57, %v5239_v9  ;;  %v5886_v47 = vadd.f32 %v11731_v43, %v5247_v3 }
0x13cb   :  { %9060 = vmatprep.subr.bf16.mxu1 %v9059_v49  ;;  %9092 = vmatprep.subr.bf16.mxu0 %v9091_v29 }
0x13cc   :  { %v5918_v20 = vmax.f32 %v5809_v37, 0.0  ;;  %v5920_v46 = vmax.f32 %v5886_v47, 0.0 }
0x13ce   :  { %9062 = vmatpush3.bf16.msra.mxu1 %v9061_v34  ;;  %9094 = vmatpush3.bf16.msra.mxu0 %v9093_v50 }
0x13cf   :  { %9064 = vmatprep.subr.bf16.mxu1 %v9063_v5  ;;  %9096 = vmatprep.subr.bf16.mxu0 %v9095_v6 }
0x13d2   :  { %9066 = vmatpush3.bf16.msra.mxu1 %v9065_v25  ;;  %9098 = vmatpush3.bf16.msra.mxu0 %v9097_v36 }
0x13d3   :  { %9068 = vmatprep.subr.bf16.mxu1 %v9067_v18  ;;  %9100 = vmatprep.subr.bf16.mxu0 %v9099_v60 }
0x13d6   :  { %9070 = vmatpush3.bf16.msra.mxu1 %v9069_v52  ;;  %9102 = vmatpush3.bf16.msra.mxu0 %v9101_v56 }
0x13d7   :  { %9072 = vmatprep.subr.bf16.mxu1 %v9071_v27  ;;  %9104 = vmatprep.subr.bf16.mxu0 %v9103_v33 }
0x13da   :  { %9074 = vmatpush3.bf16.msra.mxu1 %v9073_v31  ;;  %9106 = vmatpush3.bf16.msra.mxu0 %v9105_v48 }
0x13dd   :  { %6702 = vmatmul.mubr.f32.vlgmr.msra.gmra.mrb[94].mxu1 %v5902_v62  ;;  %6777 = vmatmul.mubr.f32.vlgmr.msra.gmra.mrb[100].mxu0 %v5904_v35 }
0x13de   :  { %6706 = vmatprep.mubr.f32.mxu1 %v5919_v55  ;;  %6781 = vmatprep.mubr.f32.mxu0 %v5921_v39 }
0x13e1   :  { %6707 = vmatmul.mubr.f32.gmra.mrb[96].mxu1 %v5918_v20  ;;  %6782 = vmatmul.mubr.f32.gmra.mrb[102].mxu0 %v5920_v46 }
0x144e   :  { %v7926_v40 = vpop.f32.mrb[82].mxu1  ;;  %v7964_v14 = vpop.f32.mrb[88].mxu0 }
0x144f   :  { %v7927_v45 = vpop.f32.mrb[83].mxu1  ;;  %v7965_v57 = vpop.f32.mrb[89].mxu0 }
0x1450   :  { %v7928_v49 = vadd.f32 %v7927_v45, %v7926_v40  ;;  %v7966_v43 = vadd.f32 %v7965_v57, %v7964_v14 }
0x1452   :  { %v6254_v29 = vadd.f32 %v7928_v49, %v7488_v41  ;;  %v7929_v4 = vpop.f32.mrb[84].mxu1  ;;  %v7967_v58 = vpop.f32.mrb[90].mxu0 }
0x1453   :  { %v7930_v1 = vpop.f32.mrb[85].mxu1  ;;  %v7968_v23 = vpop.f32.mrb[91].mxu0 }
0x1454   :  { %v6329_v28 = vadd.f32 %v7966_v43, %v6254_v29  ;;  %v7931_v19 = vadd.f32 %v7930_v1, %v7929_v4  ;;  %v7969_v34 = vadd.f32 %v7968_v23, %v7967_v58 }
0x1456   :  { %v6259_v50 = vadd.f32 %v7931_v19, %v7488_v41 }
0x1458   :  { %v6334_v61 = vadd.f32 %v7969_v34, %v6259_v50 }
0x146e   :  { %v8002_v38 = vpop.f32.mrb[86].mxu1  ;;  %v8040_v5 = vpop.f32.mrb[92].mxu0 }
0x146f   :  { %v8003_v6 = vpop.f32.mrb[87].mxu1  ;;  %v8041_v2 = vpop.f32.mrb[93].mxu0 }
0x1470   :  { %v8004_v59 = vadd.f32 %v8003_v6, %v8002_v38  ;;  %v8042_v16 = vadd.f32 %v8041_v2, %v8040_v5  ;;  %v6837_v5 = vld [vmem:[%s12266_s15 + $0x10] sm:$0xff]  ;;  %v6838_v6 = vld [vmem:[%s12266_s15 + $0x18] sm:$0xff] }
0x1471   :  { %v9111_v2 = vpack.c.bf16 %v6838_v6, %v6837_v5 }
0x1472   :  { %v6404_v26 = vadd.f32 %v8004_v59, %v6329_v28  ;;  %v8005_v17 = vpop.f32.mrb[88].mxu1  ;;  %v8043_v22 = vpop.f32.mrb[94].mxu0 }
0x1473   :  { %v8006_v25 = vpop.f32.mrb[89].mxu1  ;;  %v8044_v36 = vpop.f32.mrb[95].mxu0 }
0x1474   :  { %v6479_v11 = vadd.f32 %v8042_v16, %v6404_v26  ;;  %v8007_v12 = vadd.f32 %v8006_v25, %v8005_v17  ;;  %v8045_v18 = vadd.f32 %v8044_v36, %v8043_v22 }
0x1476   :  { %v6409_v60 = vadd.f32 %v8007_v12, %v6334_v61  ;;  %v6836_v61 = vld [vmem:[%s12266_s15 + $0x8] sm:$0xff] }
0x1478   :  { %v6484_v24 = vadd.f32 %v8045_v18, %v6409_v60  ;;  %v7492_v18 = vld [vmem:[%s12265_s14 + $0x1] ss:$0 sm:$0xff] }
0x148f   :  { %v8078_v8 = vpop.f32.mrb[90].mxu1  ;;  %v8116_v30 = vpop.f32.mrb[96].mxu0 }
0x1490   :  { %v8079_v0 = vpop.f32.mrb[91].mxu1  ;;  %v8117_v51 = vpop.f32.mrb[97].mxu0 }
0x1491   :  { %v8080_v63 = vadd.f32 %v8079_v0, %v8078_v8  ;;  %v8118_v9 = vadd.f32 %v8117_v51, %v8116_v30 }
0x1493   :  { %v6554_v52 = vadd.f32 %v8080_v63, %v6479_v11  ;;  %v8081_v56 = vpop.f32.mrb[92].mxu1  ;;  %v8119_v42 = vpop.f32.mrb[98].mxu0  ;;  %v7491_v11 = vld [vmem:[%s12264_s13 + $0x1] ss:$0 sm:$0xff] }
0x1494   :  { %v8082_v3 = vpop.f32.mrb[93].mxu1  ;;  %v8120_v27 = vpop.f32.mrb[99].mxu0  ;;  %v6929_v63 = vld [vmem:[%s12267_s17] sm:$0xff] }
0x1495   :  { %v6629_v33 = vadd.f32 %v8118_v9, %v6554_v52  ;;  %v8083_v54 = vadd.f32 %v8082_v3, %v8081_v56  ;;  %v8121_v32 = vadd.f32 %v8120_v27, %v8119_v42  ;;  %v6930_v9 = vld [vmem:[%s12267_s17 + $0x8] sm:$0xff]  ;;  %v7493_v56 = vld [vmem:[%s12268_s16] ss:$0 sm:$0xff] }
0x1496   :  { %v9115_v52 = vpack.c.bf16 %v6930_v9, %v6929_v63 }
0x1497   :  { %v6559_v44 = vadd.f32 %v8083_v54, %v6484_v24 }
0x1499   :  { %v6634_v31 = vadd.f32 %v8121_v32, %v6559_v44  ;;  %v7496_v44 = vld [vmem:[%s12269_s18] ss:$0 sm:$0xff] }
0x14b0   :  { %v8154_v48 = vpop.f32.mrb[94].mxu1  ;;  %v8192_v53 = vpop.f32.mrb[100].mxu0 }
0x14b1   :  { %v8155_v21 = vpop.f32.mrb[95].mxu1  ;;  %v8193_v7 = vpop.f32.mrb[101].mxu0 }
0x14b2   :  { %v8156_v13 = vadd.f32 %v8155_v21, %v8154_v48  ;;  %v8194_v62 = vadd.f32 %v8193_v7, %v8192_v53 }
0x14b4   :  { %v6704_v35 = vadd.f32 %v8156_v13, %v6629_v33  ;;  %v8157_v37 = vpop.f32.mrb[96].mxu1  ;;  %v8195_v47 = vpop.f32.mrb[102].mxu0 }
0x14b5   :  { %v8158_v55 = vpop.f32.mrb[97].mxu1  ;;  %v8196_v39 = vpop.f32.mrb[103].mxu0 }
0x14b6   :  { %v6779_v20 = vadd.f32 %v8194_v62, %v6704_v35  ;;  %v8159_v46 = vadd.f32 %v8158_v55, %v8157_v37  ;;  %v8197_v40 = vadd.f32 %v8196_v39, %v8195_v47 }
0x14b8   :  { %v6709_v14 = vadd.f32 %v8159_v46, %v6634_v31  ;;  %v6787_v41 = vadd.f32 %v6779_v20, %v11141_v15 }
0x14ba   :  { %v6784_v45 = vadd.f32 %v8197_v40, %v6709_v14  ;;  %v6793_v57 = vsel %vm189_vm4, %v6787_v41, 0.0 }
0x14bb   :  { %6794 = vadd.xlane.f32.xlu0 %v6793_v57 }
0x14bc   :  { %v6788_v49 = vadd.f32 %v6784_v45, %v11171_v10  ;;  %v6835_v10 = vld [vmem:[%s12266_s15] sm:$0xff] }
0x14bd   :  { %v9107_v38 = vpack.c.bf16 %v6836_v61, %v6835_v10 }
0x14be   :  { %v6796_v43 = vsel %vm189_vm4, %v6788_v49, 0.0 }
0x14bf   :  { %6797 = vadd.xlane.f32.xlu1 %v6796_v43  ;;  %9108 = vmatprep.subr.bf16.mxu1 %v9107_v38 }
0x14c0   :  { %9110 = vmatpush3.bf16.msra.mxu1 %v9107_v38 }
0x14c1   :  { %9112 = vmatprep.subr.bf16.mxu1 %v9111_v2 }
0x14c4   :  { %9114 = vmatpush3.bf16.msra.mxu1 %v9111_v2 }
0x14c5   :  { %9116 = vmatprep.subr.bf16.mxu1 %v9115_v52 }
0x1548   :  { %v6795_v29 = vpop.xlane.xlu0 %6794 }
0x1549   :  { %v6799_v4 = vmul.f32 0.03125, %v6795_v29 }
0x154b   :  { %v6801_v58 = vsub.f32 %v6787_v41, %v6799_v4 }
0x154c   :  { %v6798_v1 = vpop.xlane.xlu1 %6797 }
0x154d   :  { %v6800_v23 = vmul.f32 0.03125, %v6798_v1  ;;  %v6803_v28 = vmul.f32 %v6801_v58, %v6801_v58 }
0x154f   :  { %v6802_v19 = vsub.f32 %v6788_v49, %v6800_v23  ;;  %v6805_v34 = vsel %vm189_vm4, %v6803_v28, 0.0 }
0x1550   :  { %6806 = vadd.xlane.f32.xlu0 %v6805_v34 }
0x1551   :  { %v6804_v15 = vmul.f32 %v6802_v19, %v6802_v19 }
0x1553   :  { %v6808_v50 = vsel %vm189_vm4, %v6804_v15, 0.0 }
0x1554   :  { %6809 = vadd.xlane.f32.xlu1 %v6808_v50 }
0x15dd   :  { %v6807_v59 = vpop.xlane.xlu0 %6806 }
0x15de   :  { %v6811_v16 = vmul.f32 0.03125, %v6807_v59 }
0x15e0   :  { %v6813_v26 = vadd.f32 1e-05, %v6811_v16 }
0x15e1   :  { %v6810_v17 = vpop.xlane.xlu1 %6809 }
0x15e2   :  { %9208 = vrsqrt.f32 %v6813_v26  ;;  %v6812_v22 = vmul.f32 0.03125, %v6810_v17 }
0x15e4   :  { %v6814_v25 = vadd.f32 1e-05, %v6812_v22 }
0x15e6   :  { %9210 = vrsqrt.f32 %v6814_v25 }
0x15ec   :  { %v9209_v36 = vpop.eup %9208 }
0x15ed   :  { %v6817_v12 = vmul.f32 %v9209_v36, %v6801_v58 }
0x15ef   :  { %v6825_v60 = vmul.f32 %v7491_v11, %v6817_v12 }
0x15f0   :  { %v9211_v24 = vpop.eup %9210 }
0x15f1   :  { %v6818_v8 = vmul.f32 %v9211_v24, %v6802_v19  ;;  %v6833_v30 = vadd.f32 %v7492_v18, %v6825_v60 }
0x15f3   :  { %v6826_v0 = vmul.f32 %v7491_v11, %v6818_v8  ;;  %8425 = vmatprep.mubr.msk.f32.mxu1 %vm189_vm4, %v6833_v30 }
0x15f5   :  { %v6834_v51 = vadd.f32 %v7492_v18, %v6826_v0 }
0x15f7   :  { %8426 = vmatmul.mubr.msk.f32.vlgmr.msra.gmra.mrb[98].mxu1 %vm189_vm4, %v6834_v51 }
0x15f8   :  { %9118 = vmatpush3.bf16.msra.mxu1 %v9115_v52 }
0x16ca   :  { %v8427_v42 = vpop.f32.mrb[98].mxu1 }
0x16cb   :  { %v6924_v3 = vadd.f32 %v8427_v42, %v7493_v56  ;;  %v6918_v27 = vpop.f32.mrb[99].mxu1 }
0x16cc   :  { %v6919_v33 = vadd.f32 %v7493_v56, %v6918_v27 }
0x16cd   :  { %v6928_v32 = vmax.f32 %v6924_v3, 0.0 }
0x16ce   :  { %v6927_v54 = vmax.f32 %v6919_v33, 0.0 }
0x16d0   :  { %8432 = vmatprep.mubr.msk.f32.mxu1 %vm1648_vm8, %v6927_v54 }
0x16d1   :  { %8433 = vmatmul.mubr.msk.f32.vlgmr.msra.gmra.mrb[100].mxu1 %vm1648_vm8, %v6928_v32 }
0x17a4   :  { %v8434_v31 = vpop.f32.mrb[100].mxu1 }
0x17a5   :  { %v7016_v48 = vadd.f32 %v8434_v31, %v7496_v44  ;;  %v7010_v53 = vpop.f32.mrb[101].mxu1 }
0x17a6   :  { %v7011_v21 = vadd.f32 %v7496_v44, %v7010_v53 }
0x17a7   :  { %v7023_v7 = vsel %vm7019_vm10, %v7016_v48, -inf }
0x17a8   :  { %7024 = vmax.xlane.f32.xlu1 %v7023_v7  ;;  %v7020_v13 = vsel %vm7019_vm10, %v7011_v21, -inf }
0x17a9   :  { %7021 = vmax.xlane.f32.xlu0 %v7020_v13 }
0x1835   :  { %v7025_v62 = vpop.xlane.xlu1 %7024 }
0x1836   :  { %v7027_v35 = vsub.f32 %v7016_v48, %v7025_v62  ;;  %v7022_v37 = vpop.xlane.xlu0 %7021 }
0x1837   :  { %v7026_v47 = vsub.f32 %v7011_v21, %v7022_v37 }
0x1838   :  { %v7030_v55 = vmul.f32 1.442695, %v7027_v35 }
0x1839   :  { %v7028_v39 = vmul.f32 1.442695, %v7026_v47 }
0x183a   :  { %9212 = vpow2.f32 %v7030_v55 }
0x183b   :  { %9214 = vpow2.f32 %v7028_v39 }
0x1844   :  { %v9213_v20 = vpop.eup %9212 }
0x1845   :  { %v9215_v46 = vpop.eup %9214  ;;  %v7035_v40 = vsel %vm7019_vm10, %v9213_v20, 0.0 }
0x1846   :  { %7036 = vadd.xlane.f32.xlu1 %v7035_v40  ;;  %v7032_v14 = vsel %vm7019_vm10, %v9215_v46, 0.0 }
0x1847   :  { %7033 = vadd.xlane.f32.xlu0 %v7032_v14 }
0x18d3   :  { %v7037_v41 = vpop.xlane.xlu1 %7036 }
0x18d4   :  { %9216 = vlog2.f32 %v7037_v41  ;;  %v7034_v45 = vpop.xlane.xlu0 %7033 }
0x18d5   :  { %9218 = vlog2.f32 %v7034_v45 }
0x18de   :  { %v9217_v57 = vpop.eup %9216 }
0x18df   :  { %v9219_v49 = vpop.eup %9218  ;;  %v7041_v43 = vmul.f32 0.6931472, %v9217_v57 }
0x18e0   :  { %v7039_v29 = vmul.f32 0.6931472, %v9219_v49 }
0x18e1   :  { %v7043_v4 = vsub.f32 %v7027_v35, %v7041_v43 }
0x18e2   :  { %v7042_v58 = vsub.f32 %v7026_v47, %v7039_v29 }
0x18e3   :  { %7045 = vst.msk [vmem:[%s12270_s19 + $0x8] sm:$0xff] %vm7019_vm10, %v7043_v4 }
0x18e4   :  { %7044 = vst.msk [vmem:[%s12270_s19] sm:$0xff] %vm7019_vm10, %v7042_v58 }

</bundles_post_ra>
